<compile_context>
chip_gen: v7x
topology: tpu7x:2x2x1
jax: 0.10.0
libtpu: 0.0.40
codegen_flags: <defaults>
</compile_context>

<pallas_src>
import jax
import jax.numpy as jnp
from jax.experimental import pallas as pl
from jax.experimental.pallas import tpu as pltpu

_VMEM_LIMIT = 32 * 1024 * 1024  # explicit scoped-VMEM budget (safe on v5e/v6e/v7x)


def _row_tile(rows, cols, bytes_per_elem=4, target_bytes=4 * 1024 * 1024):
    """Largest row-tile that divides `rows`, is a multiple of 8 and keeps one block
    around `target_bytes` (so double-buffering fits comfortably in VMEM)."""
    max_rows = max(8, target_bytes // max(1, cols * bytes_per_elem))
    for t in range(min(rows, max_rows), 7, -1):
        if rows % t == 0 and t % 8 == 0:
            return t
    return rows  # full extent is always a legal block size


# ----------------------------- kernel 1: 3x3 conv + BN partial stats -----------------
def _conv3x3_stats_kernel(xp_ref, w_ref, o_ref, s_ref, ss_ref, col_ref):
    # xp_ref : (1, H+2, W+2, Cin) bf16 zero-padded input for this batch element
    # w_ref  : (9*Cin, Cout)      bf16 weights flattened in (kh, kw, cin) order
    # o_ref  : (1, H, W, Cout)    f32 conv output
    # s_ref  : (1, 1, Cout)       f32 per-batch-element channel sum   (BN partial)
    # ss_ref : (1, 1, Cout)       f32 per-batch-element channel sumsq (BN partial)
    # col_ref: (H*W, 9*Cin)       bf16 VMEM scratch (im2col buffer)
    _, H, W, Cout = o_ref.shape
    Cin = xp_ref.shape[3]

    # im2col: pack the 9 shifted windows along the contraction axis so the MXU sees a
    # single matmul with K = 9*Cin instead of 9 shallow K = Cin matmuls.
    for kh in range(3):
        for kw in range(3):
            t = kh * 3 + kw
            col_ref[:, t * Cin:(t + 1) * Cin] = (
                xp_ref[0, kh:kh + H, kw:kw + W, :].reshape(H * W, Cin))

    acc = jnp.dot(col_ref[...], w_ref[...],
                  preferred_element_type=jnp.float32)            # (H*W, Cout) f32

    o_ref[0] = acc.reshape(H, W, Cout).astype(o_ref.dtype)

    # Per-batch-element BN partials; reduced over N in the wrapper so the batch grid
    # axis stays "parallel" (usable by both TensorCores on v7x).
    s_ref[0] = jnp.sum(acc, axis=0, keepdims=True)
    ss_ref[0] = jnp.sum(acc * acc, axis=0, keepdims=True)


def _conv3x3_with_stats(x_nhwc, w_oihw):
    """'Same' 3x3 conv (stride 1, no bias) + per-batch BN stat partials."""
    N, H, W, Cin = x_nhwc.shape
    Cout = w_oihw.shape[0]

    # zero halo + bf16 MXU operands (accumulation stays f32 inside the kernel)
    x_pad = jnp.pad(x_nhwc.astype(jnp.bfloat16), ((0, 0), (1, 1), (1, 1), (0, 0)))
    w_flat = (jnp.transpose(w_oihw, (2, 3, 1, 0))        # (3, 3, Cin, Cout)
              .reshape(9 * Cin, Cout).astype(jnp.bfloat16))

    # TODO(synk): for very large feature maps on v7x (64 MiB VMEM), additionally tile
    # the H dimension with a +2 halo instead of one whole image per grid step.
    conv_out, s_part, ss_part = pl.pallas_call(
        _conv3x3_stats_kernel,
        out_shape=(
            jax.ShapeDtypeStruct((N, H, W, Cout), jnp.float32),
            jax.ShapeDtypeStruct((N, 1, Cout), jnp.float32),
            jax.ShapeDtypeStruct((N, 1, Cout), jnp.float32),
        ),
        grid_spec=pltpu.PrefetchScalarGridSpec(
            num_scalar_prefetch=0,
            grid=(N,),
            in_specs=[
                pl.BlockSpec((1, H + 2, W + 2, Cin), lambda n: (n, 0, 0, 0)),
                pl.BlockSpec((9 * Cin, Cout), lambda n: (0, 0)),
            ],
            out_specs=[
                pl.BlockSpec((1, H, W, Cout), lambda n: (n, 0, 0, 0)),
                pl.BlockSpec((1, 1, Cout), lambda n: (n, 0, 0)),
                pl.BlockSpec((1, 1, Cout), lambda n: (n, 0, 0)),
            ],
            scratch_shapes=[pltpu.VMEM((H * W, 9 * Cin), jnp.bfloat16)],
        ),
        compiler_params=pltpu.CompilerParams(
            dimension_semantics=("parallel",),
            vmem_limit_bytes=_VMEM_LIMIT),
    )(x_pad, w_flat)

    return conv_out, s_part, ss_part


def _bn_scale_shift(s_part, ss_part, count, gamma, beta, eps):
    """Fold training-mode BN (batch stats, biased variance) into per-channel affine."""
    mean = jnp.sum(s_part, axis=(0, 1)) / count
    var = jnp.maximum(jnp.sum(ss_part, axis=(0, 1)) / count - mean * mean, 0.0)
    # TODO(synk): for very large N*H*W accumulate stats around a shifted mean to avoid
    # E[x^2]-E[x]^2 cancellation.
    scale = gamma.astype(jnp.float32) / jnp.sqrt(var + eps)
    shift = beta.astype(jnp.float32) - mean * scale
    return scale, shift


# ----------------------------- kernel 2/3: fused BN (+residual) + ReLU ---------------
def _bn_relu_kernel(y_ref, sc_ref, sh_ref, o_ref):
    y = y_ref[...].astype(jnp.float32)
    o_ref[...] = jnp.maximum(y * sc_ref[...] + sh_ref[...], 0.0).astype(o_ref.dtype)


def _bn_add_relu_kernel(y_ref, res_ref, sc_ref, sh_ref, o_ref):
    y = y_ref[...].astype(jnp.float32)
    r = res_ref[...].astype(jnp.float32)
    o_ref[...] = jnp.maximum(y * sc_ref[...] + sh_ref[...] + r, 0.0).astype(o_ref.dtype)


def _bn_act(y_nhwc, scale, shift, residual=None, out_dtype=jnp.float32):
    """Affine BN (+ optional residual add) + ReLU on a lane-dense (N*H, W*C) view so
    loads/stores are full-width (unmasked) and blocks are large."""
    N, H, W, C = y_nhwc.shape
    rows, cols = N * H, W * C
    y2 = y_nhwc.reshape(rows, cols)
    sc = jnp.tile(scale, W).reshape(1, cols)   # channel index cycles fastest
    sh = jnp.tile(shift, W).reshape(1, cols)
    tr = _row_tile(rows, cols)

    row_spec = pl.BlockSpec((tr, cols), lambda i: (i, 0))
    vec_spec = pl.BlockSpec((1, cols), lambda i: (0, 0))

    if residual is None:
        kernel = _bn_relu_kernel
        operands = (y2, sc, sh)
        in_specs = [row_spec, vec_spec, vec_spec]
    else:
        kernel = _bn_add_relu_kernel
        operands = (y2, residual.reshape(rows, cols), sc, sh)
        in_specs = [row_spec, row_spec, vec_spec, vec_spec]

    out = pl.pallas_call(
        kernel,
        out_shape=jax.ShapeDtypeStruct((rows, cols), out_dtype),
        grid_spec=pltpu.PrefetchScalarGridSpec(
            num_scalar_prefetch=0,
            grid=(rows // tr,),
            in_specs=in_specs,
            out_specs=row_spec,
        ),
        compiler_params=pltpu.CompilerParams(
            dimension_semantics=("parallel",),
            vmem_limit_bytes=_VMEM_LIMIT),
    )(*operands)
    return out.reshape(N, H, W, C)


# ----------------------------- full residual block -----------------------------------
def basic_residual_block(x_nchw, w1, gamma1, beta1, w2, gamma2, beta2, eps=1e-5):
    """Forward pass of BasicResidualBlock (stride=1, identity shortcut), BN in training
    mode. Accepts/returns NCHW to match the PyTorch module; kernels run in NHWC."""
    # TODO(synk): stride != 1 and the optional 1x1-conv+BN downsample branch are not
    # implemented (only the default identity-shortcut configuration).
    N, Cin, H, W = x_nchw.shape
    Cout = w1.shape[0]
    assert Cin == Cout, "identity shortcut requires in_channel == out_channel"

    x_nhwc = jnp.transpose(x_nchw, (0, 2, 3, 1)).astype(jnp.float32)
    count = jnp.float32(N * H * W)

    # conv1 -> bn1 -> relu   (output stored bf16: conv2 consumes bf16 MXU operands)
    y1, s1, ss1 = _conv3x3_with_stats(x_nhwc, w1)
    scale1, shift1 = _bn_scale_shift(s1, ss1, count, gamma1, beta1, eps)
    r1 = _bn_act(y1, scale1, shift1, out_dtype=jnp.bfloat16)

    # conv2 -> bn2 -> (+identity) -> relu
    y2, s2, ss2 = _conv3x3_with_stats(r1, w2)
    scale2, shift2 = _bn_scale_shift(s2, ss2, count, gamma2, beta2, eps)
    out = _bn_act(y2, scale2, shift2, residual=x_nhwc, out_dtype=jnp.float32)

    return jnp.transpose(out, (0, 3, 1, 2))  # back to NCHW


if __name__ == "__main__":
    key = jax.random.PRNGKey(0)
    N, C, H, W = 2, 8, 16, 16          # identity shortcut => in_ch == out_ch
    k1, k2, k3, k4, k5, k6, k7 = jax.random.split(key, 7)

    x = jax.random.normal(k1, (N, C, H, W), jnp.float32)
    w1 = jax.random.normal(k2, (C, C, 3, 3), jnp.float32) * 0.1
    w2 = jax.random.normal(k3, (C, C, 3, 3), jnp.float32) * 0.1
    gamma1 = 1.0 + 0.1 * jax.random.normal(k4, (C,), jnp.float32)
    beta1 = 0.1 * jax.random.normal(k5, (C,), jnp.float32)
    gamma2 = 1.0 + 0.1 * jax.random.normal(k6, (C,), jnp.float32)
    beta2 = 0.1 * jax.random.normal(k7, (C,), jnp.float32)

    out = basic_residual_block(x, w1, gamma1, beta1, w2, gamma2, beta2)
    out = jax.block_until_ready(out)

    # ---------------- pure-JAX reference (same bf16 MXU operand precision) -----------
    eps = 1e-5

    def conv_ref(inp, w):
        return jax.lax.conv_general_dilated(
            inp.astype(jnp.bfloat16), w.astype(jnp.bfloat16),
            window_strides=(1, 1), padding="SAME",
            dimension_numbers=("NCHW", "OIHW", "NCHW"),
            preferred_element_type=jnp.float32)

    def bn_ref(y, g, b):
        mean = y.mean(axis=(0, 2, 3))
        var = y.var(axis=(0, 2, 3))                      # biased, training-mode
        scale = g / jnp.sqrt(var + eps)
        shift = b - mean * scale
        return y * scale[None, :, None, None] + shift[None, :, None, None]

    y1_ref = conv_ref(x, w1)
    r1_ref = jnp.maximum(bn_ref(y1_ref, gamma1, beta1), 0.0).astype(jnp.bfloat16)
    y2_ref = conv_ref(r1_ref.astype(jnp.float32), w2)
    ref = jnp.maximum(bn_ref(y2_ref, gamma2, beta2) + x, 0.0)

    assert out.shape == (N, C, H, W)
    # tolerance accounts for bf16 MXU operands / bf16 intermediate quantization
    assert jnp.allclose(out, ref, atol=2e-2, rtol=2e-2), \
        float(jnp.max(jnp.abs(out - ref)))

    print("KERNEL_OK")
</pallas_src>

<mosaic_0001>
module attributes {stable_mosaic.version = 11 : i64} {
  func.func @_conv3x3_stats_kernel(%arg0: i32, %arg1: memref<1x18x18x8xbf16, #tpu.memory_space<vmem>>, %arg2: memref<72x8xbf16, #tpu.memory_space<vmem>>, %arg3: memref<1x16x16x8xf32, #tpu.memory_space<vmem>>, %arg4: memref<1x1x8xf32, #tpu.memory_space<vmem>>, %arg5: memref<1x1x8xf32, #tpu.memory_space<vmem>>, %arg6: memref<256x72xbf16, #tpu.memory_space<vmem>>) attributes {dimension_semantics = [#tpu.dimension_semantics<parallel>], iteration_bounds = array<i64: 2>, scalar_prefetch = 0 : i64, scratch_operands = 1 : i64, tpu.core_type = #tpu.core_type<tc>, window_params = [{transform_indices = @transform_0, window_bounds = array<i64: 1, 18, 18, 8>}, {pipeline_mode = #tpu.pipeline_mode<synchronous>, transform_indices = @transform_1, window_bounds = array<i64: 72, 8>}, {transform_indices = @transform_2, window_bounds = array<i64: 1, 16, 16, 8>}, {transform_indices = @transform_3, window_bounds = array<i64: 1, 1, 8>}, {transform_indices = @transform_4, window_bounds = array<i64: 1, 1, 8>}]} {
    %c0 = arith.constant 0 : index
    %c0_0 = arith.constant 0 : index
    %c0_1 = arith.constant 0 : index
    %c0_2 = arith.constant 0 : index
    %0 = vector.load %arg1[%c0, %c0_0, %c0_1, %c0_2] : memref<1x18x18x8xbf16, #tpu.memory_space<vmem>>, vector<1x16x16x8xbf16>
    %1 = vector.shape_cast %0 : vector<1x16x16x8xbf16> to vector<16x16x8xbf16>
    %2 = vector.shape_cast %1 : vector<16x16x8xbf16> to vector<256x8xbf16>
    %c0_3 = arith.constant 0 : index
    %c0_4 = arith.constant 0 : index
    %3 = vector.load %arg6[%c0_3, %c0_4] : memref<256x72xbf16, #tpu.memory_space<vmem>>, vector<256x8xbf16>
    tpu.vector_store %arg6[%c0_3, %c0_4], %2 {strides = array<i32>} : memref<256x72xbf16, #tpu.memory_space<vmem>>, vector<256x8xbf16>,
    %c0_5 = arith.constant 0 : index
    %c0_6 = arith.constant 0 : index
    %c1 = arith.constant 1 : index
    %c0_7 = arith.constant 0 : index
    %4 = vector.load %arg1[%c0_5, %c0_6, %c1, %c0_7] : memref<1x18x18x8xbf16, #tpu.memory_space<vmem>>, vector<1x16x16x8xbf16>
    %5 = vector.shape_cast %4 : vector<1x16x16x8xbf16> to vector<16x16x8xbf16>
    %6 = vector.shape_cast %5 : vector<16x16x8xbf16> to vector<256x8xbf16>
    %c0_8 = arith.constant 0 : index
    %c8 = arith.constant 8 : index
    %7 = vector.load %arg6[%c0_8, %c8] : memref<256x72xbf16, #tpu.memory_space<vmem>>, vector<256x8xbf16>
    tpu.vector_store %arg6[%c0_8, %c8], %6 {strides = array<i32>} : memref<256x72xbf16, #tpu.memory_space<vmem>>, vector<256x8xbf16>,
    %c0_9 = arith.constant 0 : index
    %c0_10 = arith.constant 0 : index
    %c2 = arith.constant 2 : index
    %c0_11 = arith.constant 0 : index
    %8 = vector.load %arg1[%c0_9, %c0_10, %c2, %c0_11] : memref<1x18x18x8xbf16, #tpu.memory_space<vmem>>, vector<1x16x16x8xbf16>
    %9 = vector.shape_cast %8 : vector<1x16x16x8xbf16> to vector<16x16x8xbf16>
    %10 = vector.shape_cast %9 : vector<16x16x8xbf16> to vector<256x8xbf16>
    %c0_12 = arith.constant 0 : index
    %c16 = arith.constant 16 : index
    %11 = vector.load %arg6[%c0_12, %c16] : memref<256x72xbf16, #tpu.memory_space<vmem>>, vector<256x8xbf16>
    tpu.vector_store %arg6[%c0_12, %c16], %10 {strides = array<i32>} : memref<256x72xbf16, #tpu.memory_space<vmem>>, vector<256x8xbf16>,
    %c0_13 = arith.constant 0 : index
    %c1_14 = arith.constant 1 : index
    %c0_15 = arith.constant 0 : index
    %c0_16 = arith.constant 0 : index
    %12 = vector.load %arg1[%c0_13, %c1_14, %c0_15, %c0_16] : memref<1x18x18x8xbf16, #tpu.memory_space<vmem>>, vector<1x16x16x8xbf16>
    %13 = vector.shape_cast %12 : vector<1x16x16x8xbf16> to vector<16x16x8xbf16>
    %14 = vector.shape_cast %13 : vector<16x16x8xbf16> to vector<256x8xbf16>
    %c0_17 = arith.constant 0 : index
    %c24 = arith.constant 24 : index
    %15 = vector.load %arg6[%c0_17, %c24] : memref<256x72xbf16, #tpu.memory_space<vmem>>, vector<256x8xbf16>
    tpu.vector_store %arg6[%c0_17, %c24], %14 {strides = array<i32>} : memref<256x72xbf16, #tpu.memory_space<vmem>>, vector<256x8xbf16>,
    %c0_18 = arith.constant 0 : index
    %c1_19 = arith.constant 1 : index
    %c1_20 = arith.constant 1 : index
    %c0_21 = arith.constant 0 : index
    %16 = vector.load %arg1[%c0_18, %c1_19, %c1_20, %c0_21] : memref<1x18x18x8xbf16, #tpu.memory_space<vmem>>, vector<1x16x16x8xbf16>
    %17 = vector.shape_cast %16 : vector<1x16x16x8xbf16> to vector<16x16x8xbf16>
    %18 = vector.shape_cast %17 : vector<16x16x8xbf16> to vector<256x8xbf16>
    %c0_22 = arith.constant 0 : index
    %c32 = arith.constant 32 : index
    %19 = vector.load %arg6[%c0_22, %c32] : memref<256x72xbf16, #tpu.memory_space<vmem>>, vector<256x8xbf16>
    tpu.vector_store %arg6[%c0_22, %c32], %18 {strides = array<i32>} : memref<256x72xbf16, #tpu.memory_space<vmem>>, vector<256x8xbf16>,
    %c0_23 = arith.constant 0 : index
    %c1_24 = arith.constant 1 : index
    %c2_25 = arith.constant 2 : index
    %c0_26 = arith.constant 0 : index
    %20 = vector.load %arg1[%c0_23, %c1_24, %c2_25, %c0_26] : memref<1x18x18x8xbf16, #tpu.memory_space<vmem>>, vector<1x16x16x8xbf16>
    %21 = vector.shape_cast %20 : vector<1x16x16x8xbf16> to vector<16x16x8xbf16>
    %22 = vector.shape_cast %21 : vector<16x16x8xbf16> to vector<256x8xbf16>
    %c0_27 = arith.constant 0 : index
    %c40 = arith.constant 40 : index
    %23 = vector.load %arg6[%c0_27, %c40] : memref<256x72xbf16, #tpu.memory_space<vmem>>, vector<256x8xbf16>
    tpu.vector_store %arg6[%c0_27, %c40], %22 {strides = array<i32>} : memref<256x72xbf16, #tpu.memory_space<vmem>>, vector<256x8xbf16>,
    %c0_28 = arith.constant 0 : index
    %c2_29 = arith.constant 2 : index
    %c0_30 = arith.constant 0 : index
    %c0_31 = arith.constant 0 : index
    %24 = vector.load %arg1[%c0_28, %c2_29, %c0_30, %c0_31] : memref<1x18x18x8xbf16, #tpu.memory_space<vmem>>, vector<1x16x16x8xbf16>
    %25 = vector.shape_cast %24 : vector<1x16x16x8xbf16> to vector<16x16x8xbf16>
    %26 = vector.shape_cast %25 : vector<16x16x8xbf16> to vector<256x8xbf16>
    %c0_32 = arith.constant 0 : index
    %c48 = arith.constant 48 : index
    %27 = vector.load %arg6[%c0_32, %c48] : memref<256x72xbf16, #tpu.memory_space<vmem>>, vector<256x8xbf16>
    tpu.vector_store %arg6[%c0_32, %c48], %26 {strides = array<i32>} : memref<256x72xbf16, #tpu.memory_space<vmem>>, vector<256x8xbf16>,
    %c0_33 = arith.constant 0 : index
    %c2_34 = arith.constant 2 : index
    %c1_35 = arith.constant 1 : index
    %c0_36 = arith.constant 0 : index
    %28 = vector.load %arg1[%c0_33, %c2_34, %c1_35, %c0_36] : memref<1x18x18x8xbf16, #tpu.memory_space<vmem>>, vector<1x16x16x8xbf16>
    %29 = vector.shape_cast %28 : vector<1x16x16x8xbf16> to vector<16x16x8xbf16>
    %30 = vector.shape_cast %29 : vector<16x16x8xbf16> to vector<256x8xbf16>
    %c0_37 = arith.constant 0 : index
    %c56 = arith.constant 56 : index
    %31 = vector.load %arg6[%c0_37, %c56] : memref<256x72xbf16, #tpu.memory_space<vmem>>, vector<256x8xbf16>
    tpu.vector_store %arg6[%c0_37, %c56], %30 {strides = array<i32>} : memref<256x72xbf16, #tpu.memory_space<vmem>>, vector<256x8xbf16>,
    %c0_38 = arith.constant 0 : index
    %c2_39 = arith.constant 2 : index
    %c2_40 = arith.constant 2 : index
    %c0_41 = arith.constant 0 : index
    %32 = vector.load %arg1[%c0_38, %c2_39, %c2_40, %c0_41] : memref<1x18x18x8xbf16, #tpu.memory_space<vmem>>, vector<1x16x16x8xbf16>
    %33 = vector.shape_cast %32 : vector<1x16x16x8xbf16> to vector<16x16x8xbf16>
    %34 = vector.shape_cast %33 : vector<16x16x8xbf16> to vector<256x8xbf16>
    %c0_42 = arith.constant 0 : index
    %c64 = arith.constant 64 : index
    %35 = vector.load %arg6[%c0_42, %c64] : memref<256x72xbf16, #tpu.memory_space<vmem>>, vector<256x8xbf16>
    tpu.vector_store %arg6[%c0_42, %c64], %34 {strides = array<i32>} : memref<256x72xbf16, #tpu.memory_space<vmem>>, vector<256x8xbf16>,
    %c0_43 = arith.constant 0 : index
    %c0_44 = arith.constant 0 : index
    %36 = vector.load %arg6[%c0_43, %c0_44] : memref<256x72xbf16, #tpu.memory_space<vmem>>, vector<256x72xbf16>
    %c0_45 = arith.constant 0 : index
    %c0_46 = arith.constant 0 : index
    %37 = vector.load %arg2[%c0_45, %c0_46] : memref<72x8xbf16, #tpu.memory_space<vmem>>, vector<72x8xbf16>
    %cst = arith.constant dense<0.000000e+00> : vector<256x8xf32>
    %38 = tpu.matmul %36, %37, %cst {dimension_numbers = #tpu.dot_dimension_numbers<[1], [0], [0], [1], [0, 0, 1, 1], [], []>} : vector<256x72xbf16>, vector<72x8xbf16>, vector<256x8xf32> -> vector<256x8xf32>
    %39 = vector.shape_cast %38 : vector<256x8xf32> to vector<16x16x8xf32>
    %c0_47 = arith.constant 0 : index
    %c0_48 = arith.constant 0 : index
    %c0_49 = arith.constant 0 : index
    %c0_50 = arith.constant 0 : index
    %40 = vector.load %arg3[%c0_47, %c0_48, %c0_49, %c0_50] : memref<1x16x16x8xf32, #tpu.memory_space<vmem>>, vector<1x16x16x8xf32>
    %41 = vector.shape_cast %40 : vector<1x16x16x8xf32> to vector<16x16x8xf32>
    %42 = vector.shape_cast %39 : vector<16x16x8xf32> to vector<1x16x16x8xf32>
    tpu.vector_store %arg3[%c0_47, %c0_48, %c0_49, %c0_50], %42 {strides = array<i32>} : memref<1x16x16x8xf32, #tpu.memory_space<vmem>>, vector<1x16x16x8xf32>,
    %cst_51 = arith.constant dense<0.000000e+00> : vector<8xf32>
    %43 = vector.multi_reduction <add>, %38, %cst_51 [0] : vector<256x8xf32> to vector<8xf32>
    %44 = vector.shape_cast %43 : vector<8xf32> to vector<1x8xf32>
    %c0_52 = arith.constant 0 : index
    %c0_53 = arith.constant 0 : index
    %c0_54 = arith.constant 0 : index
    %45 = vector.load %arg4[%c0_52, %c0_53, %c0_54] : memref<1x1x8xf32, #tpu.memory_space<vmem>>, vector<1x1x8xf32>
    %46 = vector.shape_cast %45 : vector<1x1x8xf32> to vector<1x8xf32>
    %47 = vector.shape_cast %44 : vector<1x8xf32> to vector<1x1x8xf32>
    tpu.vector_store %arg4[%c0_52, %c0_53, %c0_54], %47 {strides = array<i32>} : memref<1x1x8xf32, #tpu.memory_space<vmem>>, vector<1x1x8xf32>,
    %48 = arith.mulf %38, %38 : vector<256x8xf32>
    %cst_55 = arith.constant dense<0.000000e+00> : vector<8xf32>
    %49 = vector.multi_reduction <add>, %48, %cst_55 [0] : vector<256x8xf32> to vector<8xf32>
    %50 = vector.shape_cast %49 : vector<8xf32> to vector<1x8xf32>
    %c0_56 = arith.constant 0 : index
    %c0_57 = arith.constant 0 : index
    %c0_58 = arith.constant 0 : index
    %51 = vector.load %arg5[%c0_56, %c0_57, %c0_58] : memref<1x1x8xf32, #tpu.memory_space<vmem>>, vector<1x1x8xf32>
    %52 = vector.shape_cast %51 : vector<1x1x8xf32> to vector<1x8xf32>
    %53 = vector.shape_cast %50 : vector<1x8xf32> to vector<1x1x8xf32>
    tpu.vector_store %arg5[%c0_56, %c0_57, %c0_58], %53 {strides = array<i32>} : memref<1x1x8xf32, #tpu.memory_space<vmem>>, vector<1x1x8xf32>,
    return
  }
  func.func @transform_0(%arg0: i32) -> (i32, i32, i32, i32) {
    %c0_i32 = arith.constant 0 : i32
    %c0_i32_0 = arith.constant 0 : i32
    %c0_i32_1 = arith.constant 0 : i32
    %c0_i32_2 = arith.constant 0 : i32
    return %arg0, %c0_i32, %c0_i32_0, %c0_i32_1 : i32, i32, i32, i32
  }
  func.func @transform_1(%arg0: i32) -> (i32, i32) {
    %c0_i32 = arith.constant 0 : i32
    %c0_i32_0 = arith.constant 0 : i32
    %c0_i32_1 = arith.constant 0 : i32
    return %c0_i32, %c0_i32_0 : i32, i32
  }
  func.func @transform_2(%arg0: i32) -> (i32, i32, i32, i32) {
    %c0_i32 = arith.constant 0 : i32
    %c0_i32_0 = arith.constant 0 : i32
    %c0_i32_1 = arith.constant 0 : i32
    %c0_i32_2 = arith.constant 0 : i32
    return %arg0, %c0_i32, %c0_i32_0, %c0_i32_1 : i32, i32, i32, i32
  }
  func.func @transform_3(%arg0: i32) -> (i32, i32, i32) {
    %c0_i32 = arith.constant 0 : i32
    %c0_i32_0 = arith.constant 0 : i32
    %c0_i32_1 = arith.constant 0 : i32
    return %arg0, %c0_i32, %c0_i32_0 : i32, i32, i32
  }
  func.func @transform_4(%arg0: i32) -> (i32, i32, i32) {
    %c0_i32 = arith.constant 0 : i32
    %c0_i32_0 = arith.constant 0 : i32
    %c0_i32_1 = arith.constant 0 : i32
    return %arg0, %c0_i32, %c0_i32_0 : i32, i32, i32
  }
}

</mosaic_0001>

<bundles_post_ra>
// kernel: tpu_custom_call.1
= control target key start
LH: loop header
LB: loop body
LE: loop exit
PB: predicated region body
PF: predicated region fallthrough
CT: control target
= control target key end

     0   :  { %10 = vsyncpa [#allocation4], 0  ;;  %s6088_s0 = inlined_call_operand.vmem [shape: bf16[2,18,18,8], index: 0, kind: input, shape index: {}]   ;;  %s6089_s1 = inlined_call_operand.vmem [shape: bf16[72,8], index: 1, kind: input, shape index: {}]   ;;  %s6090_s2 = inlined_call_operand.vmem [shape: f32[2,16,16,8], index: 2, kind: output, shape index: {0}]   ;;  %s6091_s3 = inlined_call_operand.hbm [shape: f32[2,1,8], index: 3, kind: output, shape index: {1}]   ;;  %s6092_s4 = inlined_call_operand.hbm [shape: f32[2,1,8], index: 4, kind: output, shape index: {2}]  }
   0x1   :  { %12 = vsyncpa [#allocation4 + $0x1], 0 }
   0x2   :  { %13 = vsyncpa [#allocation6], 0 }
   0x3   :  { %15 = vsyncpa [#allocation6 + $0x1], 0  ;;  %s4733_s15 = smov 0   ;;  %s4735_s16 = smov 0  }
   0x4   :  { %s4737_s17 = smov 0   ;;  %s4739_s18 = smov 0  }
   0x5 LB: > { %s4754_s19 = sadd.s32 4294967295, %s4696_s18   ;;  %s3940_s20 = sadd.s32 4294967294, %s4696_s18   ;;  %s4696_s18 = sphi %s4739_s18, %s6102_s18   ;;  %s4692_s17 = sphi %s4737_s17, %s6101_s17   ;;  %s4688_s16 = sphi %s4735_s16, %s6100_s16   ;;  %s4684_s15 = sphi %s4733_s15, %s6099_s15  }
   0x6   : > { %s4758_s21 = sadd.s32 1, %s4696_s18   ;;  %s101_s22 = sadd.s32 1, %s4692_s17 }
   0x7   : > { %s98_s23 = ssub.s32 %s4696_s18, %s4758_s21  ;;  %p111_p0 = scmp.ne.s32.totalorder %s4692_s17, %s4688_s16 }
   0x8   : > { %p99_p1 = scmp.eq.s32.totalorder %s98_s23, 0  ;;  %p112_p2 = scmp.eq.s32.totalorder %s4754_s19, 1 }
   0x9   : > { %p117_p3 = scmp.ne.s32.totalorder %s4688_s16, %s4684_s15  ;;  %p118_p4 = scmp.eq.s32.totalorder %s3940_s20, 1 }
   0xa   : > { %s4769_s24 = scalar_select %p99_p1, %s4692_s17, %s101_s22  }
   0xb   : > { %p4771_p5 = por %p112_p2, %p111_p0  ;;  %p4775_p6 = por %p118_p4, %p117_p3 }
   0xc   : > { %p3943_p7 = scmp.ge.s32.totalorder %s4696_s18, 1  ;;  %p173_p8 = scmp.lt.s32.totalorder %s4696_s18, 3 }
   0xe   : > { %p174_p9 = pnand %p3943_p7, %p173_p8 }
   0xf   : > { %p207_p10 = scmp.lt.s32.totalorder (!%p174_p9), %s4754_s19, 1  ;;  %vm1007_vm0 = vcmask (!%p174_p9), 1042432   ;;  %vm1008_vm1 = vcmask (!%p174_p9), 1046532   ;;  %s4698_s6 = smov (!%p174_p9), 24   ;;  %vm411_vm3 = vsmask.f32 (!%p174_p9), 3328 }
  0x10   : > { %177 = sbr.rel (%p174_p9) target bundleno = 720 (0x2d0), region = 28  ;;  %vm4791_vm2 = vmor (!%p174_p9), %vm1007_vm0, %vm1008_vm1  ;;  %vm412_vm4 = vsmask.f32 (!%p174_p9), 7440  ;;  %s4699_s7 = smov (!%p174_p9), 40   ;;  %vm346_vm6 = vcmask (!%p174_p9), 64512   ;;  %vm894_vm7 = vcmask (!%p174_p9), 130112  }
  0x11   : > { %s4700_s8 = smov (!%p174_p9), 16   ;;  %vm4832_vm5 = vmor (!%p174_p9), %vm411_vm3, %vm412_vm4  ;;  %s4701_s9 = smov (!%p174_p9), 8   ;;  %vm1218_vm8 = vcmask (!%p174_p9), 195712   ;;  %vm1396_vm9 = vcmask (!%p174_p9), 261312   ;;  %vm1941_vm10 = vcmask (!%p174_p9), 326912   ;;  %vm2262_vm11 = vcmask (!%p174_p9), 392512  }
  0x12   : > { %s4702_s10 = smov (!%p174_p9), 32   ;;  %s4703_s11 = smov (!%p174_p9), 48   ;;  %vm2440_vm12 = vcmask (!%p174_p9), 458112   ;;  %vm2985_vm13 = vcmask (!%p174_p9), 523712   ;;  %vm3306_vm14 = vcmask (!%p174_p9), 589312   ;;  %vm3424_vm15 = vcmask (!%p174_p9), 1043456  }
  0x13   : > { %s4704_s12 = smov (!%p174_p9), 56   ;;  %s4705_s20 = smov (!%p174_p9), 64   ;;  %vm3375_vm0 = vcmask (!%p174_p9), 588800   ;;  %vm3690_vm1 = vcmask (!%p174_p9), 57344  }
  0x17   : > { %s4783_s27 = scalar_select %p207_p10, %s4754_s19, 1 }
  0x19   : > { %s4496_s28 = smul.u32 216, %s4783_s27 }
  0x1b   : > { %s4789_s5 = scalar_lea.vmem %s6088_s0, %s4496_s28 }
  0x1c   : > { %v4549_v1 = vld [vmem:[%s4789_s5 + $0x18] sm:$0xff]   ;;  %v4550_v2 = vld [vmem:[%s4789_s5 + $0xc] sm:$0xff]   ;;  %v4125_v5 = vld [vmem:[%s4789_s5 + $0x14] sm:$0x1] }
  0x1d   : > { %1350 = vrot.lane.b32.xlu1 %v4549_v1, %s4698_s6  ;;  %v4123_v3 = vld [vmem:[%s4789_s5 + $0xc] sm:$0xe]  ;;  %v4124_v4 = vld [vmem:[%s4789_s5 + $0x10] sm:$0xf]  ;;  %1348 = vrot.lane.b32.xlu0 %v4550_v2, %s4698_s6  ;;  %v2059_v8 = vrot.slane %v4125_v5, 5 }
  0x1e   : > { %v4171_v6 = vrot.slane %v4123_v3, 9  ;;  %v2056_v7 = vrot.slane %v4124_v4, 5  ;;  %v911_v9 = vld [vmem:[%s4789_s5] sm:$0xe]  ;;  %v912_v10 = vld [vmem:[%s4789_s5 + $0x4] sm:$0xf] }
  0x1f   : > { %v913_v11 = vld [vmem:[%s4789_s5 + $0x8] sm:$0x1]  ;;  %v3979_v12 = vrot.slane %v911_v9, 9  ;;  %v1012_v15 = vrot.slane %v912_v10, 5  ;;  %v914_v17 = vld [vmem:[%s4789_s5 + $0xc] sm:$0xe] }
  0x20   : > { %v2057_v13 = vsel %vm4791_vm2, %v4171_v6, %v2056_v7  ;;  %v2058_v14 = vrot.slane %v2056_v7, 4  ;;  %v1015_v16 = vrot.slane %v913_v11, 5  ;;  %v915_v18 = vld [vmem:[%s4789_s5 + $0x10] sm:$0xf]  ;;  %v916_v19 = vld [vmem:[%s4789_s5 + $0x14] sm:$0x1] }
  0x21   : > { %v3980_v20 = vrot.slane %v914_v17, 9  ;;  %v1013_v22 = vsel %vm4791_vm2, %v3979_v12, %v1012_v15  ;;  %v1014_v23 = vrot.slane %v1012_v15, 4  ;;  %v1019_v24 = vrot.slane %v915_v18, 5  ;;  %v363_v25 = vld [vmem:[%s4789_s5] sm:$0xf] }
  0x22   : > { %v2060_v21 = vsel %vm4791_vm2, %v2058_v14, %v2059_v8  ;;  %v364_v26 = vld [vmem:[%s4789_s5 + $0x4] sm:$0xf]  ;;  %v1022_v28 = vrot.slane %v916_v19, 5  ;;  %v365_v29 = vld [vmem:[%s4789_s5 + $0x8] sm:$0x1]  ;;  %v415_v30 = vshrl.u32 %v363_v25, 16 }
  0x23   : > { %v4187_v27 = vcombine.low %v2057_v13, %v2060_v21  ;;  %v418_v31 = vshll.u32 %v363_v25, 16  ;;  %v1016_v32 = vsel %vm4791_vm2, %v1014_v23, %v1015_v16  ;;  %v1020_v33 = vsel %vm4791_vm2, %v3980_v20, %v1019_v24  ;;  %v4126_v36 = vld [vmem:[%s4789_s5 + $0x18] sm:$0xe]  ;;  %v4127_v37 = vld [vmem:[%s4789_s5 + $0x1c] sm:$0xf] }
  0x24   : > { %v1021_v34 = vrot.slane %v1019_v24, 4  ;;  %v424_v35 = vshll.u32 %v364_v26, 16  ;;  %v3995_v38 = vcombine.low %v1013_v22, %v1016_v32  ;;  %v417_v39 = vrot.slane %v415_v30, 4  ;;  %v4128_v42 = vld [vmem:[%s4789_s5 + $0x20] sm:$0x1] }
  0x25   : > { %2214 = vrot.lane.b32.xlu0 %v4187_v27, %s4699_s7  ;;  %v420_v40 = vrot.slane %v418_v31, 5  ;;  %v428_v41 = vshrl.u32 %v364_v26, 16  ;;  %v434_v45 = vshll.u32 %v365_v29, 16  ;;  %v4172_v46 = vrot.slane %v4126_v36, 9  ;;  %v366_v47 = vld [vmem:[%s4789_s5 + $0xc] sm:$0xf] }
  0x26   : > { %v1023_v43 = vsel %vm4791_vm2, %v1021_v34, %v1022_v28  ;;  %v426_v44 = vrot.slane %v424_v35, 5  ;;  %1170 = vrot.lane.b32.xlu1 %v3995_v38, %s4700_s8  ;;  %v2063_v51 = vrot.slane %v4127_v37, 5  ;;  %v367_v52 = vld [vmem:[%s4789_s5 + $0x10] sm:$0xf]  ;;  %v2066_v55 = vrot.slane %v4128_v42, 5 }
  0x27   : > { %v3996_v48 = vcombine.low %v1020_v33, %v1023_v43  ;;  %v421_v49 = vor.u32 %v420_v40, %v417_v39  ;;  %v430_v50 = vrot.slane %v428_v41, 4  ;;  %v436_v54 = vrot.slane %v434_v45, 5  ;;  %v368_v56 = vld [vmem:[%s4789_s5 + $0x14] sm:$0x1]  ;;  %v4062_v63 = vld [vmem:[%s4789_s5 + $0x18] sm:$0xf] }
  0x28   : > { %v439_v57 = vshrl.u32 %v366_v47, 16  ;;  %v442_v58 = vshll.u32 %v366_v47, 16  ;;  %v2064_v61 = vsel %vm4791_vm2, %v4172_v46, %v2063_v51  ;;  %v2065_v62 = vrot.slane %v2063_v51, 4  ;;  %v4063_v5 = vld [vmem:[%s4789_s5 + $0x1c] sm:$0xf] }
  0x29   : > { %v422_v59 = vrot.slane %v421_v49, 4  ;;  %v431_v60 = vor.u32 %v430_v50, %v426_v44  ;;  %v448_v3 = vshll.u32 %v367_v52, 16  ;;  %v452_v4 = vshrl.u32 %v367_v52, 16  ;;  %v4064_v10 = vld [vmem:[%s4789_s5 + $0x20] sm:$0x1] }
  0x2a   : > { %v441_v1 = vrot.slane %v439_v57, 4  ;;  %v444_v2 = vrot.slane %v442_v58, 5  ;;  %1172 = vrot.lane.b32.xlu1 %v3996_v48, %s4700_s8  ;;  %v2067_v8 = vsel %vm4791_vm2, %v2065_v62, %v2066_v55  ;;  %v458_v9 = vshll.u32 %v368_v56, 16  ;;  %v4059_v11 = vld [vmem:[%s4789_s5 + $0xc] sm:$0xf] }
  0x2b   : > { %v427_v6 = vsel %vm4832_vm5, %v422_v59, %v426_v44  ;;  %v432_v7 = vrot.slane %v431_v60, 4  ;;  %v4188_v12 = vcombine.low %v2064_v61, %v2067_v8  ;;  %v450_v14 = vrot.slane %v448_v3, 5  ;;  %v4060_v28 = vld [vmem:[%s4789_s5 + $0x10] sm:$0xf]  ;;  %v4061_v32 = vld [vmem:[%s4789_s5 + $0x14] sm:$0x1] }
  0x2c   : > { %v445_v13 = vor.u32 %v444_v2, %v441_v1  ;;  %v454_v15 = vrot.slane %v452_v4, 4  ;;  %v460_v17 = vrot.slane %v458_v9, 5  ;;  %v1486_v18 = vshrl.u32 %v4062_v63, 16  ;;  %v4251_v38 = vld [vmem:[%s4789_s5 + $0x18] sm:$0xf] }
  0x2d   : > { %v437_v16 = vsel %vm4832_vm5, %v432_v7, %v436_v54  ;;  %v1489_v19 = vshll.u32 %v4062_v63, 16  ;;  %v1495_v23 = vshll.u32 %v4063_v5, 16  ;;  %v1499_v26 = vshrl.u32 %v4063_v5, 16  ;;  %v4252_v47 = vld [vmem:[%s4789_s5 + $0x1c] sm:$0xf] }
  0x2e   : > { %v3963_v20 = vcombine.low %v427_v6, %v437_v16  ;;  %v446_v21 = vrot.slane %v445_v13, 4  ;;  %v455_v22 = vor.u32 %v454_v15, %v450_v14  ;;  %2216 = vrot.lane.b32.xlu1 %v4188_v12, %s4699_s7  ;;  %v1488_v24 = vrot.slane %v1486_v18, 4  ;;  %v4253_v56 = vld [vmem:[%s4789_s5 + $0x20] sm:$0x1]  ;;  %v4254_v62 = vld [vmem:[%s4789_s5 + $0x24] sm:$0xf] }
  0x2f   : > { %v1491_v25 = vrot.slane %v1489_v19, 5  ;;  %v1505_v27 = vshll.u32 %v4064_v10, 16  ;;  %v1497_v31 = vrot.slane %v1495_v23, 5  ;;  %v1462_v33 = vshrl.u32 %v4059_v11, 16  ;;  %v4255_v4 = vld [vmem:[%s4789_s5 + $0x28] sm:$0xf] }
  0x30   : > { %846 = vrot.lane.b32.xlu0 %v3963_v20, %s4701_s9  ;;  %v451_v29 = vsel %vm4832_vm5, %v446_v21, %v450_v14  ;;  %v456_v30 = vrot.slane %v455_v22, 4  ;;  %v1501_v35 = vrot.slane %v1499_v26, 4  ;;  %v1465_v37 = vshll.u32 %v4059_v11, 16  ;;  %v4256_v12 = vld [vmem:[%s4789_s5 + $0x2c] sm:$0x1]  ;;  %v4552_v16 = vld [vmem:[%s4789_s5 + $0x24] sm:$0xff]  }
  0x31   : > { %v1492_v34 = vor.u32 %v1491_v25, %v1488_v24  ;;  %v1507_v36 = vrot.slane %v1505_v27, 5  ;;  %v1464_v40 = vrot.slane %v1462_v33, 4  ;;  %v1471_v41 = vshll.u32 %v4060_v28, 16  ;;  %v4315_v14 = vld [vmem:[%s4789_s5 + $0x18] sm:$0xe] }
  0x32   : > { %v461_v39 = vsel %vm4832_vm5, %v456_v30, %v460_v17  ;;  %v1475_v42 = vshrl.u32 %v4060_v28, 16  ;;  %v1502_v45 = vor.u32 %v1501_v35, %v1497_v31  ;;  %v1467_v46 = vrot.slane %v1465_v37, 5  ;;  %v4316_v20 = vld [vmem:[%s4789_s5 + $0x1c] sm:$0xf]  ;;  %v4317_v25 = vld [vmem:[%s4789_s5 + $0x20] sm:$0x1] }
  0x33   : > { %v3964_v43 = vcombine.low %v451_v29, %v461_v39  ;;  %v1493_v44 = vrot.slane %v1492_v34, 4  ;;  %v1473_v48 = vrot.slane %v1471_v41, 5  ;;  %v1481_v50 = vshll.u32 %v4061_v32, 16  ;;  %v369_v30 = vld [vmem:[%s4789_s5 + $0x18] sm:$0xf] }
  0x34   : > { %v1477_v49 = vrot.slane %v1475_v42, 4  ;;  %v2506_v51 = vshrl.u32 %v4251_v38, 16  ;;  %v1503_v54 = vrot.slane %v1502_v45, 4  ;;  %v1468_v55 = vor.u32 %v1467_v46, %v1464_v40  ;;  %v371_v41 = vld [vmem:[%s4789_s5 + $0x20] sm:$0x1] }
  0x35   : > { %848 = vrot.lane.b32.xlu0 %v3964_v43, %s4701_s9  ;;  %v1498_v52 = vsel %vm4832_vm5, %v1493_v44, %v1497_v31  ;;  %v2509_v57 = vshll.u32 %v4251_v38, 16  ;;  %v1483_v59 = vrot.slane %v1481_v50, 5  ;;  %v2515_v61 = vshll.u32 %v4252_v47, 16  ;;  %v4551_v31 = vld [vmem:[%s4789_s5 + $0x18] sm:$0xff]   ;;  %v4318_v42 = vld [vmem:[%s4789_s5 + $0x24] sm:$0xe] }
  0x36   : > { %v1478_v58 = vor.u32 %v1477_v49, %v1473_v48  ;;  %v2508_v60 = vrot.slane %v2506_v51, 4  ;;  %v1508_v63 = vsel %vm4832_vm5, %v1503_v54, %v1507_v36  ;;  %v1469_v1 = vrot.slane %v1468_v55, 4  ;;  %v370_v36 = vld [vmem:[%s4789_s5 + $0x1c] sm:$0xf]  ;;  %v372_v54 = vld [vmem:[%s4789_s5 + $0x24] sm:$0xf] }
  0x37   : > { %v2511_v2 = vrot.slane %v2509_v57, 5  ;;  %v2519_v3 = vshrl.u32 %v4252_v47, 16  ;;  %v4108_v5 = vcombine.low %v1498_v52, %v1508_v63  ;;  %v2517_v7 = vrot.slane %v2515_v61, 5  ;;  %v4319_v47 = vld [vmem:[%s4789_s5 + $0x28] sm:$0xf] }
  0x38   : > { %v1479_v6 = vrot.slane %v1478_v58, 4  ;;  %v2525_v8 = vshll.u32 %v4253_v56, 16  ;;  %v1474_v9 = vsel %vm4832_vm5, %v1469_v1, %v1473_v48  ;;  %v2530_v13 = vshrl.u32 %v4254_v62, 16  ;;  %v4320_v48 = vld [vmem:[%s4789_s5 + $0x2c] sm:$0x1] }
  0x39   : > { %v2512_v10 = vor.u32 %v2511_v2, %v2508_v60  ;;  %v2521_v11 = vrot.slane %v2519_v3, 4  ;;  %1895 = vrot.lane.b32.xlu1 %v4108_v5, %s4702_s10  ;;  %v2533_v18 = vshll.u32 %v4254_v62, 16  ;;  %v2539_v19 = vshll.u32 %v4255_v4, 16 }
  0x3a   : > { %v1484_v15 = vsel %vm4832_vm5, %v1479_v6, %v1483_v59  ;;  %v2527_v17 = vrot.slane %v2525_v8, 5  ;;  %v2532_v24 = vrot.slane %v2530_v13, 4  ;;  %v2543_v28 = vshrl.u32 %v4255_v4, 16  ;;  %v373_v8 = vld [vmem:[%s4789_s5 + $0x28] sm:$0xf] }
  0x3b   : > { %v4107_v21 = vcombine.low %v1474_v9, %v1484_v15  ;;  %v2513_v22 = vrot.slane %v2512_v10, 4  ;;  %v2522_v23 = vor.u32 %v2521_v11, %v2517_v7  ;;  %v2535_v26 = vrot.slane %v2533_v18, 5 }
  0x3c   : > { %v2541_v27 = vrot.slane %v2539_v19, 5  ;;  %v2549_v29 = vshll.u32 %v4256_v12, 16  ;;  %v4363_v34 = vrot.slane %v4315_v14, 9  ;;  %v3100_v35 = vrot.slane %v4316_v20, 5  ;;  %v374_v12 = vld [vmem:[%s4789_s5 + $0x2c] sm:$0x1] }
  0x3d   : > { %1893 = vrot.lane.b32.xlu0 %v4107_v21, %s4702_s10  ;;  %v2518_v32 = vsel %vm4832_vm5, %v2513_v22, %v2517_v7  ;;  %v2523_v33 = vrot.slane %v2522_v23, 4  ;;  %2394 = vrot.lane.b32.xlu1 %v4552_v16, %s4703_s11  ;;  %v2536_v37 = vor.u32 %v2535_v26, %v2532_v24  ;;  %v2545_v38 = vrot.slane %v2543_v28, 4  ;;  %v917_v14 = vld [vmem:[%s4789_s5 + $0x18] sm:$0xe]  ;;  %v918_v19 = vld [vmem:[%s4789_s5 + $0x1c] sm:$0xf] }
  0x3e   : > { %v2551_v39 = vrot.slane %v2549_v29, 5  ;;  %v3103_v40 = vrot.slane %v4317_v25, 5  ;;  %v3101_v44 = vsel %vm4791_vm2, %v4363_v34, %v3100_v35  ;;  %v3102_v45 = vrot.slane %v3100_v35, 4  ;;  %v4567_v20 = vld [vmem:[%s6089_s1] sm:$0xff]  }
  0x3f   : > { %v2528_v43 = vsel %vm4832_vm5, %v2523_v33, %v2527_v17  ;;  %v463_v46 = vshrl.u32 %v369_v30, 16  ;;  %v2537_v50 = vrot.slane %v2536_v37, 4  ;;  %v2546_v51 = vor.u32 %v2545_v38, %v2541_v27  ;;  %v919_v25 = vld [vmem:[%s4789_s5 + $0x20] sm:$0x1]  ;;  %4442 = vmatprep.subr.bf16.mxu0 %v4567_v20  ;;  %4484 = vmatprep.subr.bf16.mxu1 %v4567_v20  ;;  %v4065_v37 = vld [vmem:[%s4789_s5 + $0x24] sm:$0xf] }
  0x40   : > { %v4299_v49 = vcombine.low %v2518_v32, %v2528_v43  ;;  %v466_v52 = vshll.u32 %v369_v30, 16  ;;  %v3104_v55 = vsel %vm4791_vm2, %v3102_v45, %v3103_v40  ;;  %v472_v57 = vshll.u32 %v370_v36, 16  ;;  %v920_v30 = vld [vmem:[%s4789_s5 + $0x24] sm:$0xe]  ;;  %4443 = vmatpush3.bf16.msra.mxu0 %v4567_v20  ;;  %4489 = vmatpush3.bf16.msra.mxu1 %v4567_v20 }
  0x41   : > { %2392 = vrot.lane.b32.xlu0 %v4551_v31, %s4703_s11  ;;  %v465_v56 = vrot.slane %v463_v46, 4  ;;  %v476_v58 = vshrl.u32 %v370_v36, 16  ;;  %v2542_v59 = vsel %vm4832_vm5, %v2537_v50, %v2541_v27  ;;  %v2547_v60 = vrot.slane %v2546_v51, 4  ;;  %v921_v31 = vld [vmem:[%s4789_s5 + $0x28] sm:$0xf] }
  0x42   : > { %v4379_v61 = vcombine.low %v3101_v44, %v3104_v55  ;;  %v468_v62 = vrot.slane %v466_v52, 5  ;;  %v474_v63 = vrot.slane %v472_v57, 5  ;;  %v482_v2 = vshll.u32 %v371_v41, 16  ;;  %v922_v36 = vld [vmem:[%s4789_s5 + $0x2c] sm:$0x1] }
  0x43   : > { %v478_v1 = vrot.slane %v476_v58, 4  ;;  %v4364_v3 = vrot.slane %v4318_v42, 9  ;;  %v2552_v4 = vsel %vm4832_vm5, %v2547_v60, %v2551_v39  ;;  %v3107_v6 = vrot.slane %v4319_v47, 5  ;;  %v4066_v42 = vld [vmem:[%s4789_s5 + $0x28] sm:$0xf] }
  0x44   : > { %v469_v5 = vor.u32 %v468_v62, %v465_v56  ;;  %v3110_v7 = vrot.slane %v4320_v48, 5  ;;  %v4300_v9 = vcombine.low %v2542_v59, %v2552_v4  ;;  %v484_v11 = vrot.slane %v482_v2, 5  ;;  %v4067_v59 = vld [vmem:[%s4789_s5 + $0x2c] sm:$0x1]  ;;  %v4068_v2 = vld [vmem:[%s4789_s5 + $0x30] sm:$0xf] }
  0x45   : > { %2937 = vrot.lane.b32.xlu0 %v4299_v49, %s4704_s12  ;;  %v479_v10 = vor.u32 %v478_v1, %v474_v63  ;;  %v487_v13 = vshrl.u32 %v372_v54, 16  ;;  %v3108_v16 = vsel %vm4791_vm2, %v4364_v3, %v3107_v6  ;;  %v3109_v17 = vrot.slane %v3107_v6, 4  ;;  %v4069_v3 = vld [vmem:[%s4789_s5 + $0x34] sm:$0xf] }
  0x46   : > { %v470_v15 = vrot.slane %v469_v5, 4  ;;  %v490_v18 = vshll.u32 %v372_v54, 16  ;;  %2939 = vrot.lane.b32.xlu1 %v4300_v9, %s4704_s12  ;;  %v496_v23 = vshll.u32 %v373_v8, 16  ;;  %v500_v24 = vshrl.u32 %v373_v8, 16  ;;  %v4070_v9 = vld [vmem:[%s4789_s5 + $0x38] sm:$0x1] }
  0x47   : > { %v480_v21 = vrot.slane %v479_v10, 4  ;;  %v489_v22 = vrot.slane %v487_v13, 4  ;;  %v3111_v27 = vsel %vm4791_vm2, %v3109_v17, %v3110_v7  ;;  %v506_v29 = vshll.u32 %v374_v12, 16  ;;  %v4553_v7 = vld [vmem:[%s4789_s5 + $0x24] sm:$0xff]   ;;  %v4131_v17 = vld [vmem:[%s4789_s5 + $0x2c] sm:$0x1] }
  0x48   : > { %v475_v26 = vsel %vm4832_vm5, %v470_v15, %v474_v63  ;;  %v492_v28 = vrot.slane %v490_v18, 5  ;;  %v4380_v33 = vcombine.low %v3108_v16, %v3111_v27  ;;  %v498_v34 = vrot.slane %v496_v23, 5  ;;  %v4129_v10 = vld [vmem:[%s4789_s5 + $0x24] sm:$0xe]  ;;  %v4130_v16 = vld [vmem:[%s4789_s5 + $0x28] sm:$0xf] }
  0x49   : > { %3258 = vrot.lane.b32.xlu0 %v4379_v61, %s4705_s20  ;;  %v485_v32 = vsel %vm4832_vm5, %v480_v21, %v484_v11  ;;  %v502_v35 = vrot.slane %v500_v24, 4  ;;  %v508_v40 = vrot.slane %v506_v29, 5  ;;  %v3981_v41 = vrot.slane %v917_v14, 9  ;;  %v4570_v11 = vld [vmem:[%s6089_s1 + $0x8] sm:$0xff]   ;;  %v4133_v27 = vld [vmem:[%s4789_s5 + $0x34] sm:$0xf] }
  0x4a   : > { %v3965_v38 = vcombine.low %v475_v26, %v485_v32  ;;  %v493_v39 = vor.u32 %v492_v28, %v489_v22  ;;  %v1026_v44 = vrot.slane %v918_v19, 5  ;;  %v1029_v45 = vrot.slane %v919_v25, 5  ;;  %v4132_v22 = vld [vmem:[%s4789_s5 + $0x30] sm:$0xe]  ;;  %4444 = vmatprep.subr.bf16.mxu0 %v4570_v11  ;;  %4485 = vmatprep.subr.bf16.mxu1 %v4570_v11  ;;  %v4134_v32 = vld [vmem:[%s4789_s5 + $0x38] sm:$0x1] }
  0x4b   : > { %v503_v43 = vor.u32 %v502_v35, %v498_v34  ;;  %v3982_v46 = vrot.slane %v920_v30, 9  ;;  %v1033_v48 = vrot.slane %v921_v31, 5  ;;  %v1036_v49 = vrot.slane %v922_v36, 5  ;;  %4445 = vmatpush3.bf16.msra.mxu0 %v4570_v11  ;;  %4490 = vmatpush3.bf16.msra.mxu1 %v4570_v11 }
  0x4c   : > { %850 = vrot.lane.b32.xlu1 %v3965_v38, %s4701_s9  ;;  %v494_v47 = vrot.slane %v493_v39, 4  ;;  %v1510_v50 = vshrl.u32 %v4065_v37, 16  ;;  %v1027_v52 = vsel %vm4791_vm2, %v3981_v41, %v1026_v44  ;;  %v1028_v54 = vrot.slane %v1026_v44, 4  ;;  %v4554_v38 = vld [vmem:[%s4789_s5 + $0x30] sm:$0xff]  }
  0x4d   : > { %3260 = vrot.lane.b32.xlu0 %v4380_v33, %s4705_s20  ;;  %v504_v51 = vrot.slane %v503_v43, 4  ;;  %v1513_v55 = vshll.u32 %v4065_v37, 16  ;;  %v1034_v57 = vsel %vm4791_vm2, %v3982_v46, %v1033_v48  ;;  %v1035_v58 = vrot.slane %v1033_v48, 4  ;;  %v4571_v33 = vld [vmem:[%s6089_s1 + $0x10] sm:$0xff]   ;;  %v4573_v43 = vld [vmem:[%s6089_s1 + $0x18] sm:$0xff]  }
  0x4e   : > { %v499_v56 = vsel %vm4832_vm5, %v494_v47, %v498_v34  ;;  %v1512_v60 = vrot.slane %v1510_v50, 4  ;;  %v1030_v62 = vsel %vm4791_vm2, %v1028_v54, %v1029_v45  ;;  %v1519_v1 = vshll.u32 %v4066_v42, 16  ;;  %v4257_v48 = vld [vmem:[%s4789_s5 + $0x30] sm:$0xf]  ;;  %4446 = vmatprep.subr.bf16.mxu0 %v4571_v33  ;;  %4486 = vmatprep.subr.bf16.mxu1 %v4571_v33  ;;  %v4258_v54 = vld [vmem:[%s4789_s5 + $0x34] sm:$0xf] }
  0x4f   : > { %v509_v61 = vsel %vm4832_vm5, %v504_v51, %v508_v40  ;;  %v1515_v63 = vrot.slane %v1513_v55, 5  ;;  %v3997_v5 = vcombine.low %v1027_v52, %v1030_v62  ;;  %v1037_v6 = vsel %vm4791_vm2, %v1035_v58, %v1036_v49  ;;  %4447 = vmatpush3.bf16.msra.mxu0 %v4571_v33  ;;  %4491 = vmatpush3.bf16.msra.mxu1 %v4571_v33 }
  0x50   : > { %v3966_v4 = vcombine.low %v499_v56, %v509_v61  ;;  %v1523_v8 = vshrl.u32 %v4066_v42, 16  ;;  %v3998_v12 = vcombine.low %v1034_v57, %v1037_v6  ;;  %v1521_v14 = vrot.slane %v1519_v1, 5  ;;  %4448 = vmatprep.subr.bf16.mxu0 %v4573_v43  ;;  %4487 = vmatprep.subr.bf16.mxu1 %v4573_v43  ;;  %v4259_v61 = vld [vmem:[%s4789_s5 + $0x38] sm:$0x1]  ;;  %v4260_v1 = vld [vmem:[%s4789_s5 + $0x3c] sm:$0xf] }
  0x51   : > { %v1516_v13 = vor.u32 %v1515_v63, %v1512_v60  ;;  %v1529_v15 = vshll.u32 %v4067_v59, 16  ;;  %1174 = vrot.lane.b32.xlu0 %v3997_v5, %s4700_s8  ;;  %v1534_v19 = vshrl.u32 %v4068_v2, 16  ;;  %v1537_v20 = vshll.u32 %v4068_v2, 16  ;;  %v4261_v6 = vld [vmem:[%s4789_s5 + $0x40] sm:$0xf] }
  0x52   : > { %852 = vrot.lane.b32.xlu1 %v3966_v4, %s4701_s9  ;;  %v1525_v18 = vrot.slane %v1523_v8, 4  ;;  %v1543_v21 = vshll.u32 %v4069_v3, 16  ;;  %v1547_v25 = vshrl.u32 %v4069_v3, 16  ;;  %v1553_v26 = vshll.u32 %v4070_v9, 16 }
  0x53   : > { %v1517_v23 = vrot.slane %v1516_v13, 4  ;;  %v1531_v24 = vrot.slane %v1529_v15, 5  ;;  %v1536_v29 = vrot.slane %v1534_v19, 4  ;;  %v1539_v30 = vrot.slane %v1537_v20, 5  ;;  %v4322_v13 = vld [vmem:[%s4789_s5 + $0x34] sm:$0xf]  ;;  %4449 = vmatpush3.bf16.msra.mxu0 %v4573_v43  ;;  %4492 = vmatpush3.bf16.msra.mxu1 %v4573_v43 }
  0x54   : > { %v1526_v28 = vor.u32 %v1525_v18, %v1521_v14  ;;  %v1545_v31 = vrot.slane %v1543_v21, 5  ;;  %v1549_v35 = vrot.slane %v1547_v25, 4  ;;  %v1555_v36 = vrot.slane %v1553_v26, 5  ;;  %v4323_v18 = vld [vmem:[%s4789_s5 + $0x38] sm:$0x1]  ;;  %v4555_v19 = vld [vmem:[%s4789_s5 + $0x30] sm:$0xff]  }
  0x55   : > { %v1522_v34 = vsel %vm4832_vm5, %v1517_v23, %v1521_v14  ;;  %v4173_v37 = vrot.slane %v4129_v10, 9  ;;  %1352 = vrot.lane.b32.xlu0 %v4553_v7, %s4698_s6  ;;  %v1540_v40 = vor.u32 %v1539_v30, %v1536_v29  ;;  %v2070_v41 = vrot.slane %v4130_v16, 5  ;;  %v4262_v7 = vld [vmem:[%s4789_s5 + $0x44] sm:$0x1] }
  0x56   : > { %1176 = vrot.lane.b32.xlu1 %v3998_v12, %s4700_s8  ;;  %v1527_v39 = vrot.slane %v1526_v28, 4  ;;  %v2073_v42 = vrot.slane %v4131_v17, 5  ;;  %v1550_v44 = vor.u32 %v1549_v35, %v1545_v31  ;;  %v4174_v45 = vrot.slane %v4132_v22, 9  ;;  %v4321_v12 = vld [vmem:[%s4789_s5 + $0x30] sm:$0xe] }
  0x57   : > { %v2077_v46 = vrot.slane %v4133_v27, 5  ;;  %v2080_v47 = vrot.slane %v4134_v32, 5  ;;  %v1541_v50 = vrot.slane %v1540_v40, 4  ;;  %v2071_v51 = vsel %vm4791_vm2, %v4173_v37, %v2070_v41  ;;  %v376_v37 = vld [vmem:[%s4789_s5 + $0x34] sm:$0xf] }
  0x58   : > { %v1532_v49 = vsel %vm4832_vm5, %v1527_v39, %v1531_v24  ;;  %v2072_v52 = vrot.slane %v2070_v41, 4  ;;  %v1551_v56 = vrot.slane %v1550_v44, 4  ;;  %v2554_v62 = vshrl.u32 %v4257_v48, 16  ;;  %v375_v24 = vld [vmem:[%s4789_s5 + $0x30] sm:$0xf] }
  0x59   : > { %v4109_v55 = vcombine.low %v1522_v34, %v1532_v49  ;;  %v2078_v57 = vsel %vm4791_vm2, %v4174_v45, %v2077_v46  ;;  %v2079_v58 = vrot.slane %v2077_v46, 4  ;;  %v1546_v59 = vsel %vm4832_vm5, %v1541_v50, %v1545_v31  ;;  %v377_v46 = vld [vmem:[%s4789_s5 + $0x38] sm:$0x1] }
  0x5a   : > { %1354 = vrot.lane.b32.xlu1 %v4554_v38, %s4698_s6  ;;  %v2074_v60 = vsel %vm4791_vm2, %v2072_v52, %v2073_v42  ;;  %v2557_v63 = vshll.u32 %v4257_v48, 16  ;;  %v1556_v2 = vsel %vm4832_vm5, %v1551_v56, %v1555_v36  ;;  %v2563_v5 = vshll.u32 %v4258_v54, 16  ;;  %v4556_v38 = vld [vmem:[%s4789_s5 + $0x3c] sm:$0xff]  }
  0x5b   : > { %1897 = vrot.lane.b32.xlu0 %v4109_v55, %s4702_s10  ;;  %v4189_v3 = vcombine.low %v2071_v51, %v2074_v60  ;;  %v2081_v4 = vsel %vm4791_vm2, %v2079_v58, %v2080_v47  ;;  %v4110_v8 = vcombine.low %v1546_v59, %v1556_v2  ;;  %v2556_v10 = vrot.slane %v2554_v62, 4  ;;  %v4324_v52 = vld [vmem:[%s4789_s5 + $0x3c] sm:$0xe]  ;;  %v4325_v58 = vld [vmem:[%s4789_s5 + $0x40] sm:$0xf] }
  0x5c   : > { %v4190_v9 = vcombine.low %v2078_v57, %v2081_v4  ;;  %v2559_v11 = vrot.slane %v2557_v63, 5  ;;  %v2565_v14 = vrot.slane %v2563_v5, 5  ;;  %v2567_v15 = vshrl.u32 %v4258_v54, 16  ;;  %v4326_v59 = vld [vmem:[%s4789_s5 + $0x44] sm:$0x1] }
  0x5d   : > { %v2573_v16 = vshll.u32 %v4259_v61, 16  ;;  %v2578_v17 = vshrl.u32 %v4260_v1, 16  ;;  %v2581_v21 = vshll.u32 %v4260_v1, 16  ;;  %v2587_v22 = vshll.u32 %v4261_v6, 16  ;;  %v378_v1 = vld [vmem:[%s4789_s5 + $0x3c] sm:$0xf] }
  0x5e   : > { %1899 = vrot.lane.b32.xlu1 %v4110_v8, %s4702_s10  ;;  %v2560_v20 = vor.u32 %v2559_v11, %v2556_v10  ;;  %v2591_v23 = vshrl.u32 %v4261_v6, 16  ;;  %v2569_v25 = vrot.slane %v2567_v15, 4  ;;  %v2597_v28 = vshll.u32 %v4262_v7, 16  ;;  %v379_v6 = vld [vmem:[%s4789_s5 + $0x40] sm:$0xf] }
  0x5f   : > { %2218 = vrot.lane.b32.xlu0 %v4189_v3, %s4699_s7  ;;  %v2575_v26 = vrot.slane %v2573_v16, 5  ;;  %v2580_v27 = vrot.slane %v2578_v17, 4  ;;  %v2583_v30 = vrot.slane %v2581_v21, 5  ;;  %v2589_v31 = vrot.slane %v2587_v22, 5  ;;  %v380_v11 = vld [vmem:[%s4789_s5 + $0x44] sm:$0x1] }
  0x60   : > { %v2561_v29 = vrot.slane %v2560_v20, 4  ;;  %v2593_v32 = vrot.slane %v2591_v23, 4  ;;  %v2570_v33 = vor.u32 %v2569_v25, %v2565_v14  ;;  %v2599_v34 = vrot.slane %v2597_v28, 5  ;;  %v923_v16 = vld [vmem:[%s4789_s5 + $0x30] sm:$0xe] }
  0x61   : > { %v4365_v35 = vrot.slane %v4321_v12, 9  ;;  %v3114_v36 = vrot.slane %v4322_v13, 5  ;;  %v2584_v40 = vor.u32 %v2583_v30, %v2580_v27  ;;  %v3117_v42 = vrot.slane %v4323_v18, 5  ;;  %v924_v21 = vld [vmem:[%s4789_s5 + $0x34] sm:$0xf] }
  0x62   : > { %2220 = vrot.lane.b32.xlu1 %v4190_v9, %s4699_s7  ;;  %v2566_v39 = vsel %vm4832_vm5, %v2561_v29, %v2565_v14  ;;  %v2594_v41 = vor.u32 %v2593_v32, %v2589_v31  ;;  %v2571_v43 = vrot.slane %v2570_v33, 4  ;;  %v511_v47 = vshrl.u32 %v375_v24, 16  ;;  %v925_v22 = vld [vmem:[%s4789_s5 + $0x38] sm:$0x1] }
  0x63   : > { %2396 = vrot.lane.b32.xlu0 %v4555_v19, %s4703_s11  ;;  %v3115_v44 = vsel %vm4791_vm2, %v4365_v35, %v3114_v36  ;;  %v3116_v45 = vrot.slane %v3114_v36, 4  ;;  %v2585_v48 = vrot.slane %v2584_v40, 4  ;;  %v514_v50 = vshll.u32 %v375_v24, 16  ;;  %v927_v36 = vld [vmem:[%s4789_s5 + $0x40] sm:$0xf] }
  0x64   : > { %v2595_v49 = vrot.slane %v2594_v41, 4  ;;  %v520_v51 = vshll.u32 %v376_v37, 16  ;;  %v2576_v54 = vsel %vm4832_vm5, %v2571_v43, %v2575_v26  ;;  %v513_v56 = vrot.slane %v511_v47, 4 }
  0x65   : > { %v3118_v55 = vsel %vm4791_vm2, %v3116_v45, %v3117_v42  ;;  %v524_v57 = vshrl.u32 %v376_v37, 16  ;;  %v4301_v60 = vcombine.low %v2566_v39, %v2576_v54  ;;  %v2590_v61 = vsel %vm4832_vm5, %v2585_v48, %v2589_v31  ;;  %v926_v31 = vld [vmem:[%s4789_s5 + $0x3c] sm:$0xe]  ;;  %v928_v37 = vld [vmem:[%s4789_s5 + $0x44] sm:$0x1] }
  0x66   : > { %2398 = vrot.lane.b32.xlu1 %v4556_v38, %s4703_s11  ;;  %v2600_v62 = vsel %vm4832_vm5, %v2595_v49, %v2599_v34  ;;  %v4381_v63 = vcombine.low %v3115_v44, %v3118_v55  ;;  %v516_v3 = vrot.slane %v514_v50, 5  ;;  %v522_v4 = vrot.slane %v520_v51, 5  ;;  %v4071_v38 = vld [vmem:[%s4789_s5 + $0x3c] sm:$0xf]  ;;  %v4072_v50 = vld [vmem:[%s4789_s5 + $0x40] sm:$0xf] }
  0x67   : > { %v4302_v2 = vcombine.low %v2590_v61, %v2600_v62  ;;  %v526_v5 = vrot.slane %v524_v57, 4  ;;  %2941 = vrot.lane.b32.xlu0 %v4301_v60, %s4704_s12  ;;  %v530_v7 = vshll.u32 %v377_v46, 16  ;;  %v4366_v8 = vrot.slane %v4324_v52, 9  ;;  %v4074_v62 = vld [vmem:[%s4789_s5 + $0x48] sm:$0xf] }
  0x68   : > { %v3121_v9 = vrot.slane %v4325_v58, 5  ;;  %v3124_v10 = vrot.slane %v4326_v59, 5  ;;  %v517_v12 = vor.u32 %v516_v3, %v513_v56  ;;  %v535_v14 = vshrl.u32 %v378_v1, 16  ;;  %v4073_v56 = vld [vmem:[%s4789_s5 + $0x44] sm:$0x1] }
  0x69   : > { %v527_v13 = vor.u32 %v526_v5, %v522_v4  ;;  %v538_v15 = vshll.u32 %v378_v1, 16  ;;  %v532_v17 = vrot.slane %v530_v7, 5  ;;  %v544_v20 = vshll.u32 %v379_v6, 16 }
  0x6a   : > { %2943 = vrot.lane.b32.xlu1 %v4302_v2, %s4704_s12  ;;  %v3122_v18 = vsel %vm4791_vm2, %v4366_v8, %v3121_v9  ;;  %v3123_v19 = vrot.slane %v3121_v9, 4  ;;  %v518_v23 = vrot.slane %v517_v12, 4  ;;  %v537_v25 = vrot.slane %v535_v14, 4  ;;  %v4076_v9 = vld [vmem:[%s4789_s5 + $0x50] sm:$0x1] }
  0x6b   : > { %v528_v24 = vrot.slane %v527_v13, 4  ;;  %v540_v26 = vrot.slane %v538_v15, 5  ;;  %3262 = vrot.lane.b32.xlu0 %v4381_v63, %s4705_s20  ;;  %v546_v28 = vrot.slane %v544_v20, 5  ;;  %v548_v29 = vshrl.u32 %v379_v6, 16  ;;  %v4557_v13 = vld [vmem:[%s4789_s5 + $0x3c] sm:$0xff]  }
  0x6c   : > { %v3125_v27 = vsel %vm4791_vm2, %v3123_v19, %v3124_v10  ;;  %v554_v30 = vshll.u32 %v380_v11, 16  ;;  %v523_v32 = vsel %vm4832_vm5, %v518_v23, %v522_v4  ;;  %v3983_v42 = vrot.slane %v923_v16, 9  ;;  %v4075_v4 = vld [vmem:[%s4789_s5 + $0x4c] sm:$0xf]  ;;  %v4135_v10 = vld [vmem:[%s4789_s5 + $0x3c] sm:$0xe] }
  0x6d   : > { %v533_v33 = vsel %vm4832_vm5, %v528_v24, %v532_v17  ;;  %v4382_v34 = vcombine.low %v3122_v18, %v3125_v27  ;;  %v541_v35 = vor.u32 %v540_v26, %v537_v25  ;;  %v550_v40 = vrot.slane %v548_v29, 4  ;;  %v4136_v16 = vld [vmem:[%s4789_s5 + $0x40] sm:$0xf]  ;;  %v4137_v17 = vld [vmem:[%s4789_s5 + $0x44] sm:$0x1] }
  0x6e   : > { %v3967_v39 = vcombine.low %v523_v32, %v533_v33  ;;  %v556_v41 = vrot.slane %v554_v30, 5  ;;  %v1040_v44 = vrot.slane %v924_v21, 5  ;;  %v1043_v45 = vrot.slane %v925_v22, 5  ;;  %v4138_v22 = vld [vmem:[%s4789_s5 + $0x48] sm:$0xe] }
  0x6f   : > { %v542_v43 = vrot.slane %v541_v35, 4  ;;  %v3984_v46 = vrot.slane %v926_v31, 9  ;;  %3264 = vrot.lane.b32.xlu0 %v4382_v34, %s4705_s20  ;;  %v551_v47 = vor.u32 %v550_v40, %v546_v28  ;;  %v1047_v48 = vrot.slane %v927_v36, 5  ;;  %v4139_v27 = vld [vmem:[%s4789_s5 + $0x4c] sm:$0xf] }
  0x70   : > { %854 = vrot.lane.b32.xlu1 %v3967_v39, %s4701_s9  ;;  %v1050_v49 = vrot.slane %v928_v37, 5  ;;  %v1558_v51 = vshrl.u32 %v4071_v38, 16  ;;  %v1041_v54 = vsel %vm4791_vm2, %v3983_v42, %v1040_v44  ;;  %v1042_v55 = vrot.slane %v1040_v44, 4  ;;  %v4140_v32 = vld [vmem:[%s4789_s5 + $0x50] sm:$0x1] }
  0x71   : > { %v547_v52 = vsel %vm4832_vm5, %v542_v43, %v546_v28  ;;  %v1561_v57 = vshll.u32 %v4071_v38, 16  ;;  %v552_v58 = vrot.slane %v551_v47, 4  ;;  %v1048_v59 = vsel %vm4791_vm2, %v3984_v46, %v1047_v48  ;;  %v4263_v46 = vld [vmem:[%s4789_s5 + $0x48] sm:$0xf] }
  0x72   : > { %v1049_v60 = vrot.slane %v1047_v48, 4  ;;  %v1560_v61 = vrot.slane %v1558_v51, 4  ;;  %v1044_v63 = vsel %vm4791_vm2, %v1042_v55, %v1043_v45  ;;  %v1567_v2 = vshll.u32 %v4072_v50, 16  ;;  %v4264_v51 = vld [vmem:[%s4789_s5 + $0x4c] sm:$0xf] }
  0x73   : > { %v1563_v1 = vrot.slane %v1561_v57, 5  ;;  %v1571_v3 = vshrl.u32 %v4072_v50, 16  ;;  %v557_v5 = vsel %vm4832_vm5, %v552_v58, %v556_v41  ;;  %v3999_v6 = vcombine.low %v1041_v54, %v1044_v63  ;;  %v4558_v41 = vld [vmem:[%s4789_s5 + $0x48] sm:$0xff]   ;;  %v4266_v58 = vld [vmem:[%s4789_s5 + $0x54] sm:$0xf] }
  0x74   : > { %v1051_v7 = vsel %vm4791_vm2, %v1049_v60, %v1050_v49  ;;  %v1577_v8 = vshll.u32 %v4073_v56, 16  ;;  %v3968_v11 = vcombine.low %v547_v52, %v557_v5  ;;  %v1569_v15 = vrot.slane %v1567_v2, 5  ;;  %v4265_v52 = vld [vmem:[%s4789_s5 + $0x50] sm:$0x1] }
  0x75   : > { %v4000_v12 = vcombine.low %v1048_v59, %v1051_v7  ;;  %v1564_v14 = vor.u32 %v1563_v1, %v1560_v61  ;;  %1178 = vrot.lane.b32.xlu0 %v3999_v6, %s4700_s8  ;;  %v1573_v18 = vrot.slane %v1571_v3, 4  ;;  %v1582_v20 = vshrl.u32 %v4074_v62, 16 }
  0x76   : > { %v1579_v19 = vrot.slane %v1577_v8, 5  ;;  %v1585_v21 = vshll.u32 %v4074_v62, 16  ;;  %856 = vrot.lane.b32.xlu1 %v3968_v11, %s4701_s9  ;;  %v1591_v24 = vshll.u32 %v4075_v4, 16  ;;  %v1595_v25 = vshrl.u32 %v4075_v4, 16  ;;  %v4267_v4 = vld [vmem:[%s4789_s5 + $0x58] sm:$0xf] }
  0x77   : > { %v1565_v23 = vrot.slane %v1564_v14, 4  ;;  %v1601_v26 = vshll.u32 %v4076_v9, 16  ;;  %v1574_v28 = vor.u32 %v1573_v18, %v1569_v15  ;;  %v1584_v29 = vrot.slane %v1582_v20, 4  ;;  %v4268_v9 = vld [vmem:[%s4789_s5 + $0x5c] sm:$0x1] }
  0x78   : > { %v1587_v30 = vrot.slane %v1585_v21, 5  ;;  %v4175_v31 = vrot.slane %v4135_v10, 9  ;;  %v1593_v34 = vrot.slane %v1591_v24, 5  ;;  %v1597_v35 = vrot.slane %v1595_v25, 4  ;;  %v4327_v14 = vld [vmem:[%s4789_s5 + $0x48] sm:$0xe] }
  0x79   : > { %v1570_v33 = vsel %vm4832_vm5, %v1565_v23, %v1569_v15  ;;  %v1603_v36 = vrot.slane %v1601_v26, 5  ;;  %1356 = vrot.lane.b32.xlu0 %v4557_v13, %s4698_s6  ;;  %v1575_v37 = vrot.slane %v1574_v28, 4  ;;  %v2084_v39 = vrot.slane %v4136_v16, 5  ;;  %v4559_v15 = vld [vmem:[%s4789_s5 + $0x48] sm:$0xff]   ;;  %v4329_v25 = vld [vmem:[%s4789_s5 + $0x50] sm:$0x1] }
  0x7a   : > { %v1588_v38 = vor.u32 %v1587_v30, %v1584_v29  ;;  %v2087_v40 = vrot.slane %v4137_v17, 5  ;;  %1180 = vrot.lane.b32.xlu1 %v4000_v12, %s4700_s8  ;;  %v1598_v42 = vor.u32 %v1597_v35, %v1593_v34  ;;  %v4176_v43 = vrot.slane %v4138_v22, 9  ;;  %v4328_v20 = vld [vmem:[%s4789_s5 + $0x4c] sm:$0xf]  ;;  %v381_v30 = vld [vmem:[%s4789_s5 + $0x48] sm:$0xf] }
  0x7b   : > { %v2091_v44 = vrot.slane %v4139_v27, 5  ;;  %v2094_v45 = vrot.slane %v4140_v32, 5  ;;  %v1580_v47 = vsel %vm4832_vm5, %v1575_v37, %v1579_v19  ;;  %v2085_v49 = vsel %vm4791_vm2, %v4175_v31, %v2084_v39  ;;  %v382_v35 = vld [vmem:[%s4789_s5 + $0x4c] sm:$0xf] }
  0x7c   : > { %v1589_v48 = vrot.slane %v1588_v38, 4  ;;  %v2086_v50 = vrot.slane %v2084_v39, 4  ;;  %v4111_v54 = vcombine.low %v1570_v33, %v1580_v47  ;;  %v1599_v55 = vrot.slane %v1598_v42, 4  ;;  %v4331_v47 = vld [vmem:[%s4789_s5 + $0x58] sm:$0xf] }
  0x7d   : > { %v2092_v56 = vsel %vm4791_vm2, %v4176_v43, %v2091_v44  ;;  %v2093_v57 = vrot.slane %v2091_v44, 4  ;;  %v2602_v61 = vshrl.u32 %v4263_v46, 16  ;;  %v2605_v62 = vshll.u32 %v4263_v46, 16  ;;  %v383_v44 = vld [vmem:[%s4789_s5 + $0x50] sm:$0x1] }
  0x7e   : > { %v1594_v59 = vsel %vm4832_vm5, %v1589_v48, %v1593_v34  ;;  %v2088_v60 = vsel %vm4791_vm2, %v2086_v50, %v2087_v40  ;;  %1358 = vrot.lane.b32.xlu1 %v4558_v41, %s4698_s6  ;;  %1901 = vrot.lane.b32.xlu0 %v4111_v54, %s4702_s10  ;;  %v1604_v63 = vsel %vm4832_vm5, %v1599_v55, %v1603_v36  ;;  %v2611_v3 = vshll.u32 %v4264_v51, 16  ;;  %v4560_v40 = vld [vmem:[%s4789_s5 + $0x54] sm:$0xff]  }
  0x7f   : > { %v4191_v1 = vcombine.low %v2085_v49, %v2088_v60  ;;  %v2095_v2 = vsel %vm4791_vm2, %v2093_v57, %v2094_v45  ;;  %v4112_v5 = vcombine.low %v1594_v59, %v1604_v63  ;;  %v2604_v7 = vrot.slane %v2602_v61, 4  ;;  %v4330_v46 = vld [vmem:[%s4789_s5 + $0x54] sm:$0xe] }
  0x80   : > { %v4192_v6 = vcombine.low %v2092_v56, %v2095_v2  ;;  %v2607_v8 = vrot.slane %v2605_v62, 5  ;;  %v2613_v10 = vrot.slane %v2611_v3, 5  ;;  %v2615_v11 = vshrl.u32 %v4264_v51, 16  ;;  %v384_v62 = vld [vmem:[%s4789_s5 + $0x54] sm:$0xf] }
  0x81   : > { %v2621_v12 = vshll.u32 %v4265_v52, 16  ;;  %v2626_v13 = vshrl.u32 %v4266_v58, 16  ;;  %v2629_v17 = vshll.u32 %v4266_v58, 16  ;;  %v2635_v18 = vshll.u32 %v4267_v4, 16  ;;  %v4332_v52 = vld [vmem:[%s4789_s5 + $0x5c] sm:$0x1] }
  0x82   : > { %v2608_v16 = vor.u32 %v2607_v8, %v2604_v7  ;;  %v2639_v19 = vshrl.u32 %v4267_v4, 16  ;;  %1903 = vrot.lane.b32.xlu1 %v4112_v5, %s4702_s10  ;;  %2222 = vrot.lane.b32.xlu0 %v4191_v1, %s4699_s7  ;;  %v2617_v21 = vrot.slane %v2615_v11, 4  ;;  %v2645_v24 = vshll.u32 %v4268_v9, 16  ;;  %v385_v4 = vld [vmem:[%s4789_s5 + $0x58] sm:$0xf] }
  0x83   : > { %v2623_v22 = vrot.slane %v2621_v12, 5  ;;  %v2628_v23 = vrot.slane %v2626_v13, 4  ;;  %v2631_v27 = vrot.slane %v2629_v17, 5  ;;  %v2637_v28 = vrot.slane %v2635_v18, 5  ;;  %v386_v11 = vld [vmem:[%s4789_s5 + $0x5c] sm:$0x1] }
  0x84   : > { %v2609_v26 = vrot.slane %v2608_v16, 4  ;;  %v2641_v29 = vrot.slane %v2639_v19, 4  ;;  %v2618_v31 = vor.u32 %v2617_v21, %v2613_v10  ;;  %v2647_v32 = vrot.slane %v2645_v24, 5  ;;  %v930_v19 = vld [vmem:[%s4789_s5 + $0x4c] sm:$0xf] }
  0x85   : > { %v4367_v33 = vrot.slane %v4327_v14, 9  ;;  %v3128_v34 = vrot.slane %v4328_v20, 5  ;;  %v2632_v37 = vor.u32 %v2631_v27, %v2628_v23  ;;  %v3131_v39 = vrot.slane %v4329_v25, 5  ;;  %v929_v14 = vld [vmem:[%s4789_s5 + $0x48] sm:$0xe] }
  0x86   : > { %v2614_v36 = vsel %vm4832_vm5, %v2609_v26, %v2613_v10  ;;  %v2642_v38 = vor.u32 %v2641_v29, %v2637_v28  ;;  %2224 = vrot.lane.b32.xlu1 %v4192_v6, %s4699_s7  ;;  %2400 = vrot.lane.b32.xlu0 %v4559_v15, %s4703_s11  ;;  %v2619_v41 = vrot.slane %v2618_v31, 4  ;;  %v559_v45 = vshrl.u32 %v381_v30, 16  ;;  %v931_v20 = vld [vmem:[%s4789_s5 + $0x50] sm:$0x1]  ;;  %v932_v21 = vld [vmem:[%s4789_s5 + $0x54] sm:$0xe] }
  0x87   : > { %v3129_v42 = vsel %vm4791_vm2, %v4367_v33, %v3128_v34  ;;  %v3130_v43 = vrot.slane %v3128_v34, 4  ;;  %v2633_v48 = vrot.slane %v2632_v37, 4  ;;  %v562_v50 = vshll.u32 %v381_v30, 16  ;;  %v933_v34 = vld [vmem:[%s4789_s5 + $0x58] sm:$0xf] }
  0x88   : > { %v2643_v49 = vrot.slane %v2642_v38, 4  ;;  %v568_v51 = vshll.u32 %v382_v35, 16  ;;  %v2624_v54 = vsel %vm4832_vm5, %v2619_v41, %v2623_v22  ;;  %v561_v56 = vrot.slane %v559_v45, 4  ;;  %v4078_v45 = vld [vmem:[%s4789_s5 + $0x58] sm:$0xf] }
  0x89   : > { %v3132_v55 = vsel %vm4791_vm2, %v3130_v43, %v3131_v39  ;;  %v572_v57 = vshrl.u32 %v382_v35, 16  ;;  %v4303_v58 = vcombine.low %v2614_v36, %v2624_v54  ;;  %v2638_v59 = vsel %vm4832_vm5, %v2633_v48, %v2637_v28  ;;  %v934_v35 = vld [vmem:[%s4789_s5 + $0x5c] sm:$0x1]  ;;  %v4077_v36 = vld [vmem:[%s4789_s5 + $0x54] sm:$0xf] }
  0x8a   : > { %v2648_v60 = vsel %vm4832_vm5, %v2643_v49, %v2647_v32  ;;  %v4383_v61 = vcombine.low %v3129_v42, %v3132_v55  ;;  %2402 = vrot.lane.b32.xlu1 %v4560_v40, %s4703_s11  ;;  %v564_v1 = vrot.slane %v562_v50, 5  ;;  %v570_v2 = vrot.slane %v568_v51, 5  ;;  %v4079_v49 = vld [vmem:[%s4789_s5 + $0x5c] sm:$0x1] }
  0x8b   : > { %v4304_v63 = vcombine.low %v2638_v59, %v2648_v60  ;;  %v574_v3 = vrot.slane %v572_v57, 4  ;;  %2945 = vrot.lane.b32.xlu0 %v4303_v58, %s4704_s12  ;;  %v578_v5 = vshll.u32 %v383_v44, 16  ;;  %v4368_v6 = vrot.slane %v4330_v46, 9 }
  0x8c   : > { %v3135_v7 = vrot.slane %v4331_v47, 5  ;;  %v3138_v8 = vrot.slane %v4332_v52, 5  ;;  %v565_v9 = vor.u32 %v564_v1, %v561_v56  ;;  %v583_v12 = vshrl.u32 %v384_v62, 16 }
  0x8d   : > { %v575_v10 = vor.u32 %v574_v3, %v570_v2  ;;  %v586_v13 = vshll.u32 %v384_v62, 16  ;;  %v580_v15 = vrot.slane %v578_v5, 5  ;;  %v592_v18 = vshll.u32 %v385_v4, 16 }
  0x8e   : > { %v3136_v16 = vsel %vm4791_vm2, %v4368_v6, %v3135_v7  ;;  %v3137_v17 = vrot.slane %v3135_v7, 4  ;;  %2947 = vrot.lane.b32.xlu1 %v4304_v63, %s4704_s12  ;;  %v566_v22 = vrot.slane %v565_v9, 4  ;;  %v585_v24 = vrot.slane %v583_v12, 4  ;;  %v4082_v9 = vld [vmem:[%s4789_s5 + $0x68] sm:$0x1] }
  0x8f   : > { %v576_v23 = vrot.slane %v575_v10, 4  ;;  %v588_v25 = vrot.slane %v586_v13, 5  ;;  %3266 = vrot.lane.b32.xlu0 %v4383_v61, %s4705_s20  ;;  %v594_v27 = vrot.slane %v592_v18, 5  ;;  %v596_v28 = vshrl.u32 %v385_v4, 16  ;;  %v5149_v56 = vpop.permute.xlu1 %1350  ;;  %v4080_v61 = vld [vmem:[%s4789_s5 + $0x60] sm:$0xf]  ;;  %v5154_v62 = vpop.permute.xlu0 %1348 }
  0x90   : > { %v3139_v26 = vsel %vm4791_vm2, %v3137_v17, %v3138_v8  ;;  %v602_v29 = vshll.u32 %v386_v11, 16  ;;  %v571_v30 = vsel %vm4832_vm5, %v566_v22, %v570_v2  ;;  %v3985_v40 = vrot.slane %v929_v14, 9  ;;  %v4081_v4 = vld [vmem:[%s4789_s5 + $0x64] sm:$0xf]  ;;  %v4141_v10 = vld [vmem:[%s4789_s5 + $0x54] sm:$0xe] }
  0x91   : > { %v581_v31 = vsel %vm4832_vm5, %v576_v23, %v580_v15  ;;  %v4384_v32 = vcombine.low %v3136_v16, %v3139_v26  ;;  %v589_v33 = vor.u32 %v588_v25, %v585_v24  ;;  %v598_v38 = vrot.slane %v596_v28, 4  ;;  %v4561_v13 = vld [vmem:[%s4789_s5 + $0x54] sm:$0xff]   ;;  %v4143_v17 = vld [vmem:[%s4789_s5 + $0x5c] sm:$0x1]  ;;  %v4144_v22 = vld [vmem:[%s4789_s5 + $0x60] sm:$0xe] }
  0x92   : > { %v3969_v37 = vcombine.low %v571_v30, %v581_v31  ;;  %v604_v39 = vrot.slane %v602_v29, 5  ;;  %v1054_v42 = vrot.slane %v930_v19, 5  ;;  %v1057_v43 = vrot.slane %v931_v20, 5  ;;  %v4142_v16 = vld [vmem:[%s4789_s5 + $0x58] sm:$0xf] }
  0x93   : > { %v590_v41 = vrot.slane %v589_v33, 4  ;;  %v3986_v44 = vrot.slane %v932_v21, 9  ;;  %3268 = vrot.lane.b32.xlu0 %v4384_v32, %s4705_s20  ;;  %v599_v46 = vor.u32 %v598_v38, %v594_v27  ;;  %v1061_v47 = vrot.slane %v933_v34, 5  ;;  %v4146_v33 = vld [vmem:[%s4789_s5 + $0x68] sm:$0x1] }
  0x94   : > { %858 = vrot.lane.b32.xlu1 %v3969_v37, %s4701_s9  ;;  %v1064_v48 = vrot.slane %v934_v35, 5  ;;  %v1606_v50 = vshrl.u32 %v4077_v36, 16  ;;  %v1055_v52 = vsel %vm4791_vm2, %v3985_v40, %v1054_v42  ;;  %v1056_v54 = vrot.slane %v1054_v42, 4 }
  0x95   : > { %v595_v51 = vsel %vm4832_vm5, %v590_v41, %v594_v27  ;;  %v1609_v55 = vshll.u32 %v4077_v36, 16  ;;  %v600_v57 = vrot.slane %v599_v46, 4  ;;  %v1062_v58 = vsel %vm4791_vm2, %v3986_v44, %v1061_v47  ;;  %v4145_v27 = vld [vmem:[%s4789_s5 + $0x64] sm:$0xf] }
  0x96   : > { %v1063_v59 = vrot.slane %v1061_v47, 4  ;;  %v1608_v60 = vrot.slane %v1606_v50, 4  ;;  %v1058_v63 = vsel %vm4791_vm2, %v1056_v54, %v1057_v43  ;;  %v1615_v2 = vshll.u32 %v4078_v45, 16  ;;  %v4269_v43 = vld [vmem:[%s4789_s5 + $0x60] sm:$0xf] }
  0x97   : > { %v1611_v1 = vrot.slane %v1609_v55, 5  ;;  %v1619_v3 = vshrl.u32 %v4078_v45, 16  ;;  %v605_v5 = vsel %vm4832_vm5, %v600_v57, %v604_v39  ;;  %v4001_v6 = vcombine.low %v1055_v52, %v1058_v63  ;;  %v5175_v34 = vpop.permute.xlu0 %2214  ;;  %v4562_v44 = vld [vmem:[%s4789_s5 + $0x60] sm:$0xff]  }
  0x98   : > { %v1065_v7 = vsel %vm4791_vm2, %v1063_v59, %v1064_v48  ;;  %v1625_v8 = vshll.u32 %v4079_v49, 16  ;;  %v3970_v11 = vcombine.low %v595_v51, %v605_v5  ;;  %v1617_v15 = vrot.slane %v1615_v2, 5  ;;  %v5172_v28 = vpop.permute.xlu1 %1170  ;;  %v4270_v49 = vld [vmem:[%s4789_s5 + $0x64] sm:$0xf] }
  0x99   : > { %v4002_v12 = vcombine.low %v1062_v58, %v1065_v7  ;;  %v1612_v14 = vor.u32 %v1611_v1, %v1608_v60  ;;  %1182 = vrot.lane.b32.xlu0 %v4001_v6, %s4700_s8  ;;  %v1621_v18 = vrot.slane %v1619_v3, 4  ;;  %v1630_v20 = vshrl.u32 %v4080_v61, 16  ;;  %v4271_v1 = vld [vmem:[%s4789_s5 + $0x68] sm:$0x1] }
  0x9a   : > { %v1627_v19 = vrot.slane %v1625_v8, 5  ;;  %v1633_v21 = vshll.u32 %v4080_v61, 16  ;;  %860 = vrot.lane.b32.xlu1 %v3970_v11, %s4701_s9  ;;  %v1639_v24 = vshll.u32 %v4081_v4, 16  ;;  %v1643_v25 = vshrl.u32 %v4081_v4, 16  ;;  %v4272_v4 = vld [vmem:[%s4789_s5 + $0x6c] sm:$0xf] }
  0x9b   : > { %v1613_v23 = vrot.slane %v1612_v14, 4  ;;  %v1649_v26 = vshll.u32 %v4082_v9, 16  ;;  %v1622_v29 = vor.u32 %v1621_v18, %v1617_v15  ;;  %v1632_v30 = vrot.slane %v1630_v20, 4  ;;  %v4572_v18 = vld [vmem:[%s4789_s5 + $0x18] sm:$0xff]   ;;  %v4580_v20 = vld [vmem:[%s4789_s5 + $0x30] sm:$0xff]  }
  0x9c   : > { %v1635_v31 = vrot.slane %v1633_v21, 5  ;;  %v4177_v32 = vrot.slane %v4141_v10, 9  ;;  %v1641_v36 = vrot.slane %v1639_v24, 5  ;;  %v1645_v37 = vrot.slane %v1643_v25, 4  ;;  %v5192_v60 = vpop.permute.xlu1 %1172  ;;  %v4273_v10 = vld [vmem:[%s4789_s5 + $0x70] sm:$0xf] }
  0x9d   : > { %v1618_v35 = vsel %vm4832_vm5, %v1613_v23, %v1617_v15  ;;  %v1651_v38 = vrot.slane %v1649_v26, 5  ;;  %1360 = vrot.lane.b32.xlu0 %v4561_v13, %s4698_s6  ;;  %v1623_v39 = vrot.slane %v1622_v29, 4  ;;  %v2098_v41 = vrot.slane %v4142_v16, 5  ;;  %v4274_v15 = vld [vmem:[%s4789_s5 + $0x74] sm:$0x1]  ;;  %v4565_v16 = vld [vmem:[%s4789_s5] sm:$0xff]  }
  0x9e   : > { %v1636_v40 = vor.u32 %v1635_v31, %v1632_v30  ;;  %v2101_v42 = vrot.slane %v4143_v17, 5  ;;  %1184 = vrot.lane.b32.xlu1 %v4002_v12, %s4700_s8  ;;  %v1646_v45 = vor.u32 %v1645_v37, %v1641_v36  ;;  %v4178_v46 = vrot.slane %v4144_v22, 9  ;;  %v4566_v17 = vld [vmem:[%s4789_s5 + $0xc] sm:$0xff]   ;;  %v4581_v21 = vld [vmem:[%s4789_s5 + $0x3c] sm:$0xff]   ;;  %347 = vst.msk [vmem:[#allocation2] sm:$0xff] %vm346_vm6, %v4565_v16  ;;  %349 = vst.msk [vmem:[#allocation2 + $0x10] sm:$0xff] %vm346_vm6, %v4572_v18 }
  0x9f   : > { %v2105_v47 = vrot.slane %v4145_v27, 5  ;;  %v2108_v48 = vrot.slane %v4146_v33, 5  ;;  %v1628_v50 = vsel %vm4832_vm5, %v1623_v39, %v1627_v19  ;;  %v2099_v52 = vsel %vm4791_vm2, %v4177_v32, %v2098_v41  ;;  %v4574_v19 = vld [vmem:[%s4789_s5 + $0x24] sm:$0xff]   ;;  %v4333_v33 = vld [vmem:[%s4789_s5 + $0x60] sm:$0xe]  ;;  %348 = vst.msk [vmem:[#allocation2 + $0x8] sm:$0xff] %vm346_vm6, %v4566_v17 }
  0xa0   : > { %v1637_v51 = vrot.slane %v1636_v40, 4  ;;  %v2100_v54 = vrot.slane %v2098_v41, 4  ;;  %v4113_v55 = vcombine.low %v1618_v35, %v1628_v50  ;;  %v1647_v57 = vrot.slane %v1646_v45, 4  ;;  %v4586_v22 = vld [vmem:[%s4789_s5 + $0x48] sm:$0xff]   ;;  %v4563_v23 = vld [vmem:[%s4789_s5 + $0x60] sm:$0xff]   ;;  %v4587_v35 = vld [vmem:[%s4789_s5 + $0x54] sm:$0xff]   ;;  %v5226_v41 = vpop.permute.xlu1 %2216 }
  0xa1   : > { %v5190_v58 = vsel %vm4791_vm2, %v4178_v46, %v2105_v47  ;;  %v2107_v59 = vrot.slane %v2105_v47, 4  ;;  %v2650_v2 = vshrl.u32 %v4269_v43, 16  ;;  %v2653_v3 = vshll.u32 %v4269_v43, 16  ;;  %v4334_v40 = vld [vmem:[%s4789_s5 + $0x64] sm:$0xf]  ;;  %350 = vst.msk [vmem:[#allocation2 + $0x18] sm:$0xff] %vm346_vm6, %v4574_v19 }
  0xa2   : > { %v1642_v61 = vsel %vm4832_vm5, %v1637_v51, %v1641_v36  ;;  %v2102_v63 = vsel %vm4791_vm2, %v2100_v54, %v2101_v42  ;;  %v5200_v5 = vpop.permute.xlu0 %846  ;;  %1362 = vrot.lane.b32.xlu1 %v4562_v44, %s4698_s6  ;;  %1905 = vrot.lane.b32.xlu0 %v4113_v55, %s4702_s10  ;;  %v1652_v6 = vsel %vm4832_vm5, %v1647_v57, %v1651_v38  ;;  %v2659_v9 = vshll.u32 %v4270_v49, 16  ;;  %v4335_v46 = vld [vmem:[%s4789_s5 + $0x68] sm:$0x1]  ;;  %v387_v50 = vld [vmem:[%s4789_s5 + $0x60] sm:$0xf] }
  0xa3   : > { %v4193_v7 = vcombine.low %v2099_v52, %v2102_v63  ;;  %v2109_v8 = vsel %vm4791_vm2, %v2107_v59, %v2108_v48  ;;  %v4114_v11 = vcombine.low %v1642_v61, %v1652_v6  ;;  %v2652_v13 = vrot.slane %v2650_v2, 4  ;;  %v4564_v51 = vld [vmem:[%s4789_s5 + $0x6c] sm:$0xff]   ;;  %v388_v57 = vld [vmem:[%s4789_s5 + $0x64] sm:$0xf]  ;;  %351 = vst.msk [vmem:[#allocation2 + $0x20] sm:$0xff] %vm346_vm6, %v4580_v20  ;;  %352 = vst.msk [vmem:[#allocation2 + $0x28] sm:$0xff] %vm346_vm6, %v4581_v21 }
  0xa4   : > { %v4194_v12 = vcombine.low %v5190_v58, %v2109_v8  ;;  %v2655_v14 = vrot.slane %v2653_v3, 5  ;;  %v5219_v24 = vrot.slane %v2659_v9, 5  ;;  %v2663_v25 = vshrl.u32 %v4270_v49, 16  ;;  %353 = vst.msk [vmem:[#allocation2 + $0x30] sm:$0xff] %vm346_vm6, %v4586_v22  ;;  %354 = vst.msk [vmem:[#allocation2 + $0x38] sm:$0xff] %vm346_vm6, %v4587_v35 }
  0xa5   : > { %v2669_v26 = vshll.u32 %v4271_v1, 16  ;;  %v2674_v27 = vshrl.u32 %v4272_v4, 16  ;;  %v2677_v30 = vshll.u32 %v4272_v4, 16  ;;  %v2683_v31 = vshll.u32 %v4273_v10, 16  ;;  %895 = vst.msk [vmem:[#allocation2] sm:$0xff] %vm894_vm7, %v5200_v5 }
  0xa6   : > { %v2656_v29 = vor.u32 %v2655_v14, %v2652_v13  ;;  %v2687_v32 = vshrl.u32 %v4273_v10, 16  ;;  %1907 = vrot.lane.b32.xlu1 %v4114_v11, %s4702_s10  ;;  %2226 = vrot.lane.b32.xlu0 %v4193_v7, %s4699_s7  ;;  %v2665_v36 = vrot.slane %v2663_v25, 4  ;;  %v2693_v39 = vshll.u32 %v4274_v15, 16  ;;  %v389_v1 = vld [vmem:[%s4789_s5 + $0x68] sm:$0x1]  ;;  %1219 = vst.msk [vmem:[#allocation2] sm:$0xff] %vm1218_vm8, %v5172_v28 }
  0xa7   : > { %v2671_v37 = vrot.slane %v2669_v26, 5  ;;  %v2676_v38 = vrot.slane %v2674_v27, 4  ;;  %v2679_v43 = vrot.slane %v2677_v30, 5  ;;  %v2685_v44 = vrot.slane %v2683_v31, 5  ;;  %v849_v47 = vpop.permute.xlu0 %848  ;;  %v4336_v2 = vld [vmem:[%s4789_s5 + $0x6c] sm:$0xe] }
  0xa8   : > { %v2657_v42 = vrot.slane %v2656_v29, 4  ;;  %v2689_v45 = vrot.slane %v2687_v32, 4  ;;  %v2666_v48 = vor.u32 %v2665_v36, %v5219_v24  ;;  %v2695_v49 = vrot.slane %v2693_v39, 5  ;;  %896 = vst.msk [vmem:[#allocation2 + $0x8] sm:$0xff] %vm894_vm7, %v849_v47  ;;  %v4337_v8 = vld [vmem:[%s4789_s5 + $0x70] sm:$0xf] }
  0xa9   : > { %v2680_v54 = vor.u32 %v2679_v43, %v2676_v38  ;;  %v4369_v59 = vrot.slane %v4333_v33, 9  ;;  %v3142_v61 = vrot.slane %v4334_v40, 5  ;;  %v3145_v63 = vrot.slane %v4335_v46, 5  ;;  %1220 = vst.msk [vmem:[#allocation2 + $0x8] sm:$0xff] %vm1218_vm8, %v5192_v60  ;;  %v4338_v9 = vld [vmem:[%s4789_s5 + $0x74] sm:$0x1] }
  0xaa   : > { %v2662_v52 = vsel %vm4832_vm5, %v2657_v42, %v5219_v24  ;;  %v2690_v55 = vor.u32 %v2689_v45, %v2685_v44  ;;  %2228 = vrot.lane.b32.xlu1 %v4194_v12, %s4699_s7  ;;  %2404 = vrot.lane.b32.xlu0 %v4563_v23, %s4703_s11  ;;  %v2667_v58 = vrot.slane %v2666_v48, 4  ;;  %v607_v6 = vshrl.u32 %v387_v50, 16  ;;  %v390_v5 = vld [vmem:[%s4789_s5 + $0x6c] sm:$0xf]  ;;  %v391_v21 = vld [vmem:[%s4789_s5 + $0x70] sm:$0xf] }
  0xab   : > { %v2681_v3 = vrot.slane %v2680_v54, 4  ;;  %v610_v7 = vshll.u32 %v387_v50, 16  ;;  %v3143_v11 = vsel %vm4791_vm2, %v4369_v59, %v3142_v61  ;;  %v3144_v12 = vrot.slane %v3142_v61, 4  ;;  %v5262_v14 = vpop.permute.xlu1 %1895  ;;  %v392_v35 = vld [vmem:[%s4789_s5 + $0x74] sm:$0x1]  ;;  %1398 = vst.msk [vmem:[#allocation2 + $0x8] sm:$0xff] %vm1396_vm9, %v5149_v56 }
  0xac   : > { %v2691_v4 = vrot.slane %v2690_v55, 4  ;;  %v2672_v10 = vsel %vm4832_vm5, %v2667_v58, %v2671_v37  ;;  %v616_v13 = vshll.u32 %v388_v57, 16  ;;  %v609_v16 = vrot.slane %v607_v6, 4  ;;  %v935_v43 = vld [vmem:[%s4789_s5 + $0x60] sm:$0xe]  ;;  %1397 = vst.msk [vmem:[#allocation2] sm:$0xff] %vm1396_vm9, %v5154_v62 }
  0xad   : > { %v4305_v28 = vcombine.low %v2662_v52, %v2672_v10  ;;  %v2686_v15 = vsel %vm4832_vm5, %v2681_v3, %v2685_v44  ;;  %v3146_v18 = vsel %vm4791_vm2, %v3144_v12, %v3145_v63  ;;  %v612_v19 = vrot.slane %v610_v7, 5  ;;  %v936_v50 = vld [vmem:[%s4789_s5 + $0x64] sm:$0xf]  ;;  %v937_v55 = vld [vmem:[%s4789_s5 + $0x68] sm:$0x1]  ;;  %1943 = vst.msk [vmem:[#allocation2 + $0x8] sm:$0xff] %vm1941_vm10, %v5262_v14 }
  0xae   : > { %v2696_v60 = vsel %vm4832_vm5, %v2691_v4, %v2695_v49  ;;  %2406 = vrot.lane.b32.xlu1 %v4564_v51, %s4703_s11  ;;  %v618_v20 = vrot.slane %v616_v13, 5  ;;  %v4385_v23 = vcombine.low %v3143_v11, %v3146_v18  ;;  %v620_v24 = vshrl.u32 %v388_v57, 16  ;;  %v938_v63 = vld [vmem:[%s4789_s5 + $0x6c] sm:$0xe]  ;;  %v940_v6 = vld [vmem:[%s4789_s5 + $0x74] sm:$0x1] }
  0xaf   : > { %v4306_v17 = vcombine.low %v2686_v15, %v2696_v60  ;;  %v1894_v22 = vpop.permute.xlu0 %1893  ;;  %2949 = vrot.lane.b32.xlu0 %v4305_v28, %s4704_s12  ;;  %v626_v25 = vshll.u32 %v389_v1, 16  ;;  %v4370_v26 = vrot.slane %v4336_v2, 9  ;;  %v613_v27 = vor.u32 %v612_v19, %v609_v16  ;;  %v5280_v45 = vpop.permute.xlu1 %2394  ;;  %v939_v1 = vld [vmem:[%s4789_s5 + $0x70] sm:$0xf]  ;;  %v4083_v28 = vld [vmem:[%s4789_s5 + $0x6c] sm:$0xf] }
  0xb0   : > { %v3149_v29 = vrot.slane %v4337_v8, 5  ;;  %v3152_v30 = vrot.slane %v4338_v9, 5  ;;  %v631_v31 = vshrl.u32 %v390_v5, 16  ;;  %v622_v32 = vrot.slane %v620_v24, 4  ;;  %1942 = vst.msk [vmem:[#allocation2] sm:$0xff] %vm1941_vm10, %v1894_v22  ;;  %v4592_v19 = vld [vmem:[%s4789_s5 + $0x60] sm:$0xff]  }
  0xb1   : > { %v628_v33 = vrot.slane %v626_v25, 5  ;;  %v634_v36 = vshll.u32 %v390_v5, 16  ;;  %v640_v37 = vshll.u32 %v391_v21, 16  ;;  %v614_v38 = vrot.slane %v613_v27, 4  ;;  %v4084_v15 = vld [vmem:[%s4789_s5 + $0x70] sm:$0xf] }
  0xb2   : > { %2951 = vrot.lane.b32.xlu1 %v4306_v17, %s4704_s12  ;;  %v3150_v39 = vsel %vm4791_vm2, %v4370_v26, %v3149_v29  ;;  %v3151_v40 = vrot.slane %v3149_v29, 4  ;;  %v633_v42 = vrot.slane %v631_v31, 4  ;;  %v623_v46 = vor.u32 %v622_v32, %v618_v20  ;;  %v4085_v14 = vld [vmem:[%s4789_s5 + $0x74] sm:$0x1]  ;;  %2263 = vst.msk [vmem:[#allocation2] sm:$0xff] %vm2262_vm11, %v5175_v34  ;;  %2264 = vst.msk [vmem:[#allocation2 + $0x8] sm:$0xff] %vm2262_vm11, %v5226_v41 }
  0xb3   : > { %v5278_v44 = vpop.permute.xlu0 %2392  ;;  %3270 = vrot.lane.b32.xlu0 %v4385_v23, %s4705_s20  ;;  %v636_v47 = vrot.slane %v634_v36, 5  ;;  %v642_v48 = vrot.slane %v640_v37, 5  ;;  %v644_v49 = vshrl.u32 %v391_v21, 16  ;;  %v619_v51 = vsel %vm4832_vm5, %v614_v38, %v618_v20  ;;  %v4086_v21 = vld [vmem:[%s4789_s5 + $0x78] sm:$0xf]  ;;  %355 = vst.msk [vmem:[#allocation2 + $0x40] sm:$0xff] %vm346_vm6, %v4592_v19 }
  0xb4   : > { %v3153_v52 = vsel %vm4791_vm2, %v3151_v40, %v3152_v30  ;;  %v650_v54 = vshll.u32 %v392_v35, 16  ;;  %v624_v57 = vrot.slane %v623_v46, 4  ;;  %v3987_v3 = vrot.slane %v935_v43, 9  ;;  %v4087_v27 = vld [vmem:[%s4789_s5 + $0x7c] sm:$0xf]  ;;  %2441 = vst.msk [vmem:[#allocation2] sm:$0xff] %vm2440_vm12, %v5278_v44 }
  0xb5   : > { %v4386_v58 = vcombine.low %v3150_v39, %v3153_v52  ;;  %v637_v59 = vor.u32 %v636_v47, %v633_v42  ;;  %v646_v61 = vrot.slane %v644_v49, 4  ;;  %v1068_v4 = vrot.slane %v936_v50, 5  ;;  %2442 = vst.msk [vmem:[#allocation2 + $0x8] sm:$0xff] %vm2440_vm12, %v5280_v45  ;;  %v4593_v35 = vld [vmem:[%s4789_s5 + $0x6c] sm:$0xff]   ;;  %v4149_v52 = vld [vmem:[%s4789_s5 + $0x74] sm:$0x1] }
  0xb6   : > { %v652_v2 = vrot.slane %v650_v54, 5  ;;  %v629_v8 = vsel %vm4832_vm5, %v624_v57, %v628_v33  ;;  %v1071_v62 = vrot.slane %v937_v55, 5  ;;  %v3988_v12 = vrot.slane %v938_v63, 9  ;;  %v4088_v33 = vld [vmem:[%s4789_s5 + $0x80] sm:$0x1]  ;;  %v4568_v41 = vld [vmem:[%s4789_s5 + $0x6c] sm:$0xff]  }
  0xb7   : > { %v2938_v7 = vpop.permute.xlu0 %2937  ;;  %3272 = vrot.lane.b32.xlu0 %v4386_v58, %s4705_s20  ;;  %v638_v9 = vrot.slane %v637_v59, 4  ;;  %v647_v56 = vor.u32 %v646_v61, %v642_v48  ;;  %v3971_v5 = vcombine.low %v619_v51, %v629_v8  ;;  %v1069_v10 = vsel %vm4791_vm2, %v3987_v3, %v1068_v4  ;;  %v4147_v40 = vld [vmem:[%s4789_s5 + $0x6c] sm:$0xe]  ;;  %v4148_v46 = vld [vmem:[%s4789_s5 + $0x70] sm:$0xf]  ;;  %356 = vst.msk [vmem:[#allocation2 + $0x48] sm:$0xff] %vm346_vm6, %v4593_v35 }
  0xb8   : > { %v1070_v11 = vrot.slane %v1068_v4, 4  ;;  %v2940_v13 = vpop.permute.xlu1 %2939  ;;  %v1075_v17 = vrot.slane %v939_v1, 5  ;;  %v1078_v18 = vrot.slane %v940_v6, 5  ;;  %v1654_v30 = vshrl.u32 %v4083_v28, 16  ;;  %2986 = vst.msk [vmem:[#allocation2] sm:$0xff] %vm2985_vm13, %v2938_v7  ;;  %v4569_v61 = vld [vmem:[%s4789_s5 + $0x78] sm:$0xff]  }
  0xb9   : > { %v643_v60 = vsel %vm4832_vm5, %v638_v9, %v642_v48  ;;  %v648_v16 = vrot.slane %v647_v56, 4  ;;  %862 = vrot.lane.b32.xlu1 %v3971_v5, %s4701_s9  ;;  %v1657_v31 = vshll.u32 %v4083_v28, 16  ;;  %v1663_v32 = vshll.u32 %v4084_v15, 16  ;;  %2987 = vst.msk [vmem:[#allocation2 + $0x8] sm:$0xff] %vm2985_vm13, %v2940_v13  ;;  %v4150_v59 = vld [vmem:[%s4789_s5 + $0x78] sm:$0xe] }
  0xba   : > { %v1072_v20 = vsel %vm4791_vm2, %v1070_v11, %v1071_v62  ;;  %v1076_v25 = vsel %vm4791_vm2, %v3988_v12, %v1075_v17  ;;  %v1077_v26 = vrot.slane %v1075_v17, 4  ;;  %v1667_v36 = vshrl.u32 %v4084_v15, 16  ;;  %v4151_v3 = vld [vmem:[%s4789_s5 + $0x7c] sm:$0xf]  ;;  %v4152_v9 = vld [vmem:[%s4789_s5 + $0x80] sm:$0x1] }
  0xbb   : > { %v3259_v22 = vpop.permute.xlu0 %3258  ;;  %v653_v23 = vsel %vm4832_vm5, %v648_v16, %v652_v2  ;;  %v4003_v24 = vcombine.low %v1069_v10, %v1072_v20  ;;  %v1673_v37 = vshll.u32 %v4085_v14, 16  ;;  %v1678_v38 = vshrl.u32 %v4086_v21, 16  ;;  %v4577_v56 = vld [vmem:[%s6089_s1 + $0x20] ss:$0 sps:$4 sm:$0xff]   ;;  %v4275_v20 = vld [vmem:[%s4789_s5 + $0x78] sm:$0xf] }
  0xbc   : > { %v3972_v29 = vcombine.low %v643_v60, %v653_v23  ;;  %v1079_v34 = vsel %vm4791_vm2, %v1077_v26, %v1078_v18  ;;  %v1656_v43 = vrot.slane %v1654_v30, 4  ;;  %v1659_v44 = vrot.slane %v1657_v31, 5  ;;  %3307 = vst.msk [vmem:[#allocation2] sm:$0xff] %vm3306_vm14, %v3259_v22  ;;  %v4277_v26 = vld [vmem:[%s4789_s5 + $0x80] sm:$0x1]  ;;  %4494 = vmatprep.subr.msk.bf16.mxu0 %vm3424_vm15, %v4577_v56  ;;  %4495 = vmatprep.subr.msk.bf16.mxu1 %vm3424_vm15, %v4577_v56 }
  0xbd   : > { %1186 = vrot.lane.b32.xlu0 %v4003_v24, %s4700_s8  ;;  %v4004_v42 = vcombine.low %v1076_v25, %v1079_v34  ;;  %v1665_v45 = vrot.slane %v1663_v32, 5  ;;  %v1669_v48 = vrot.slane %v1667_v36, 4  ;;  %v1675_v49 = vrot.slane %v1673_v37, 5  ;;  %v4276_v25 = vld [vmem:[%s4789_s5 + $0x7c] sm:$0xf] }
  0xbe   : > { %v851_v39 = vpop.permute.xlu1 %850  ;;  %864 = vrot.lane.b32.xlu1 %v3972_v29, %s4701_s9  ;;  %v1680_v50 = vrot.slane %v1678_v38, 4  ;;  %v1681_v51 = vshll.u32 %v4086_v21, 16  ;;  %v1660_v54 = vor.u32 %v1659_v44, %v1656_v43  ;;  %v1687_v55 = vshll.u32 %v4087_v27, 16  ;;  %v4278_v32 = vld [vmem:[%s4789_s5 + $0x84] sm:$0xf] }
  0xbf   : > { %897 = vst.msk [vmem:[#allocation2 + $0x10] sm:$0xff] %vm894_vm7, %v851_v39  ;;  %v3261_v47 = vpop.permute.xlu0 %3260  ;;  %v1691_v57 = vshrl.u32 %v4087_v27, 16  ;;  %v1697_v58 = vshll.u32 %v4088_v33, 16  ;;  %v1670_v63 = vor.u32 %v1669_v48, %v1665_v45  ;;  %v4179_v2 = vrot.slane %v4147_v40, 9  ;;  %v4279_v33 = vld [vmem:[%s4789_s5 + $0x88] sm:$0xf] }
  0xc0   : > { %v1683_v1 = vrot.slane %v1681_v51, 5  ;;  %v1661_v4 = vrot.slane %v1660_v54, 4  ;;  %v1689_v6 = vrot.slane %v1687_v55, 5  ;;  %3308 = vst.msk [vmem:[#allocation2 + $0x8] sm:$0xff] %vm3306_vm14, %v3261_v47  ;;  %v2112_v10 = vrot.slane %v4148_v46, 5  ;;  %v4575_v46 = vld [vmem:[%s4789_s5 + $0x78] sm:$0xff]  }
  0xc1   : > { %1364 = vrot.lane.b32.xlu0 %v4568_v41, %s4698_s6  ;;  %v1693_v7 = vrot.slane %v1691_v57, 4  ;;  %v1699_v8 = vrot.slane %v1697_v58, 5  ;;  %v1671_v62 = vrot.slane %v1670_v63, 4  ;;  %v2115_v11 = vrot.slane %v4149_v52, 5  ;;  %v4280_v43 = vld [vmem:[%s4789_s5 + $0x8c] sm:$0x1] }
  0xc2   : > { %1188 = vrot.lane.b32.xlu1 %v4004_v42, %s4700_s8  ;;  %v1684_v5 = vor.u32 %v1683_v1, %v1680_v50  ;;  %v1666_v28 = vsel %vm4832_vm5, %v1661_v4, %v1665_v45  ;;  %v4180_v60 = vrot.slane %v4150_v59, 9  ;;  %v2119_v16 = vrot.slane %v4151_v3, 5  ;;  %v4339_v50 = vld [vmem:[%s4789_s5 + $0x78] sm:$0xe]  ;;  %v4340_v58 = vld [vmem:[%s4789_s5 + $0x7c] sm:$0xf] }
  0xc3   : > { %v1175_v13 = vpop.permute.xlu0 %1174  ;;  %v1694_v15 = vor.u32 %v1693_v7, %v1689_v6  ;;  %v1676_v17 = vsel %vm4832_vm5, %v1671_v62, %v1675_v49  ;;  %v2113_v14 = vsel %vm4791_vm2, %v4179_v2, %v2112_v10  ;;  %v2114_v19 = vrot.slane %v2112_v10, 4  ;;  %v3323_v39 = vld [vmem:[#allocation2] sm:$0xff] }
  0xc4   : > { %v853_v12 = vpop.permute.xlu1 %852  ;;  %1221 = vst.msk [vmem:[#allocation2 + $0x10] sm:$0xff] %vm1218_vm8, %v1175_v13  ;;  %v1685_v18 = vrot.slane %v1684_v5, 4  ;;  %v4115_v21 = vcombine.low %v1666_v28, %v1676_v17  ;;  %v5365_v23 = vsel %vm4791_vm2, %v4180_v60, %v2119_v16  ;;  %v2121_v24 = vrot.slane %v2119_v16, 4  ;;  %4452 = vmatprep.mubr.msk.bf16.mxu0 %vm3375_vm0, %v3323_v39  ;;  %v4341_v2 = vld [vmem:[%s4789_s5 + $0x80] sm:$0x1] }
  0xc5   : > { %898 = vst.msk [vmem:[#allocation2 + $0x18] sm:$0xff] %vm894_vm7, %v853_v12  ;;  %v1695_v22 = vrot.slane %v1694_v15, 4  ;;  %v2116_v29 = vsel %vm4791_vm2, %v2114_v19, %v2115_v11  ;;  %v2122_v30 = vrot.slane %v4152_v9, 5  ;;  %v3426_v36 = vsel %vm3424_vm15, %v4577_v56, 0  ;;  %v393_v9 = vld [vmem:[%s4789_s5 + $0x78] sm:$0xf] }
  0xc6   : > { %1366 = vrot.lane.b32.xlu1 %v4569_v61, %s4698_s6  ;;  %v1690_v27 = vsel %vm4832_vm5, %v1685_v18, %v1689_v6  ;;  %1909 = vrot.lane.b32.xlu0 %v4115_v21, %s4702_s10  ;;  %v4195_v41 = vcombine.low %v2113_v14, %v2116_v29  ;;  %v2698_v40 = vshrl.u32 %v4275_v20, 16  ;;  %v2701_v42 = vshll.u32 %v4275_v20, 16  ;;  %v394_v11 = vld [vmem:[%s4789_s5 + $0x7c] sm:$0xf]  ;;  %v4576_v12 = vld [vmem:[%s4789_s5 + $0x84] sm:$0xff]  }
  0xc7   : > { %v1353_v35 = vpop.permute.xlu0 %1352  ;;  %v1700_v34 = vsel %vm4832_vm5, %v1695_v22, %v1699_v8  ;;  %v2123_v38 = vsel %vm4791_vm2, %v2121_v24, %v2122_v30  ;;  %4451 = vmatpush3.bf16.msra.mxu0 %v3426_v36  ;;  %v3324_v44 = vld [vmem:[#allocation2 + $0x8] sm:$0xff]  ;;  %v2707_v47 = vshll.u32 %v4276_v25, 16  ;;  %v2711_v48 = vshrl.u32 %v4276_v25, 16  ;;  %4493 = vmatpush3.bf16.msra.mxu1 %v3426_v36  ;;  %v395_v16 = vld [vmem:[%s4789_s5 + $0x80] sm:$0x1] }
  0xc8   : > { %v1177_v31 = vpop.permute.xlu1 %1176  ;;  %1399 = vst.msk [vmem:[#allocation2 + $0x10] sm:$0xff] %vm1396_vm9, %v1353_v35  ;;  %v4116_v37 = vcombine.low %v1690_v27, %v1700_v34  ;;  %v4196_v45 = vcombine.low %v5365_v23, %v2123_v38  ;;  %v2717_v49 = vshll.u32 %v4277_v26, 16  ;;  %v2700_v51 = vrot.slane %v2698_v40, 4  ;;  %v4342_v21 = vld [vmem:[%s4789_s5 + $0x84] sm:$0xe]  ;;  %v4596_v27 = vld [vmem:[%s4789_s5 + $0x78] sm:$0xff]  }
  0xc9   : > { %1222 = vst.msk [vmem:[#allocation2 + $0x18] sm:$0xff] %vm1218_vm8, %v1177_v31  ;;  %v2703_v52 = vrot.slane %v2701_v42, 5  ;;  %v2722_v54 = vshrl.u32 %v4278_v32, 16  ;;  %v2725_v55 = vshll.u32 %v4278_v32, 16  ;;  %v2709_v59 = vrot.slane %v2707_v47, 5 }
  0xca   : > { %1911 = vrot.lane.b32.xlu1 %v4116_v37, %s4702_s10  ;;  %2230 = vrot.lane.b32.xlu0 %v4195_v41, %s4699_s7  ;;  %v2713_v61 = vrot.slane %v2711_v48, 4  ;;  %v2719_v63 = vrot.slane %v2717_v49, 5  ;;  %v2731_v1 = vshll.u32 %v4279_v33, 16  ;;  %v2735_v8 = vshrl.u32 %v4279_v33, 16  ;;  %v4343_v33 = vld [vmem:[%s4789_s5 + $0x88] sm:$0xf] }
  0xcb   : > { %4453 = vmatmul.mubr.msk.bf16.vlgmr.msra.gmra.mrb[0].mxu0 %vm3375_vm0, %v3324_v44  ;;  %v2704_v4 = vor.u32 %v2703_v52, %v2700_v51  ;;  %v2724_v6 = vrot.slane %v2722_v54, 4  ;;  %v2727_v7 = vrot.slane %v2725_v55, 5  ;;  %v2741_v5 = vshll.u32 %v4280_v43, 16  ;;  %v4344_v37 = vld [vmem:[%s4789_s5 + $0x8c] sm:$0x1]  ;;  %357 = vst.msk [vmem:[#allocation2 + $0x50] sm:$0xff] %vm346_vm6, %v4596_v27 }
  0xcc   : > { %v1355_v57 = vpop.permute.xlu1 %1354  ;;  %v2714_v56 = vor.u32 %v2713_v61, %v2709_v59  ;;  %v2733_v62 = vrot.slane %v2731_v1, 5  ;;  %v4371_v10 = vrot.slane %v4339_v50, 9  ;;  %v2737_v15 = vrot.slane %v2735_v8, 4  ;;  %v396_v44 = vld [vmem:[%s4789_s5 + $0x84] sm:$0xf] }
  0xcd   : > { %1400 = vst.msk [vmem:[#allocation2 + $0x18] sm:$0xff] %vm1396_vm9, %v1355_v57  ;;  %v1898_v3 = vpop.permute.xlu0 %1897  ;;  %v2705_v13 = vrot.slane %v2704_v4, 4  ;;  %v2728_v28 = vor.u32 %v2727_v7, %v2724_v6  ;;  %v3156_v60 = vrot.slane %v4340_v58, 5  ;;  %v2743_v14 = vrot.slane %v2741_v5, 5  ;;  %v397_v50 = vld [vmem:[%s4789_s5 + $0x88] sm:$0xf] }
  0xce   : > { %1944 = vst.msk [vmem:[#allocation2 + $0x10] sm:$0xff] %vm1941_vm10, %v1898_v3  ;;  %2232 = vrot.lane.b32.xlu1 %v4196_v45, %s4699_s7  ;;  %2408 = vrot.lane.b32.xlu0 %v4575_v46, %s4703_s11  ;;  %v2715_v18 = vrot.slane %v2714_v56, 4  ;;  %v3159_v19 = vrot.slane %v4341_v2, 5  ;;  %v655_v20 = vshrl.u32 %v393_v9, 16  ;;  %v2738_v25 = vor.u32 %v2737_v15, %v2733_v62  ;;  %v941_v7 = vld [vmem:[%s4789_s5 + $0x78] sm:$0xe] }
  0xcf   : > { %v2710_v23 = vsel %vm4832_vm5, %v2705_v13, %v2709_v59  ;;  %v2729_v24 = vrot.slane %v2728_v28, 4  ;;  %v3157_v26 = vsel %vm4791_vm2, %v4371_v10, %v3156_v60  ;;  %v3158_v30 = vrot.slane %v3156_v60, 4  ;;  %v398_v59 = vld [vmem:[%s4789_s5 + $0x8c] sm:$0x1]  ;;  %v4597_v8 = vld [vmem:[%s4789_s5 + $0x84] sm:$0xff]  }
  0xd0   : > { %v1900_v17 = vpop.permute.xlu1 %1899  ;;  %v2720_v29 = vsel %vm4832_vm5, %v2715_v18, %v2719_v63  ;;  %v657_v31 = vrot.slane %v655_v20, 4  ;;  %v658_v32 = vshll.u32 %v393_v9, 16  ;;  %v2739_v41 = vrot.slane %v2738_v25, 4  ;;  %v942_v10 = vld [vmem:[%s4789_s5 + $0x7c] sm:$0xf]  ;;  %358 = vst.msk [vmem:[#allocation2 + $0x58] sm:$0xff] %vm346_vm6, %v4597_v8 }
  0xd1   : > { %1945 = vst.msk [vmem:[#allocation2 + $0x18] sm:$0xff] %vm1941_vm10, %v1900_v17  ;;  %v2219_v22 = vpop.permute.xlu0 %2218  ;;  %v4307_v35 = vcombine.low %v2710_v23, %v2720_v29  ;;  %v2734_v34 = vsel %vm4832_vm5, %v2729_v24, %v2733_v62  ;;  %v664_v36 = vshll.u32 %v394_v11, 16  ;;  %v3160_v39 = vsel %vm4791_vm2, %v3158_v30, %v3159_v19  ;;  %v943_v60 = vld [vmem:[%s4789_s5 + $0x80] sm:$0x1]  ;;  %v944_v19 = vld [vmem:[%s4789_s5 + $0x84] sm:$0xe] }
  0xd2   : > { %2265 = vst.msk [vmem:[#allocation2 + $0x10] sm:$0xff] %vm2262_vm11, %v2219_v22  ;;  %2410 = vrot.lane.b32.xlu1 %v4576_v12, %s4703_s11  ;;  %v660_v40 = vrot.slane %v658_v32, 5  ;;  %v668_v42 = vshrl.u32 %v394_v11, 16  ;;  %v674_v43 = vshll.u32 %v395_v16, 16  ;;  %v2744_v46 = vsel %vm4832_vm5, %v2739_v41, %v2743_v14  ;;  %v945_v20 = vld [vmem:[%s4789_s5 + $0x88] sm:$0xf] }
  0xd3   : > { %2953 = vrot.lane.b32.xlu0 %v4307_v35, %s4704_s12  ;;  %v4387_v47 = vcombine.low %v3157_v26, %v3160_v39  ;;  %v666_v48 = vrot.slane %v664_v36, 5  ;;  %v4372_v49 = vrot.slane %v4342_v21, 9  ;;  %v4308_v51 = vcombine.low %v2734_v34, %v2744_v46  ;;  %v946_v26 = vld [vmem:[%s4789_s5 + $0x8c] sm:$0x1]  ;;  %v4089_v27 = vld [vmem:[%s4789_s5 + $0x84] sm:$0xf] }
  0xd4   : > { %v2221_v38 = vpop.permute.xlu1 %2220  ;;  %v661_v52 = vor.u32 %v660_v40, %v657_v31  ;;  %v670_v54 = vrot.slane %v668_v42, 4  ;;  %v676_v55 = vrot.slane %v674_v43, 5  ;;  %v3163_v57 = vrot.slane %v4343_v33, 5  ;;  %v4090_v33 = vld [vmem:[%s4789_s5 + $0x88] sm:$0xf] }
  0xd5   : > { %2266 = vst.msk [vmem:[#allocation2 + $0x18] sm:$0xff] %vm2262_vm11, %v2221_v38  ;;  %v2397_v45 = vpop.permute.xlu0 %2396  ;;  %v3166_v58 = vrot.slane %v4344_v37, 5  ;;  %v679_v61 = vshrl.u32 %v396_v44, 16  ;;  %v682_v63 = vshll.u32 %v396_v44, 16  ;;  %v688_v4 = vshll.u32 %v397_v50, 16 }
  0xd6   : > { %2443 = vst.msk [vmem:[#allocation2 + $0x10] sm:$0xff] %vm2440_vm12, %v2397_v45  ;;  %2955 = vrot.lane.b32.xlu1 %v4308_v51, %s4704_s12  ;;  %v662_v2 = vrot.slane %v661_v52, 4  ;;  %v671_v3 = vor.u32 %v670_v54, %v666_v48  ;;  %v692_v6 = vshrl.u32 %v397_v50, 16  ;;  %v3164_v9 = vsel %vm4791_vm2, %v4372_v49, %v3163_v57  ;;  %v4091_v45 = vld [vmem:[%s4789_s5 + $0x8c] sm:$0x1] }
  0xd7   : > { %3274 = vrot.lane.b32.xlu0 %v4387_v47, %s4705_s20  ;;  %v3165_v56 = vrot.slane %v3163_v57, 4  ;;  %v681_v62 = vrot.slane %v679_v61, 4  ;;  %v684_v5 = vrot.slane %v682_v63, 5  ;;  %v690_v28 = vrot.slane %v688_v4, 5  ;;  %v4093_v54 = vld [vmem:[%s4789_s5 + $0x94] sm:$0xf] }
  0xd8   : > { %v2399_v1 = vpop.permute.xlu1 %2398  ;;  %v667_v12 = vsel %vm4832_vm5, %v662_v2, %v666_v48  ;;  %v672_v13 = vrot.slane %v671_v3, 4  ;;  %v694_v15 = vrot.slane %v692_v6, 4  ;;  %v698_v18 = vshll.u32 %v398_v59, 16  ;;  %v4092_v48 = vld [vmem:[%s4789_s5 + $0x90] sm:$0xf]  ;;  %v4578_v4 = vld [vmem:[%s4789_s5 + $0x84] sm:$0xff]  }
  0xd9   : > { %2444 = vst.msk [vmem:[#allocation2 + $0x18] sm:$0xff] %vm2440_vm12, %v2399_v1  ;;  %v2942_v11 = vpop.permute.xlu0 %2941  ;;  %v3167_v16 = vsel %vm4791_vm2, %v3165_v56, %v3166_v58  ;;  %v685_v17 = vor.u32 %v684_v5, %v681_v62  ;;  %v3989_v14 = vrot.slane %v941_v7, 9  ;;  %v1082_v25 = vrot.slane %v942_v10, 5  ;;  %v4153_v2 = vld [vmem:[%s4789_s5 + $0x84] sm:$0xe] }
  0xda   : > { %2988 = vst.msk [vmem:[#allocation2 + $0x10] sm:$0xff] %vm2985_vm13, %v2942_v11  ;;  %v677_v22 = vsel %vm4832_vm5, %v672_v13, %v676_v55  ;;  %v4388_v23 = vcombine.low %v3164_v9, %v3167_v16  ;;  %v695_v24 = vor.u32 %v694_v15, %v690_v28  ;;  %v700_v31 = vrot.slane %v698_v18, 5  ;;  %v4094_v55 = vld [vmem:[%s4789_s5 + $0x98] sm:$0x1]  ;;  %v4154_v9 = vld [vmem:[%s4789_s5 + $0x88] sm:$0xf] }
  0xdb   : > { %v3973_v29 = vcombine.low %v667_v12, %v677_v22  ;;  %v686_v30 = vrot.slane %v685_v17, 4  ;;  %v1085_v32 = vrot.slane %v943_v60, 5  ;;  %v1083_v41 = vsel %vm4791_vm2, %v3989_v14, %v1082_v25  ;;  %v4155_v11 = vld [vmem:[%s4789_s5 + $0x8c] sm:$0x1]  ;;  %v4156_v60 = vld [vmem:[%s4789_s5 + $0x90] sm:$0xe] }
  0xdc   : > { %v2944_v21 = vpop.permute.xlu1 %2943  ;;  %3276 = vrot.lane.b32.xlu0 %v4388_v23, %s4705_s20  ;;  %v696_v34 = vrot.slane %v695_v24, 4  ;;  %v1084_v36 = vrot.slane %v1082_v25, 4  ;;  %v3990_v37 = vrot.slane %v944_v19, 9  ;;  %v1089_v39 = vrot.slane %v945_v20, 5  ;;  %v4157_v16 = vld [vmem:[%s4789_s5 + $0x94] sm:$0xf] }
  0xdd   : > { %2989 = vst.msk [vmem:[#allocation2 + $0x18] sm:$0xff] %vm2985_vm13, %v2944_v21  ;;  %v3263_v35 = vpop.permute.xlu0 %3262  ;;  %866 = vrot.lane.b32.xlu1 %v3973_v29, %s4701_s9  ;;  %v691_v38 = vsel %vm4832_vm5, %v686_v30, %v690_v28  ;;  %v1092_v40 = vrot.slane %v946_v26, 5  ;;  %v1702_v42 = vshrl.u32 %v4089_v27, 16  ;;  %v1705_v46 = vshll.u32 %v4089_v27, 16  ;;  %v4158_v17 = vld [vmem:[%s4789_s5 + $0x98] sm:$0x1] }
  0xde   : > { %3309 = vst.msk [vmem:[#allocation2 + $0x10] sm:$0xff] %vm3306_vm14, %v3263_v35  ;;  %v701_v43 = vsel %vm4832_vm5, %v696_v34, %v700_v31  ;;  %v1086_v44 = vsel %vm4791_vm2, %v1084_v36, %v1085_v32  ;;  %v1711_v47 = vshll.u32 %v4090_v33, 16  ;;  %v1090_v51 = vsel %vm4791_vm2, %v3990_v37, %v1089_v39  ;;  %v4579_v22 = vld [vmem:[%s4789_s5 + $0x90] sm:$0xff]  }
  0xdf   : > { %v3974_v49 = vcombine.low %v691_v38, %v701_v43  ;;  %v4005_v50 = vcombine.low %v1083_v41, %v1086_v44  ;;  %v1091_v52 = vrot.slane %v1089_v39, 4  ;;  %v1704_v59 = vrot.slane %v1702_v42, 4  ;;  %v4281_v37 = vld [vmem:[%s4789_s5 + $0x90] sm:$0xf]  ;;  %v4282_v44 = vld [vmem:[%s4789_s5 + $0x94] sm:$0xf] }
  0xe0   : > { %v1707_v61 = vrot.slane %v1705_v46, 5  ;;  %v1713_v63 = vrot.slane %v1711_v47, 5  ;;  %v1715_v1 = vshrl.u32 %v4090_v33, 16  ;;  %v1721_v6 = vshll.u32 %v4091_v45, 16 }
  0xe1   : > { %v3265_v58 = vpop.permute.xlu0 %3264  ;;  %868 = vrot.lane.b32.xlu1 %v3974_v49, %s4701_s9  ;;  %1190 = vrot.lane.b32.xlu0 %v4005_v50, %s4700_s8  ;;  %v1093_v3 = vsel %vm4791_vm2, %v1091_v52, %v1092_v40  ;;  %v1726_v7 = vshrl.u32 %v4092_v48, 16  ;;  %v1729_v8 = vshll.u32 %v4092_v48, 16  ;;  %v1735_v10 = vshll.u32 %v4093_v54, 16  ;;  %v4283_v49 = vld [vmem:[%s4789_s5 + $0x98] sm:$0x1] }
  0xe2   : > { %v855_v57 = vpop.permute.xlu1 %854  ;;  %3310 = vst.msk [vmem:[#allocation2 + $0x18] sm:$0xff] %vm3306_vm14, %v3265_v58  ;;  %v4006_v56 = vcombine.low %v1090_v51, %v1093_v3  ;;  %v1708_v62 = vor.u32 %v1707_v61, %v1704_v59  ;;  %v1717_v5 = vrot.slane %v1715_v1, 4  ;;  %v1723_v12 = vrot.slane %v1721_v6, 5  ;;  %v4284_v58 = vld [vmem:[%s4789_s5 + $0x9c] sm:$0xf] }
  0xe3   : > { %899 = vst.msk [vmem:[#allocation2 + $0x20] sm:$0xff] %vm894_vm7, %v855_v57  ;;  %v1728_v13 = vrot.slane %v1726_v7, 4  ;;  %v1731_v28 = vrot.slane %v1729_v8, 5  ;;  %v1739_v15 = vshrl.u32 %v4093_v54, 16  ;;  %v1737_v20 = vrot.slane %v1735_v10, 5 }
  0xe4   : > { %v1709_v14 = vrot.slane %v1708_v62, 4  ;;  %v1718_v19 = vor.u32 %v1717_v5, %v1713_v63  ;;  %v1745_v21 = vshll.u32 %v4094_v55, 16  ;;  %v4181_v25 = vrot.slane %v4153_v2, 9  ;;  %v4285_v59 = vld [vmem:[%s4789_s5 + $0xa0] sm:$0xf] }
  0xe5   : > { %v3325_v18 = vld [vmem:[#allocation2 + $0x10] sm:$0xff]  ;;  %1192 = vrot.lane.b32.xlu1 %v4006_v56, %s4700_s8  ;;  %1368 = vrot.lane.b32.xlu0 %v4578_v4, %s4698_s6  ;;  %v1732_v23 = vor.u32 %v1731_v28, %v1728_v13  ;;  %v1741_v24 = vrot.slane %v1739_v15, 4  ;;  %v2126_v26 = vrot.slane %v4154_v9, 5  ;;  %v2129_v32 = vrot.slane %v4155_v11, 5  ;;  %v4286_v8 = vld [vmem:[%s4789_s5 + $0xa4] sm:$0x1] }
  0xe6   : > { %4456 = vmatprep.mubr.msk.bf16.mxu0 %vm3375_vm0, %v3325_v18  ;;  %v1714_v29 = vsel %vm4832_vm5, %v1709_v14, %v1713_v63  ;;  %v1719_v30 = vrot.slane %v1718_v19, 4  ;;  %v1747_v31 = vrot.slane %v1745_v21, 5  ;;  %v4182_v40 = vrot.slane %v4156_v60, 9  ;;  %v4582_v56 = vld [vmem:[%s4789_s5 + $0x90] sm:$0xff]   ;;  %v4347_v21 = vld [vmem:[%s4789_s5 + $0x98] sm:$0x1] }
  0xe7   : > { %v1179_v27 = vpop.permute.xlu0 %1178  ;;  %v1733_v35 = vrot.slane %v1732_v23, 4  ;;  %v1742_v34 = vor.u32 %v1741_v24, %v1737_v20  ;;  %v2127_v41 = vsel %vm4791_vm2, %v4181_v25, %v2126_v26  ;;  %v2128_v36 = vrot.slane %v2126_v26, 4  ;;  %v4345_v11 = vld [vmem:[%s4789_s5 + $0x90] sm:$0xe] }
  0xe8   : > { %v857_v33 = vpop.permute.xlu1 %856  ;;  %1223 = vst.msk [vmem:[#allocation2 + $0x20] sm:$0xff] %vm1218_vm8, %v1179_v27  ;;  %v1724_v39 = vsel %vm4832_vm5, %v1719_v30, %v1723_v12  ;;  %v2133_v42 = vrot.slane %v4157_v16, 5  ;;  %v2136_v43 = vrot.slane %v4158_v17, 5  ;;  %v2746_v57 = vshrl.u32 %v4281_v37, 16  ;;  %v4346_v16 = vld [vmem:[%s4789_s5 + $0x94] sm:$0xf] }
  0xe9   : > { %900 = vst.msk [vmem:[#allocation2 + $0x28] sm:$0xff] %vm894_vm7, %v857_v33  ;;  %v3326_v38 = vld [vmem:[#allocation2 + $0x18] sm:$0xff]  ;;  %1370 = vrot.lane.b32.xlu1 %v4579_v22, %s4698_s6  ;;  %v4117_v45 = vcombine.low %v1714_v29, %v1724_v39  ;;  %v1738_v46 = vsel %vm4832_vm5, %v1733_v35, %v1737_v20  ;;  %v1743_v47 = vrot.slane %v1742_v34, 4  ;;  %v2130_v48 = vsel %vm4791_vm2, %v2128_v36, %v2129_v32  ;;  %v399_v22 = vld [vmem:[%s4789_s5 + $0x90] sm:$0xf] }
  0xea   : > { %4457 = vmatmul.mubr.msk.bf16.gmra.mrb[4].mxu0 %vm3375_vm0, %v3326_v38  ;;  %v4197_v51 = vcombine.low %v2127_v41, %v2130_v48  ;;  %v2134_v52 = vsel %vm4791_vm2, %v4182_v40, %v2133_v42  ;;  %v2135_v54 = vrot.slane %v2133_v42, 4  ;;  %v2749_v63 = vshll.u32 %v4281_v37, 16  ;;  %v400_v27 = vld [vmem:[%s4789_s5 + $0x94] sm:$0xf]  ;;  %v401_v33 = vld [vmem:[%s4789_s5 + $0x98] sm:$0x1] }
  0xeb   : > { %v1357_v50 = vpop.permute.xlu0 %1356  ;;  %1913 = vrot.lane.b32.xlu0 %v4117_v45, %s4702_s10  ;;  %v1748_v61 = vsel %vm4832_vm5, %v1743_v47, %v1747_v31  ;;  %v2755_v1 = vshll.u32 %v4282_v44, 16  ;;  %v2759_v2 = vshrl.u32 %v4282_v44, 16  ;;  %v2748_v6 = vrot.slane %v2746_v57, 4  ;;  %v4583_v35 = vld [vmem:[%s4789_s5 + $0x9c] sm:$0xff]  }
  0xec   : > { %v1181_v55 = vpop.permute.xlu1 %1180  ;;  %1401 = vst.msk [vmem:[#allocation2 + $0x20] sm:$0xff] %vm1396_vm9, %v1357_v50  ;;  %v4118_v3 = vcombine.low %v1738_v46, %v1748_v61  ;;  %v2137_v4 = vsel %vm4791_vm2, %v2135_v54, %v2136_v43  ;;  %v2765_v7 = vshll.u32 %v4283_v49, 16  ;;  %v2751_v62 = vrot.slane %v2749_v63, 5  ;;  %v4348_v45 = vld [vmem:[%s4789_s5 + $0x9c] sm:$0xe]  ;;  %v4598_v46 = vld [vmem:[%s4789_s5 + $0x90] sm:$0xff]  }
  0xed   : > { %1224 = vst.msk [vmem:[#allocation2 + $0x28] sm:$0xff] %vm1218_vm8, %v1181_v55  ;;  %v4198_v9 = vcombine.low %v2134_v52, %v2137_v4  ;;  %v2757_v5 = vrot.slane %v2755_v1, 5  ;;  %v2761_v10 = vrot.slane %v2759_v2, 4  ;;  %v2770_v13 = vshrl.u32 %v4284_v58, 16  ;;  %v4349_v57 = vld [vmem:[%s4789_s5 + $0xa0] sm:$0xf] }
  0xee   : > { %1915 = vrot.lane.b32.xlu1 %v4118_v3, %s4702_s10  ;;  %v2767_v12 = vrot.slane %v2765_v7, 5  ;;  %v2773_v28 = vshll.u32 %v4284_v58, 16  ;;  %v2779_v15 = vshll.u32 %v4285_v59, 16  ;;  %v2752_v18 = vor.u32 %v2751_v62, %v2748_v6  ;;  %359 = vst.msk [vmem:[#allocation2 + $0x60] sm:$0xff] %vm346_vm6, %v4598_v46  ;;  %v4350_v1 = vld [vmem:[%s4789_s5 + $0xa4] sm:$0x1] }
  0xef   : > { %2234 = vrot.lane.b32.xlu0 %v4197_v51, %s4699_s7  ;;  %v2762_v14 = vor.u32 %v2761_v10, %v2757_v5  ;;  %v2783_v19 = vshrl.u32 %v4285_v59, 16  ;;  %v2789_v20 = vshll.u32 %v4286_v8, 16  ;;  %v2772_v23 = vrot.slane %v2770_v13, 4  ;;  %v402_v2 = vld [vmem:[%s4789_s5 + $0x9c] sm:$0xf] }
  0xf0   : > { %v1359_v60 = vpop.permute.xlu1 %1358  ;;  %v1902_v17 = vpop.permute.xlu0 %1901  ;;  %v2775_v24 = vrot.slane %v2773_v28, 5  ;;  %v2781_v25 = vrot.slane %v2779_v15, 5  ;;  %v4373_v26 = vrot.slane %v4345_v11, 9  ;;  %v2753_v29 = vrot.slane %v2752_v18, 4  ;;  %v4599_v62 = vld [vmem:[%s4789_s5 + $0x9c] sm:$0xff]  }
  0xf1   : > { %1402 = vst.msk [vmem:[#allocation2 + $0x28] sm:$0xff] %vm1396_vm9, %v1359_v60  ;;  %v2763_v30 = vrot.slane %v2762_v14, 4  ;;  %v2785_v31 = vrot.slane %v2783_v19, 4  ;;  %v2791_v32 = vrot.slane %v2789_v20, 5  ;;  %v3170_v41 = vrot.slane %v4346_v16, 5 }
  0xf2   : > { %1946 = vst.msk [vmem:[#allocation2 + $0x20] sm:$0xff] %vm1941_vm10, %v1902_v17  ;;  %2236 = vrot.lane.b32.xlu1 %v4198_v9, %s4699_s7  ;;  %v2776_v34 = vor.u32 %v2775_v24, %v2772_v23  ;;  %v3173_v36 = vrot.slane %v4347_v21, 5  ;;  %v703_v37 = vshrl.u32 %v399_v22, 16  ;;  %v2758_v40 = vsel %vm4832_vm5, %v2753_v29, %v2757_v5  ;;  %v404_v13 = vld [vmem:[%s4789_s5 + $0xa4] sm:$0x1] }
  0xf3   : > { %2412 = vrot.lane.b32.xlu0 %v4582_v56, %s4703_s11  ;;  %v2768_v42 = vsel %vm4832_vm5, %v2763_v30, %v2767_v12  ;;  %v2786_v43 = vor.u32 %v2785_v31, %v2781_v25  ;;  %v706_v44 = vshll.u32 %v399_v22, 16  ;;  %v3171_v49 = vsel %vm4791_vm2, %v4373_v26, %v3170_v41  ;;  %v403_v56 = vld [vmem:[%s4789_s5 + $0xa0] sm:$0xf]  ;;  %v947_v17 = vld [vmem:[%s4789_s5 + $0x90] sm:$0xe]  ;;  %360 = vst.msk [vmem:[#allocation2 + $0x68] sm:$0xff] %vm346_vm6, %v4599_v62 }
  0xf4   : > { %v1904_v38 = vpop.permute.xlu1 %1903  ;;  %v2223_v39 = vpop.permute.xlu0 %2222  ;;  %v4309_v47 = vcombine.low %v2758_v40, %v2768_v42  ;;  %v2777_v48 = vrot.slane %v2776_v34, 4  ;;  %v3172_v50 = vrot.slane %v3170_v41, 4  ;;  %v705_v52 = vrot.slane %v703_v37, 4  ;;  %v948_v21 = vld [vmem:[%s4789_s5 + $0x94] sm:$0xf] }
  0xf5   : > { %1947 = vst.msk [vmem:[#allocation2 + $0x28] sm:$0xff] %vm1941_vm10, %v1904_v38  ;;  %v2787_v51 = vrot.slane %v2786_v43, 4  ;;  %v708_v54 = vrot.slane %v706_v44, 5  ;;  %v712_v55 = vshll.u32 %v400_v27, 16  ;;  %v716_v61 = vshrl.u32 %v400_v27, 16 }
  0xf6   : > { %2267 = vst.msk [vmem:[#allocation2 + $0x20] sm:$0xff] %vm2262_vm11, %v2223_v39  ;;  %2414 = vrot.lane.b32.xlu1 %v4583_v35, %s4703_s11  ;;  %v2782_v58 = vsel %vm4832_vm5, %v2777_v48, %v2781_v25  ;;  %v3174_v59 = vsel %vm4791_vm2, %v3172_v50, %v3173_v36  ;;  %v722_v63 = vshll.u32 %v401_v33, 16  ;;  %v4374_v12 = vrot.slane %v4348_v45, 9  ;;  %v949_v33 = vld [vmem:[%s4789_s5 + $0x98] sm:$0x1] }
  0xf7   : > { %2957 = vrot.lane.b32.xlu0 %v4309_v47, %s4704_s12  ;;  %v2792_v6 = vsel %vm4832_vm5, %v2787_v51, %v2791_v32  ;;  %v4389_v7 = vcombine.low %v3171_v49, %v3174_v59  ;;  %v709_v8 = vor.u32 %v708_v54, %v705_v52  ;;  %v714_v9 = vrot.slane %v712_v55, 5  ;;  %v950_v37 = vld [vmem:[%s4789_s5 + $0x9c] sm:$0xe]  ;;  %v951_v43 = vld [vmem:[%s4789_s5 + $0xa0] sm:$0xf] }
  0xf8   : > { %v2225_v3 = vpop.permute.xlu1 %2224  ;;  %v2401_v4 = vpop.permute.xlu0 %2400  ;;  %v4310_v5 = vcombine.low %v2782_v58, %v2792_v6  ;;  %v718_v10 = vrot.slane %v716_v61, 4  ;;  %v724_v11 = vrot.slane %v722_v63, 5  ;;  %v3177_v15 = vrot.slane %v4349_v57, 5  ;;  %v952_v44 = vld [vmem:[%s4789_s5 + $0xa4] sm:$0x1] }
  0xf9   : > { %2268 = vst.msk [vmem:[#allocation2 + $0x28] sm:$0xff] %vm2262_vm11, %v2225_v3  ;;  %v710_v28 = vrot.slane %v709_v8, 4  ;;  %v3180_v60 = vrot.slane %v4350_v1, 5  ;;  %v727_v16 = vshrl.u32 %v402_v2, 16  ;;  %v730_v14 = vshll.u32 %v402_v2, 16 }
  0xfa   : > { %2445 = vst.msk [vmem:[#allocation2 + $0x20] sm:$0xff] %vm2440_vm12, %v2401_v4  ;;  %2959 = vrot.lane.b32.xlu1 %v4310_v5, %s4704_s12  ;;  %v719_v18 = vor.u32 %v718_v10, %v714_v9  ;;  %v736_v19 = vshll.u32 %v403_v56, 16  ;;  %v740_v20 = vshrl.u32 %v403_v56, 16  ;;  %v3178_v24 = vsel %vm4791_vm2, %v4374_v12, %v3177_v15  ;;  %v4095_v46 = vld [vmem:[%s4789_s5 + $0x9c] sm:$0xf] }
  0xfb   : > { %3278 = vrot.lane.b32.xlu0 %v4389_v7, %s4705_s20  ;;  %v715_v23 = vsel %vm4832_vm5, %v710_v28, %v714_v9  ;;  %v3179_v25 = vrot.slane %v3177_v15, 4  ;;  %v729_v26 = vrot.slane %v727_v16, 4  ;;  %v732_v30 = vrot.slane %v730_v14, 5  ;;  %v4096_v51 = vld [vmem:[%s4789_s5 + $0xa0] sm:$0xf] }
  0xfc   : > { %v2403_v22 = vpop.permute.xlu1 %2402  ;;  %v720_v29 = vrot.slane %v719_v18, 4  ;;  %v738_v31 = vrot.slane %v736_v19, 5  ;;  %v742_v32 = vrot.slane %v740_v20, 4  ;;  %v746_v34 = vshll.u32 %v404_v13, 16  ;;  %v4097_v6 = vld [vmem:[%s4789_s5 + $0xa4] sm:$0x1] }
  0xfd   : > { %2446 = vst.msk [vmem:[#allocation2 + $0x28] sm:$0xff] %vm2440_vm12, %v2403_v22  ;;  %v2946_v27 = vpop.permute.xlu0 %2945  ;;  %v3181_v35 = vsel %vm4791_vm2, %v3179_v25, %v3180_v60  ;;  %v3991_v41 = vrot.slane %v947_v17, 9  ;;  %v1096_v36 = vrot.slane %v948_v21, 5  ;;  %v733_v40 = vor.u32 %v732_v30, %v729_v26  ;;  %v4098_v8 = vld [vmem:[%s4789_s5 + $0xa8] sm:$0xf]  ;;  %v4584_v19 = vld [vmem:[%s4789_s5 + $0x9c] sm:$0xff]  }
  0xfe   : > { %2990 = vst.msk [vmem:[#allocation2 + $0x20] sm:$0xff] %vm2985_vm13, %v2946_v27  ;;  %v725_v38 = vsel %vm4832_vm5, %v720_v29, %v724_v11  ;;  %v4390_v39 = vcombine.low %v3178_v24, %v3181_v35  ;;  %v743_v42 = vor.u32 %v742_v32, %v738_v31  ;;  %v748_v48 = vrot.slane %v746_v34, 5  ;;  %v4099_v10 = vld [vmem:[%s4789_s5 + $0xac] sm:$0xf]  ;;  %v4100_v11 = vld [vmem:[%s4789_s5 + $0xb0] sm:$0x1] }
  0xff   : > { %v3975_v47 = vcombine.low %v715_v23, %v725_v38  ;;  %v1097_v49 = vsel %vm4791_vm2, %v3991_v41, %v1096_v36  ;;  %v1098_v50 = vrot.slane %v1096_v36, 4  ;;  %v734_v54 = vrot.slane %v733_v40, 4  ;;  %v4159_v17 = vld [vmem:[%s4789_s5 + $0x9c] sm:$0xe]  ;;  %v4160_v18 = vld [vmem:[%s4789_s5 + $0xa0] sm:$0xf] }
 0x100   : > { %v2948_v45 = vpop.permute.xlu1 %2947  ;;  %3280 = vrot.lane.b32.xlu0 %v4390_v39, %s4705_s20  ;;  %v744_v55 = vrot.slane %v743_v42, 4  ;;  %v1099_v57 = vrot.slane %v949_v33, 5  ;;  %v3992_v58 = vrot.slane %v950_v37, 9  ;;  %v1103_v59 = vrot.slane %v951_v43, 5  ;;  %v4161_v23 = vld [vmem:[%s4789_s5 + $0xa4] sm:$0x1] }
 0x101   : > { %2991 = vst.msk [vmem:[#allocation2 + $0x28] sm:$0xff] %vm2985_vm13, %v2948_v45  ;;  %v3267_v52 = vpop.permute.xlu0 %3266  ;;  %870 = vrot.lane.b32.xlu1 %v3975_v47, %s4701_s9  ;;  %v1106_v61 = vrot.slane %v952_v44, 5  ;;  %v1750_v63 = vshrl.u32 %v4095_v46, 16  ;;  %v1753_v1 = vshll.u32 %v4095_v46, 16  ;;  %v739_v2 = vsel %vm4832_vm5, %v734_v54, %v738_v31  ;;  %v4162_v33 = vld [vmem:[%s4789_s5 + $0xa8] sm:$0xe] }
 0x102   : > { %3311 = vst.msk [vmem:[#allocation2 + $0x20] sm:$0xff] %vm3306_vm14, %v3267_v52  ;;  %v749_v3 = vsel %vm4832_vm5, %v744_v55, %v748_v48  ;;  %v1100_v4 = vsel %vm4791_vm2, %v1098_v50, %v1099_v57  ;;  %v1759_v7 = vshll.u32 %v4096_v51, 16  ;;  %v1104_v62 = vsel %vm4791_vm2, %v3992_v58, %v1103_v59  ;;  %v4163_v35 = vld [vmem:[%s4789_s5 + $0xac] sm:$0xf]  ;;  %v4164_v45 = vld [vmem:[%s4789_s5 + $0xb0] sm:$0x1] }
 0x103   : > { %v3976_v9 = vcombine.low %v739_v2, %v749_v3  ;;  %v4007_v56 = vcombine.low %v1097_v49, %v1100_v4  ;;  %v1105_v5 = vrot.slane %v1103_v59, 4  ;;  %v1752_v28 = vrot.slane %v1750_v63, 4  ;;  %v4585_v39 = vld [vmem:[%s4789_s5 + $0xa8] sm:$0xff]  }
 0x104   : > { %v1755_v15 = vrot.slane %v1753_v1, 5  ;;  %v1761_v60 = vrot.slane %v1759_v7, 5  ;;  %v1763_v16 = vshrl.u32 %v4096_v51, 16  ;;  %v1769_v20 = vshll.u32 %v4097_v6, 16  ;;  %v4287_v58 = vld [vmem:[%s4789_s5 + $0xa8] sm:$0xf] }
 0x105   : > { %v3269_v13 = vpop.permute.xlu0 %3268  ;;  %872 = vrot.lane.b32.xlu1 %v3976_v9, %s4701_s9  ;;  %1194 = vrot.lane.b32.xlu0 %v4007_v56, %s4700_s8  ;;  %v1107_v14 = vsel %vm4791_vm2, %v1105_v5, %v1106_v61  ;;  %v1774_v21 = vshrl.u32 %v4098_v8, 16  ;;  %v1777_v22 = vshll.u32 %v4098_v8, 16  ;;  %v1783_v27 = vshll.u32 %v4099_v10, 16  ;;  %v4288_v3 = vld [vmem:[%s4789_s5 + $0xac] sm:$0xf] }
 0x106   : > { %v859_v12 = vpop.permute.xlu1 %858  ;;  %3312 = vst.msk [vmem:[#allocation2 + $0x28] sm:$0xff] %vm3306_vm14, %v3269_v13  ;;  %v4008_v24 = vcombine.low %v1104_v62, %v1107_v14  ;;  %v1756_v25 = vor.u32 %v1755_v15, %v1752_v28  ;;  %v1765_v26 = vrot.slane %v1763_v16, 4  ;;  %v1771_v29 = vrot.slane %v1769_v20, 5  ;;  %v4289_v9 = vld [vmem:[%s4789_s5 + $0xb0] sm:$0x1] }
 0x107   : > { %901 = vst.msk [vmem:[#allocation2 + $0x30] sm:$0xff] %vm894_vm7, %v859_v12  ;;  %v1776_v30 = vrot.slane %v1774_v21, 4  ;;  %v1779_v31 = vrot.slane %v1777_v22, 5  ;;  %v1787_v32 = vshrl.u32 %v4099_v10, 16  ;;  %v1785_v37 = vrot.slane %v1783_v27, 5 }
 0x108   : > { %v1757_v41 = vrot.slane %v1756_v25, 4  ;;  %v1766_v36 = vor.u32 %v1765_v26, %v1761_v60  ;;  %v1793_v38 = vshll.u32 %v4100_v11, 16  ;;  %v4183_v43 = vrot.slane %v4159_v17, 9  ;;  %v4290_v56 = vld [vmem:[%s4789_s5 + $0xb4] sm:$0xf] }
 0x109   : > { %v3327_v34 = vld [vmem:[#allocation2 + $0x20] sm:$0xff]  ;;  %1196 = vrot.lane.b32.xlu1 %v4008_v24, %s4700_s8  ;;  %1372 = vrot.lane.b32.xlu0 %v4584_v19, %s4698_s6  ;;  %v1780_v40 = vor.u32 %v1779_v31, %v1776_v30  ;;  %v1789_v42 = vrot.slane %v1787_v32, 4  ;;  %v2140_v44 = vrot.slane %v4160_v18, 5  ;;  %v2143_v50 = vrot.slane %v4161_v23, 5  ;;  %v4291_v17 = vld [vmem:[%s4789_s5 + $0xb8] sm:$0xf] }
 0x10a   : > { %4460 = vmatprep.mubr.msk.bf16.mxu0 %vm3375_vm0, %v3327_v34  ;;  %v1762_v47 = vsel %vm4832_vm5, %v1757_v41, %v1761_v60  ;;  %v1767_v48 = vrot.slane %v1766_v36, 4  ;;  %v1795_v49 = vrot.slane %v1793_v38, 5  ;;  %v4184_v63 = vrot.slane %v4162_v33, 9  ;;  %v4292_v21 = vld [vmem:[%s4789_s5 + $0xbc] sm:$0x1]  ;;  %v4588_v24 = vld [vmem:[%s4789_s5 + $0xa8] sm:$0xff]  }
 0x10b   : > { %v1183_v46 = vpop.permute.xlu0 %1182  ;;  %v1781_v52 = vrot.slane %v1780_v40, 4  ;;  %v1790_v54 = vor.u32 %v1789_v42, %v1785_v37  ;;  %v2141_v55 = vsel %vm4791_vm2, %v4183_v43, %v2140_v44  ;;  %v2142_v57 = vrot.slane %v2140_v44, 4  ;;  %v4351_v22 = vld [vmem:[%s4789_s5 + $0xa8] sm:$0xe]  ;;  %v4353_v34 = vld [vmem:[%s4789_s5 + $0xb0] sm:$0x1] }
 0x10c   : > { %v861_v51 = vpop.permute.xlu1 %860  ;;  %1225 = vst.msk [vmem:[#allocation2 + $0x30] sm:$0xff] %vm1218_vm8, %v1183_v46  ;;  %v1772_v61 = vsel %vm4832_vm5, %v1767_v48, %v1771_v29  ;;  %v2147_v1 = vrot.slane %v4163_v35, 5  ;;  %v2150_v2 = vrot.slane %v4164_v45, 5  ;;  %v2794_v13 = vshrl.u32 %v4287_v58, 16  ;;  %v4352_v29 = vld [vmem:[%s4789_s5 + $0xac] sm:$0xf] }
 0x10d   : > { %902 = vst.msk [vmem:[#allocation2 + $0x38] sm:$0xff] %vm894_vm7, %v861_v51  ;;  %v3328_v59 = vld [vmem:[#allocation2 + $0x28] sm:$0xff]  ;;  %1374 = vrot.lane.b32.xlu1 %v4585_v39, %s4698_s6  ;;  %v4119_v4 = vcombine.low %v1762_v47, %v1772_v61  ;;  %v1786_v6 = vsel %vm4832_vm5, %v1781_v52, %v1785_v37  ;;  %v1791_v7 = vrot.slane %v1790_v54, 4  ;;  %v2144_v8 = vsel %vm4791_vm2, %v2142_v57, %v2143_v50  ;;  %v4589_v42 = vld [vmem:[%s4789_s5 + $0xb4] sm:$0xff]   ;;  %v407_v52 = vld [vmem:[%s4789_s5 + $0xb0] sm:$0x1] }
 0x10e   : > { %4461 = vmatmul.mubr.msk.bf16.gmra.mrb[8].mxu0 %vm3375_vm0, %v3328_v59  ;;  %v4199_v5 = vcombine.low %v2141_v55, %v2144_v8  ;;  %v2148_v10 = vsel %vm4791_vm2, %v4184_v63, %v2147_v1  ;;  %v2149_v11 = vrot.slane %v2147_v1, 4  ;;  %v2797_v15 = vshll.u32 %v4287_v58, 16  ;;  %v405_v40 = vld [vmem:[%s4789_s5 + $0xa8] sm:$0xf]  ;;  %v406_v47 = vld [vmem:[%s4789_s5 + $0xac] sm:$0xf] }
 0x10f   : > { %v1361_v62 = vpop.permute.xlu0 %1360  ;;  %1917 = vrot.lane.b32.xlu0 %v4119_v4, %s4702_s10  ;;  %v1796_v28 = vsel %vm4832_vm5, %v1791_v7, %v1795_v49  ;;  %v2803_v60 = vshll.u32 %v4288_v3, 16  ;;  %v2807_v16 = vshrl.u32 %v4288_v3, 16  ;;  %v2796_v19 = vrot.slane %v2794_v13, 4  ;;  %v4600_v63 = vld [vmem:[%s4789_s5 + $0xa8] sm:$0xff]  }
 0x110   : > { %v1185_v12 = vpop.permute.xlu1 %1184  ;;  %1403 = vst.msk [vmem:[#allocation2 + $0x30] sm:$0xff] %vm1396_vm9, %v1361_v62  ;;  %v4120_v18 = vcombine.low %v1786_v6, %v1796_v28  ;;  %v2151_v14 = vsel %vm4791_vm2, %v2149_v11, %v2150_v2  ;;  %v2813_v20 = vshll.u32 %v4289_v9, 16  ;;  %v2799_v25 = vrot.slane %v2797_v15, 5 }
 0x111   : > { %1226 = vst.msk [vmem:[#allocation2 + $0x38] sm:$0xff] %vm1218_vm8, %v1185_v12  ;;  %v4200_v23 = vcombine.low %v2148_v10, %v2151_v14  ;;  %v2805_v26 = vrot.slane %v2803_v60, 5  ;;  %v2809_v27 = vrot.slane %v2807_v16, 4  ;;  %v2818_v31 = vshrl.u32 %v4290_v56, 16  ;;  %v4355_v12 = vld [vmem:[%s4789_s5 + $0xb8] sm:$0xf] }
 0x112   : > { %1919 = vrot.lane.b32.xlu1 %v4120_v18, %s4702_s10  ;;  %v2815_v30 = vrot.slane %v2813_v20, 5  ;;  %v2821_v32 = vshll.u32 %v4290_v56, 16  ;;  %v2827_v33 = vshll.u32 %v4291_v17, 16  ;;  %v2800_v36 = vor.u32 %v2799_v25, %v2796_v19  ;;  %v4354_v56 = vld [vmem:[%s4789_s5 + $0xb4] sm:$0xe]  ;;  %361 = vst.msk [vmem:[#allocation2 + $0x70] sm:$0xff] %vm346_vm6, %v4600_v63 }
 0x113   : > { %2238 = vrot.lane.b32.xlu0 %v4199_v5, %s4699_s7  ;;  %v2810_v37 = vor.u32 %v2809_v27, %v2805_v26  ;;  %v2831_v38 = vshrl.u32 %v4291_v17, 16  ;;  %v2837_v39 = vshll.u32 %v4292_v21, 16  ;;  %v2820_v43 = vrot.slane %v2818_v31, 4  ;;  %v4356_v16 = vld [vmem:[%s4789_s5 + $0xbc] sm:$0x1] }
 0x114   : > { %v1363_v35 = vpop.permute.xlu1 %1362  ;;  %v1906_v41 = vpop.permute.xlu0 %1905  ;;  %v2823_v44 = vrot.slane %v2821_v32, 5  ;;  %v2829_v45 = vrot.slane %v2827_v33, 5  ;;  %v4375_v46 = vrot.slane %v4351_v22, 9  ;;  %v2801_v48 = vrot.slane %v2800_v36, 4  ;;  %v408_v17 = vld [vmem:[%s4789_s5 + $0xb4] sm:$0xf] }
 0x115   : > { %1404 = vst.msk [vmem:[#allocation2 + $0x38] sm:$0xff] %vm1396_vm9, %v1363_v35  ;;  %v2811_v49 = vrot.slane %v2810_v37, 4  ;;  %v2833_v50 = vrot.slane %v2831_v38, 4  ;;  %v2839_v51 = vrot.slane %v2837_v39, 5  ;;  %v3184_v55 = vrot.slane %v4352_v29, 5 }
 0x116   : > { %1948 = vst.msk [vmem:[#allocation2 + $0x30] sm:$0xff] %vm1941_vm10, %v1906_v41  ;;  %2240 = vrot.lane.b32.xlu1 %v4200_v23, %s4699_s7  ;;  %v2824_v54 = vor.u32 %v2823_v44, %v2820_v43  ;;  %v3187_v57 = vrot.slane %v4353_v34, 5  ;;  %v751_v58 = vshrl.u32 %v405_v40, 16  ;;  %v2806_v1 = vsel %vm4832_vm5, %v2801_v48, %v2805_v26  ;;  %v409_v23 = vld [vmem:[%s4789_s5 + $0xb8] sm:$0xf] }
 0x117   : > { %2416 = vrot.lane.b32.xlu0 %v4588_v24, %s4703_s11  ;;  %v2816_v2 = vsel %vm4832_vm5, %v2811_v49, %v2815_v30  ;;  %v2834_v3 = vor.u32 %v2833_v50, %v2829_v45  ;;  %v754_v4 = vshll.u32 %v405_v40, 16  ;;  %v3185_v8 = vsel %vm4791_vm2, %v4375_v46, %v3184_v55  ;;  %v4601_v24 = vld [vmem:[%s4789_s5 + $0xb4] sm:$0xff]   ;;  %v410_v30 = vld [vmem:[%s4789_s5 + $0xbc] sm:$0x1]  ;;  %v953_v34 = vld [vmem:[%s4789_s5 + $0xa8] sm:$0xe] }
 0x118   : > { %v1908_v59 = vpop.permute.xlu1 %1907  ;;  %v2227_v61 = vpop.permute.xlu0 %2226  ;;  %v4311_v6 = vcombine.low %v2806_v1, %v2816_v2  ;;  %v2825_v7 = vrot.slane %v2824_v54, 4  ;;  %v3186_v9 = vrot.slane %v3184_v55, 4  ;;  %v753_v5 = vrot.slane %v751_v58, 4  ;;  %362 = vst.msk [vmem:[#allocation2 + $0x78] sm:$0xff] %vm346_vm6, %v4601_v24  ;;  %v954_v39 = vld [vmem:[%s4789_s5 + $0xac] sm:$0xf] }
 0x119   : > { %1949 = vst.msk [vmem:[#allocation2 + $0x38] sm:$0xff] %vm1941_vm10, %v1908_v59  ;;  %v2835_v62 = vrot.slane %v2834_v3, 4  ;;  %v756_v10 = vrot.slane %v754_v4, 5  ;;  %v760_v11 = vshll.u32 %v406_v47, 16  ;;  %v764_v15 = vshrl.u32 %v406_v47, 16 }
 0x11a   : > { %2269 = vst.msk [vmem:[#allocation2 + $0x30] sm:$0xff] %vm2262_vm11, %v2227_v61  ;;  %2418 = vrot.lane.b32.xlu1 %v4589_v42, %s4703_s11  ;;  %v2830_v13 = vsel %vm4832_vm5, %v2825_v7, %v2829_v45  ;;  %v3188_v28 = vsel %vm4791_vm2, %v3186_v9, %v3187_v57  ;;  %v770_v60 = vshll.u32 %v407_v52, 16  ;;  %v4376_v29 = vrot.slane %v4354_v56, 9  ;;  %v955_v46 = vld [vmem:[%s4789_s5 + $0xb0] sm:$0x1] }
 0x11b   : > { %2961 = vrot.lane.b32.xlu0 %v4311_v6, %s4704_s12  ;;  %v2840_v19 = vsel %vm4832_vm5, %v2835_v62, %v2839_v51  ;;  %v4391_v20 = vcombine.low %v3185_v8, %v3188_v28  ;;  %v757_v21 = vor.u32 %v756_v10, %v753_v5  ;;  %v762_v22 = vrot.slane %v760_v11, 5  ;;  %v956_v47 = vld [vmem:[%s4789_s5 + $0xb4] sm:$0xe]  ;;  %v957_v54 = vld [vmem:[%s4789_s5 + $0xb8] sm:$0xf] }
 0x11c   : > { %v2229_v18 = vpop.permute.xlu1 %2228  ;;  %v2405_v14 = vpop.permute.xlu0 %2404  ;;  %v4312_v25 = vcombine.low %v2830_v13, %v2840_v19  ;;  %v766_v26 = vrot.slane %v764_v15, 4  ;;  %v772_v27 = vrot.slane %v770_v60, 5  ;;  %v3191_v32 = vrot.slane %v4355_v12, 5  ;;  %v958_v55 = vld [vmem:[%s4789_s5 + $0xbc] sm:$0x1] }
 0x11d   : > { %2270 = vst.msk [vmem:[#allocation2 + $0x38] sm:$0xff] %vm2262_vm11, %v2229_v18  ;;  %v758_v31 = vrot.slane %v757_v21, 4  ;;  %v3194_v33 = vrot.slane %v4356_v16, 5  ;;  %v775_v35 = vshrl.u32 %v408_v17, 16  ;;  %v778_v36 = vshll.u32 %v408_v17, 16 }
 0x11e   : > { %2447 = vst.msk [vmem:[#allocation2 + $0x30] sm:$0xff] %vm2440_vm12, %v2405_v14  ;;  %2963 = vrot.lane.b32.xlu1 %v4312_v25, %s4704_s12  ;;  %v767_v41 = vor.u32 %v766_v26, %v762_v22  ;;  %v784_v37 = vshll.u32 %v409_v23, 16  ;;  %v788_v38 = vshrl.u32 %v409_v23, 16  ;;  %v3192_v43 = vsel %vm4791_vm2, %v4376_v29, %v3191_v32  ;;  %v4101_v57 = vld [vmem:[%s4789_s5 + $0xb4] sm:$0xf] }
 0x11f   : > { %3282 = vrot.lane.b32.xlu0 %v4391_v20, %s4705_s20  ;;  %v763_v42 = vsel %vm4832_vm5, %v758_v31, %v762_v22  ;;  %v3193_v44 = vrot.slane %v3191_v32, 4  ;;  %v777_v45 = vrot.slane %v775_v35, 4  ;;  %v780_v50 = vrot.slane %v778_v36, 5  ;;  %v4102_v1 = vld [vmem:[%s4789_s5 + $0xb8] sm:$0xf] }
 0x120   : > { %v2407_v40 = vpop.permute.xlu1 %2406  ;;  %v768_v49 = vrot.slane %v767_v41, 4  ;;  %v786_v51 = vrot.slane %v784_v37, 5  ;;  %v790_v52 = vrot.slane %v788_v38, 4  ;;  %v794_v59 = vshll.u32 %v410_v30, 16  ;;  %v4103_v28 = vld [vmem:[%s4789_s5 + $0xbc] sm:$0x1] }
 0x121   : > { %2448 = vst.msk [vmem:[#allocation2 + $0x38] sm:$0xff] %vm2440_vm12, %v2407_v40  ;;  %v2950_v48 = vpop.permute.xlu0 %2949  ;;  %v3195_v58 = vsel %vm4791_vm2, %v3193_v44, %v3194_v33  ;;  %v3993_v61 = vrot.slane %v953_v34, 9  ;;  %v1110_v63 = vrot.slane %v954_v39, 5  ;;  %v781_v4 = vor.u32 %v780_v50, %v777_v45  ;;  %v4104_v15 = vld [vmem:[%s4789_s5 + $0xc0] sm:$0xf]  ;;  %v4590_v34 = vld [vmem:[%s4789_s5 + $0xb4] sm:$0xff]  }
 0x122   : > { %2992 = vst.msk [vmem:[#allocation2 + $0x30] sm:$0xff] %vm2985_vm13, %v2950_v48  ;;  %v773_v2 = vsel %vm4832_vm5, %v768_v49, %v772_v27  ;;  %v4392_v3 = vcombine.low %v3192_v43, %v3195_v58  ;;  %v791_v6 = vor.u32 %v790_v52, %v786_v51  ;;  %v796_v9 = vrot.slane %v794_v59, 5  ;;  %v4105_v26 = vld [vmem:[%s4789_s5 + $0xc4] sm:$0xf]  ;;  %v4106_v33 = vld [vmem:[%s4789_s5 + $0xc8] sm:$0x1] }
 0x123   : > { %v3977_v8 = vcombine.low %v763_v42, %v773_v2  ;;  %v1111_v56 = vsel %vm4791_vm2, %v3993_v61, %v1110_v63  ;;  %v1112_v62 = vrot.slane %v1110_v63, 4  ;;  %v782_v10 = vrot.slane %v781_v4, 4  ;;  %v4165_v38 = vld [vmem:[%s4789_s5 + $0xb4] sm:$0xe]  ;;  %v4166_v45 = vld [vmem:[%s4789_s5 + $0xb8] sm:$0xf] }
 0x124   : > { %v2952_v7 = vpop.permute.xlu1 %2951  ;;  %3284 = vrot.lane.b32.xlu0 %v4392_v3, %s4705_s20  ;;  %v792_v11 = vrot.slane %v791_v6, 4  ;;  %v1113_v12 = vrot.slane %v955_v46, 5  ;;  %v3994_v13 = vrot.slane %v956_v47, 9  ;;  %v1117_v60 = vrot.slane %v957_v54, 5  ;;  %v4167_v46 = vld [vmem:[%s4789_s5 + $0xbc] sm:$0x1] }
 0x125   : > { %2993 = vst.msk [vmem:[#allocation2 + $0x38] sm:$0xff] %vm2985_vm13, %v2952_v7  ;;  %v3271_v5 = vpop.permute.xlu0 %3270  ;;  %874 = vrot.lane.b32.xlu1 %v3977_v8, %s4701_s9  ;;  %v1120_v16 = vrot.slane %v958_v55, 5  ;;  %v1798_v17 = vshrl.u32 %v4101_v57, 16  ;;  %v1801_v18 = vshll.u32 %v4101_v57, 16  ;;  %v787_v14 = vsel %vm4832_vm5, %v782_v10, %v786_v51  ;;  %v4168_v51 = vld [vmem:[%s4789_s5 + $0xc0] sm:$0xe] }
 0x126   : > { %3313 = vst.msk [vmem:[#allocation2 + $0x30] sm:$0xff] %vm3306_vm14, %v3271_v5  ;;  %v797_v19 = vsel %vm4832_vm5, %v792_v11, %v796_v9  ;;  %v1114_v20 = vsel %vm4791_vm2, %v1112_v62, %v1113_v12  ;;  %v1807_v21 = vshll.u32 %v4102_v1, 16  ;;  %v1118_v24 = vsel %vm4791_vm2, %v3994_v13, %v1117_v60  ;;  %v4169_v59 = vld [vmem:[%s4789_s5 + $0xc4] sm:$0xf]  ;;  %v4170_v4 = vld [vmem:[%s4789_s5 + $0xc8] sm:$0x1] }
 0x127   : > { %v3978_v22 = vcombine.low %v787_v14, %v797_v19  ;;  %v4009_v23 = vcombine.low %v1111_v56, %v1114_v20  ;;  %v1119_v25 = vrot.slane %v1117_v60, 4  ;;  %v1800_v29 = vrot.slane %v1798_v17, 4  ;;  %v4591_v61 = vld [vmem:[%s4789_s5 + $0xc0] sm:$0xff]  }
 0x128   : > { %v1803_v30 = vrot.slane %v1801_v18, 5  ;;  %v1809_v31 = vrot.slane %v1807_v21, 5  ;;  %v1811_v32 = vshrl.u32 %v4102_v1, 16  ;;  %v1817_v41 = vshll.u32 %v4103_v28, 16  ;;  %v4293_v13 = vld [vmem:[%s4789_s5 + $0xc0] sm:$0xf] }
 0x129   : > { %v3273_v27 = vpop.permute.xlu0 %3272  ;;  %876 = vrot.lane.b32.xlu1 %v3978_v22, %s4701_s9  ;;  %1198 = vrot.lane.b32.xlu0 %v4009_v23, %s4700_s8  ;;  %v1121_v35 = vsel %vm4791_vm2, %v1119_v25, %v1120_v16  ;;  %v1822_v36 = vshrl.u32 %v4104_v15, 16  ;;  %v1825_v37 = vshll.u32 %v4104_v15, 16  ;;  %v1831_v43 = vshll.u32 %v4105_v26, 16  ;;  %v4294_v18 = vld [vmem:[%s4789_s5 + $0xc4] sm:$0xf]  ;;  %s4416_s9 = sshll.u32 %s4754_s19, 4 }
 0x12a   : > { %3314 = vst.msk [vmem:[#allocation2 + $0x38] sm:$0xff] %vm3306_vm14, %v3273_v27  ;;  %v4010_v39 = vcombine.low %v1118_v24, %v1121_v35  ;;  %v1804_v40 = vor.u32 %v1803_v30, %v1800_v29  ;;  %v1813_v42 = vrot.slane %v1811_v32, 4  ;;  %v1819_v47 = vrot.slane %v1817_v41, 5  ;;  %v4295_v22 = vld [vmem:[%s4789_s5 + $0xc8] sm:$0x1]  ;;  %s6012_s29 = scalar_lea.hbm %s6091_s3, %s4416_s9  ;;  %s6020_s13 = scalar_lea.hbm %s6092_s4, %s4416_s9 }
 0x12b   : > { %v863_v44 = vpop.permute.xlu1 %862  ;;  %v1824_v48 = vrot.slane %v1822_v36, 4  ;;  %v1827_v49 = vrot.slane %v1825_v37, 5  ;;  %v1835_v50 = vshrl.u32 %v4105_v26, 16  ;;  %v1833_v57 = vrot.slane %v1831_v43, 5  ;;  %v4296_v30 = vld [vmem:[%s4789_s5 + $0xcc] sm:$0xf] }
 0x12c   : > { %903 = vst.msk [vmem:[#allocation2 + $0x40] sm:$0xff] %vm894_vm7, %v863_v44  ;;  %v1805_v54 = vrot.slane %v1804_v40, 4  ;;  %v1814_v55 = vor.u32 %v1813_v42, %v1809_v31  ;;  %v1841_v58 = vshll.u32 %v4106_v33, 16  ;;  %v4185_v2 = vrot.slane %v4165_v38, 9  ;;  %v4594_v42 = vld [vmem:[%s4789_s5 + $0xc0] sm:$0xff]  }
 0x12d   : > { %v3329_v52 = vld [vmem:[#allocation2 + $0x30] sm:$0xff]  ;;  %1200 = vrot.lane.b32.xlu1 %v4010_v39, %s4700_s8  ;;  %1376 = vrot.lane.b32.xlu0 %v4590_v34, %s4698_s6  ;;  %v1828_v63 = vor.u32 %v1827_v49, %v1824_v48  ;;  %v1837_v1 = vrot.slane %v1835_v50, 4  ;;  %v2154_v3 = vrot.slane %v4166_v45, 5  ;;  %v2157_v56 = vrot.slane %v4167_v46, 5  ;;  %v4357_v46 = vld [vmem:[%s4789_s5 + $0xc0] sm:$0xe] }
 0x12e   : > { %4464 = vmatprep.mubr.msk.bf16.mxu0 %vm3375_vm0, %v3329_v52  ;;  %v1810_v7 = vsel %vm4832_vm5, %v1805_v54, %v1809_v31  ;;  %v1815_v8 = vrot.slane %v1814_v55, 4  ;;  %v1843_v9 = vrot.slane %v1841_v58, 5  ;;  %v4186_v60 = vrot.slane %v4168_v51, 9  ;;  %v4297_v34 = vld [vmem:[%s4789_s5 + $0xd0] sm:$0xf] }
 0x12f   : > { %v1187_v6 = vpop.permute.xlu0 %1186  ;;  %v1829_v5 = vrot.slane %v1828_v63, 4  ;;  %v1838_v10 = vor.u32 %v1837_v1, %v1833_v57  ;;  %v2155_v11 = vsel %vm4791_vm2, %v4185_v2, %v2154_v3  ;;  %v2156_v12 = vrot.slane %v2154_v3, 4  ;;  %v4298_v39 = vld [vmem:[%s4789_s5 + $0xd4] sm:$0x1]  ;;  %v4358_v52 = vld [vmem:[%s4789_s5 + $0xc4] sm:$0xf] }
 0x130   : > { %v865_v62 = vpop.permute.xlu1 %864  ;;  %1227 = vst.msk [vmem:[#allocation2 + $0x40] sm:$0xff] %vm1218_vm8, %v1187_v6  ;;  %v1820_v15 = vsel %vm4832_vm5, %v1815_v8, %v1819_v47  ;;  %v2161_v16 = vrot.slane %v4169_v59, 5  ;;  %v2164_v17 = vrot.slane %v4170_v4, 5  ;;  %v2842_v29 = vshrl.u32 %v4293_v13, 16  ;;  %v4359_v59 = vld [vmem:[%s4789_s5 + $0xc8] sm:$0x1] }
 0x131   : > { %904 = vst.msk [vmem:[#allocation2 + $0x48] sm:$0xff] %vm894_vm7, %v865_v62  ;;  %v3330_v28 = vld [vmem:[#allocation2 + $0x38] sm:$0xff]  ;;  %1378 = vrot.lane.b32.xlu1 %v4591_v61, %s4698_s6  ;;  %v4121_v14 = vcombine.low %v1810_v7, %v1820_v15  ;;  %v1834_v19 = vsel %vm4832_vm5, %v1829_v5, %v1833_v57  ;;  %v1839_v20 = vrot.slane %v1838_v10, 4  ;;  %v2158_v21 = vsel %vm4791_vm2, %v2156_v12, %v2157_v56  ;;  %v4360_v61 = vld [vmem:[%s4789_s5 + $0xcc] sm:$0xe] }
 0x132   : > { %4465 = vmatmul.mubr.msk.bf16.gmra.mrb[12].mxu0 %vm3375_vm0, %v3330_v28  ;;  %v4201_v24 = vcombine.low %v2155_v11, %v2158_v21  ;;  %v2162_v25 = vsel %vm4791_vm2, %v4186_v60, %v2161_v16  ;;  %v2163_v26 = vrot.slane %v2161_v16, 4  ;;  %v2845_v32 = vshll.u32 %v4293_v13, 16  ;;  %v4361_v4 = vld [vmem:[%s4789_s5 + $0xd0] sm:$0xf]  ;;  %v4362_v12 = vld [vmem:[%s4789_s5 + $0xd4] sm:$0x1] }
 0x133   : > { %v1365_v23 = vpop.permute.xlu0 %1364  ;;  %1921 = vrot.lane.b32.xlu0 %v4121_v14, %s4702_s10  ;;  %v1844_v31 = vsel %vm4832_vm5, %v1839_v20, %v1843_v9  ;;  %v2851_v33 = vshll.u32 %v4294_v18, 16  ;;  %v2855_v35 = vshrl.u32 %v4294_v18, 16  ;;  %v2844_v37 = vrot.slane %v2842_v29, 4  ;;  %v4595_v62 = vld [vmem:[%s4789_s5 + $0xcc] sm:$0xff]   ;;  %s4420_s5 = sshll.u32 %s4783_s27, 8  ;;  %s6002_s27 = sand.u32 1, %s4688_s16  }
 0x134   : > { %v1189_v27 = vpop.permute.xlu1 %1188  ;;  %1405 = vst.msk [vmem:[#allocation2 + $0x40] sm:$0xff] %vm1396_vm9, %v1365_v23  ;;  %v4122_v41 = vcombine.low %v1834_v19, %v1844_v31  ;;  %v2165_v36 = vsel %vm4791_vm2, %v2163_v26, %v2164_v17  ;;  %v2861_v38 = vshll.u32 %v4295_v22, 16  ;;  %v2847_v43 = vrot.slane %v2845_v32, 5  ;;  %s5853_s8 = scalar_lea.vmem %s6090_s2, %s4420_s5  ;;  %s3800_s14 = scalar_lea.sflag [#allocation4], %s6002_s27 }
 0x135   : > { %1228 = vst.msk [vmem:[#allocation2 + $0x48] sm:$0xff] %vm1218_vm8, %v1189_v27  ;;  %v4202_v40 = vcombine.low %v2162_v25, %v2165_v36  ;;  %v2853_v44 = vrot.slane %v2851_v33, 5  ;;  %v2857_v45 = vrot.slane %v2855_v35, 4  ;;  %v2866_v48 = vshrl.u32 %v4296_v30, 16  ;;  %s4706_s5 = smov [#allocation3]  }
 0x136   : > { %1923 = vrot.lane.b32.xlu1 %v4122_v41, %s4702_s10  ;;  %v2863_v47 = vrot.slane %v2861_v38, 5  ;;  %v2869_v49 = vshll.u32 %v4296_v30, 16  ;;  %v2875_v50 = vshll.u32 %v4297_v34, 16  ;;  %v2848_v54 = vor.u32 %v2847_v43, %v2844_v37  ;;  %s200_s10 = scalar_lea.vmem [#allocation3], %s6002_s27  ;;  %s4606_s6 = sshll.u32 %s4706_s5, 4  ;;  %s4607_s6 = int_to_ptr.vmem [resolvable:$false] %s4606_s6 }
 0x137   : > { %2242 = vrot.lane.b32.xlu0 %v4201_v24, %s4699_s7  ;;  %v2858_v55 = vor.u32 %v2857_v45, %v2853_v44  ;;  %v2879_v57 = vshrl.u32 %v4297_v34, 16  ;;  %v2885_v58 = vshll.u32 %v4298_v39, 16  ;;  %v2868_v63 = vrot.slane %v2866_v48, 4 }
 0x138   : > { %v1367_v51 = vpop.permute.xlu1 %1366  ;;  %v2871_v1 = vrot.slane %v2869_v49, 5  ;;  %v2877_v2 = vrot.slane %v2875_v50, 5  ;;  %v4377_v3 = vrot.slane %v4357_v46, 9  ;;  %v1910_v6 = vpop.permute.xlu0 %1909  ;;  %v2849_v7 = vrot.slane %v2848_v54, 4 }
 0x139   : > { %1406 = vst.msk [vmem:[#allocation2 + $0x48] sm:$0xff] %vm1396_vm9, %v1367_v51  ;;  %v2859_v8 = vrot.slane %v2858_v55, 4  ;;  %v2881_v9 = vrot.slane %v2879_v57, 4  ;;  %v2887_v56 = vrot.slane %v2885_v58, 5  ;;  %v3198_v10 = vrot.slane %v4358_v52, 5 }
 0x13a   : > { %1950 = vst.msk [vmem:[#allocation2 + $0x40] sm:$0xff] %vm1941_vm10, %v1910_v6  ;;  %2244 = vrot.lane.b32.xlu1 %v4202_v40, %s4699_s7  ;;  %v2872_v5 = vor.u32 %v2871_v1, %v2868_v63  ;;  %v3201_v11 = vrot.slane %v4359_v59, 5  ;;  %v4378_v13 = vrot.slane %v4360_v61, 9  ;;  %v2854_v28 = vsel %vm4832_vm5, %v2849_v7, %v2853_v44  ;;  %s4608_s7 = scalar_lea.vmem %s4607_s6, 32 }
 0x13b   : > { %2420 = vrot.lane.b32.xlu0 %v4594_v42, %s4703_s11  ;;  %v2864_v15 = vsel %vm4832_vm5, %v2859_v8, %v2863_v47  ;;  %v2882_v60 = vor.u32 %v2881_v9, %v2877_v2  ;;  %v3205_v16 = vrot.slane %v4361_v4, 5  ;;  %v3199_v19 = vsel %vm4791_vm2, %v4377_v3, %v3198_v10 }
 0x13c   : > { %v1912_v17 = vpop.permute.xlu1 %1911  ;;  %v4313_v18 = vcombine.low %v2854_v28, %v2864_v15  ;;  %v2873_v14 = vrot.slane %v2872_v5, 4  ;;  %v3200_v20 = vrot.slane %v3198_v10, 4  ;;  %v2231_v21 = vpop.permute.xlu0 %2230  ;;  %v3208_v24 = vrot.slane %v4362_v12, 5 }
 0x13d   : > { %1951 = vst.msk [vmem:[#allocation2 + $0x48] sm:$0xff] %vm1941_vm10, %v1912_v17  ;;  %v2883_v22 = vrot.slane %v2882_v60, 4  ;;  %v3207_v23 = vrot.slane %v3205_v16, 4  ;;  %v3206_v30 = vsel %vm4791_vm2, %v4378_v13, %v3205_v16 }
 0x13e   : > { %2271 = vst.msk [vmem:[#allocation2 + $0x40] sm:$0xff] %vm2262_vm11, %v2231_v21  ;;  %2422 = vrot.lane.b32.xlu1 %v4595_v62, %s4703_s11  ;;  %v2878_v25 = vsel %vm4832_vm5, %v2873_v14, %v2877_v2  ;;  %v3202_v26 = vsel %vm4791_vm2, %v3200_v20, %v3201_v11  ;;  %s3819_s11 = sshll.u32 %s200_s10, 4  ;;  %s6014_s11 = int_to_ptr.vmem [resolvable:$true] %s3819_s11 }
 0x13f   : > { %2965 = vrot.lane.b32.xlu0 %v4313_v18, %s4704_s12  ;;  %v2888_v27 = vsel %vm4832_vm5, %v2883_v22, %v2887_v56  ;;  %v4393_v29 = vcombine.low %v3199_v19, %v3202_v26  ;;  %v3209_v31 = vsel %vm4791_vm2, %v3207_v23, %v3208_v24  ;;  %s4602_s22 = scalar_lea.vmem %s6014_s11, 16  ;;  %p4609_p0 = scmp.lt.s32.totalorder %s6014_s11, %s4607_s6 }
 0x140   : > { %v2233_v32 = vpop.permute.xlu1 %2232  ;;  %v4314_v33 = vcombine.low %v2878_v25, %v2888_v27  ;;  %v2409_v35 = vpop.permute.xlu0 %2408  ;;  %v4394_v34 = vcombine.low %v3206_v30, %v3209_v31  ;;  %p4603_p11 = scmp.ne.s32.totalorder %s6014_s11, %s4602_s22  ;;  %p4610_p1 = scmp.lt.s32.totalorder %s4608_s7, %s4602_s22 }
 0x141   : > { %2272 = vst.msk [vmem:[#allocation2 + $0x48] sm:$0xff] %vm2262_vm11, %v2233_v32 }
 0x142   : > { %2449 = vst.msk [vmem:[#allocation2 + $0x40] sm:$0xff] %vm2440_vm12, %v2409_v35  ;;  %2967 = vrot.lane.b32.xlu1 %v4314_v33, %s4704_s12  ;;  %s206_s12 = scalar_lea.vmem [#allocation5], %s6002_s27  ;;  %p4604_p12 = pnand %p4603_p11, %p4771_p5 }
 0x143   : > { %3286 = vrot.lane.b32.xlu0 %v4393_v29, %s4705_s20  ;;  %p4611_p2 = por %p4610_p1, %p4609_p0 }
 0x144   : > { %v2411_v53 = vpop.permute.xlu1 %2410  ;;  %p4605_p13 = pneg %p4604_p12 }
 0x145   : > { %2450 = vst.msk [vmem:[#allocation2 + $0x48] sm:$0xff] %vm2440_vm12, %v2411_v53  ;;  %v2954_v41 = vpop.permute.xlu0 %2953 }
 0x146   : > { %3288 = vrot.lane.b32.xlu1 %v4394_v34, %s4705_s20  ;;  %2994 = vst.msk [vmem:[#allocation2 + $0x40] sm:$0xff] %vm2985_vm13, %v2954_v41  ;;  %s3832_s20 = sshll.u32 %s206_s12, 4  ;;  %p4612_p3 = pnand %p4611_p2, %p4605_p13  ;;  %s6022_s20 = int_to_ptr.vmem [resolvable:$true] %s3832_s20 }
 0x148   : > { %v2956_v0 = vpop.permute.xlu1 %2955 }
 0x149   : > { %2995 = vst.msk [vmem:[#allocation2 + $0x48] sm:$0xff] %vm2985_vm13, %v2956_v0  ;;  %v3275_v36 = vpop.permute.xlu0 %3274 }
 0x14a   : > { %3315 = vst.msk [vmem:[#allocation2 + $0x40] sm:$0xff] %vm3306_vm14, %v3275_v36 }
 0x14e   : > { %v3277_v37 = vpop.permute.xlu0 %3276 }
 0x14f   : > { %v867_v38 = vpop.permute.xlu1 %866  ;;  %3316 = vst.msk [vmem:[#allocation2 + $0x48] sm:$0xff] %vm3306_vm14, %v3277_v37 }
 0x150   : > { %905 = vst.msk [vmem:[#allocation2 + $0x50] sm:$0xff] %vm894_vm7, %v867_v38 }
 0x151   : > { %v3331_v39 = vld [vmem:[#allocation2 + $0x40] sm:$0xff] }
 0x152   : > { %4468 = vmatprep.mubr.msk.bf16.mxu1 %vm3375_vm0, %v3331_v39 }
 0x153   : > { %v869_v40 = vpop.permute.xlu1 %868  ;;  %v1191_v42 = vpop.permute.xlu0 %1190 }
 0x154   : > { %906 = vst.msk [vmem:[#allocation2 + $0x58] sm:$0xff] %vm894_vm7, %v869_v40 }
 0x155   : > { %1229 = vst.msk [vmem:[#allocation2 + $0x50] sm:$0xff] %vm1218_vm8, %v1191_v42 }
 0x156   : > { %v3332_v43 = vld [vmem:[#allocation2 + $0x48] sm:$0xff] }
 0x157   : > { %v1193_v44 = vpop.permute.xlu1 %1192  ;;  %v1369_v45 = vpop.permute.xlu0 %1368  ;;  %4469 = vmatmul.mubr.msk.bf16.vlgmr.msra.gmra.mrb[0].mxu1 %vm3375_vm0, %v3332_v43 }
 0x158   : > { %1230 = vst.msk [vmem:[#allocation2 + $0x58] sm:$0xff] %vm1218_vm8, %v1193_v44 }
 0x159   : > { %1407 = vst.msk [vmem:[#allocation2 + $0x50] sm:$0xff] %vm1396_vm9, %v1369_v45 }
 0x15b   : > { %v1371_v46 = vpop.permute.xlu1 %1370 }
 0x15c   : > { %1408 = vst.msk [vmem:[#allocation2 + $0x58] sm:$0xff] %vm1396_vm9, %v1371_v46 }
 0x15d   : > { %v1914_v47 = vpop.permute.xlu0 %1913 }
 0x15e   : > { %1952 = vst.msk [vmem:[#allocation2 + $0x50] sm:$0xff] %vm1941_vm10, %v1914_v47 }
 0x160   : > { %v1916_v48 = vpop.permute.xlu1 %1915 }
 0x161   : > { %1953 = vst.msk [vmem:[#allocation2 + $0x58] sm:$0xff] %vm1941_vm10, %v1916_v48  ;;  %v2235_v49 = vpop.permute.xlu0 %2234 }
 0x162   : > { %2273 = vst.msk [vmem:[#allocation2 + $0x50] sm:$0xff] %vm2262_vm11, %v2235_v49 }
 0x164   : > { %v2237_v50 = vpop.permute.xlu1 %2236 }
 0x165   : > { %2274 = vst.msk [vmem:[#allocation2 + $0x58] sm:$0xff] %vm2262_vm11, %v2237_v50  ;;  %v2413_v51 = vpop.permute.xlu0 %2412 }
 0x166   : > { %2451 = vst.msk [vmem:[#allocation2 + $0x50] sm:$0xff] %vm2440_vm12, %v2413_v51 }
 0x168   : > { %v2415_v52 = vpop.permute.xlu1 %2414 }
 0x169   : > { %2452 = vst.msk [vmem:[#allocation2 + $0x58] sm:$0xff] %vm2440_vm12, %v2415_v52  ;;  %v2958_v54 = vpop.permute.xlu0 %2957 }
 0x16a   : > { %2996 = vst.msk [vmem:[#allocation2 + $0x50] sm:$0xff] %vm2985_vm13, %v2958_v54 }
 0x16c   : > { %v2960_v55 = vpop.permute.xlu1 %2959 }
 0x16d   : > { %2997 = vst.msk [vmem:[#allocation2 + $0x58] sm:$0xff] %vm2985_vm13, %v2960_v55  ;;  %v3279_v57 = vpop.permute.xlu0 %3278 }
 0x16e   : > { %3317 = vst.msk [vmem:[#allocation2 + $0x50] sm:$0xff] %vm3306_vm14, %v3279_v57 }
 0x172   : > { %v3281_v58 = vpop.permute.xlu0 %3280 }
 0x173   : > { %v871_v59 = vpop.permute.xlu1 %870  ;;  %3318 = vst.msk [vmem:[#allocation2 + $0x58] sm:$0xff] %vm3306_vm14, %v3281_v58 }
 0x174   : > { %907 = vst.msk [vmem:[#allocation2 + $0x60] sm:$0xff] %vm894_vm7, %v871_v59 }
 0x175   : > { %v3333_v61 = vld [vmem:[#allocation2 + $0x50] sm:$0xff] }
 0x176   : > { %4472 = vmatprep.mubr.msk.bf16.mxu1 %vm3375_vm0, %v3333_v61 }
 0x177   : > { %v873_v63 = vpop.permute.xlu1 %872  ;;  %v1195_v1 = vpop.permute.xlu0 %1194 }
 0x178   : > { %908 = vst.msk [vmem:[#allocation2 + $0x68] sm:$0xff] %vm894_vm7, %v873_v63 }
 0x179   : > { %1231 = vst.msk [vmem:[#allocation2 + $0x60] sm:$0xff] %vm1218_vm8, %v1195_v1 }
 0x17a   : > { %v3334_v2 = vld [vmem:[#allocation2 + $0x58] sm:$0xff] }
 0x17b   : > { %v1197_v3 = vpop.permute.xlu1 %1196  ;;  %v1373_v4 = vpop.permute.xlu0 %1372  ;;  %4473 = vmatmul.mubr.msk.bf16.gmra.mrb[4].mxu1 %vm3375_vm0, %v3334_v2 }
 0x17c   : > { %1232 = vst.msk [vmem:[#allocation2 + $0x68] sm:$0xff] %vm1218_vm8, %v1197_v3 }
 0x17d   : > { %1409 = vst.msk [vmem:[#allocation2 + $0x60] sm:$0xff] %vm1396_vm9, %v1373_v4 }
 0x17f   : > { %v1375_v6 = vpop.permute.xlu1 %1374 }
 0x180   : > { %1410 = vst.msk [vmem:[#allocation2 + $0x68] sm:$0xff] %vm1396_vm9, %v1375_v6 }
 0x181   : > { %v1918_v7 = vpop.permute.xlu0 %1917 }
 0x182   : > { %1954 = vst.msk [vmem:[#allocation2 + $0x60] sm:$0xff] %vm1941_vm10, %v1918_v7 }
 0x184   : > { %v1920_v8 = vpop.permute.xlu1 %1919 }
 0x185   : > { %1955 = vst.msk [vmem:[#allocation2 + $0x68] sm:$0xff] %vm1941_vm10, %v1920_v8  ;;  %v2239_v9 = vpop.permute.xlu0 %2238 }
 0x186   : > { %2275 = vst.msk [vmem:[#allocation2 + $0x60] sm:$0xff] %vm2262_vm11, %v2239_v9 }
 0x188   : > { %v2241_v56 = vpop.permute.xlu1 %2240 }
 0x189   : > { %2276 = vst.msk [vmem:[#allocation2 + $0x68] sm:$0xff] %vm2262_vm11, %v2241_v56  ;;  %v2417_v62 = vpop.permute.xlu0 %2416 }
 0x18a   : > { %2453 = vst.msk [vmem:[#allocation2 + $0x60] sm:$0xff] %vm2440_vm12, %v2417_v62 }
 0x18c   : > { %v2419_v5 = vpop.permute.xlu1 %2418 }
 0x18d   : > { %2454 = vst.msk [vmem:[#allocation2 + $0x68] sm:$0xff] %vm2440_vm12, %v2419_v5  ;;  %v2962_v10 = vpop.permute.xlu0 %2961 }
 0x18e   : > { %2998 = vst.msk [vmem:[#allocation2 + $0x60] sm:$0xff] %vm2985_vm13, %v2962_v10 }
 0x190   : > { %v2964_v11 = vpop.permute.xlu1 %2963 }
 0x191   : > { %2999 = vst.msk [vmem:[#allocation2 + $0x68] sm:$0xff] %vm2985_vm13, %v2964_v11  ;;  %v3283_v12 = vpop.permute.xlu0 %3282 }
 0x192   : > { %3319 = vst.msk [vmem:[#allocation2 + $0x60] sm:$0xff] %vm3306_vm14, %v3283_v12 }
 0x196   : > { %v3285_v13 = vpop.permute.xlu0 %3284 }
 0x197   : > { %v875_v28 = vpop.permute.xlu1 %874  ;;  %3320 = vst.msk [vmem:[#allocation2 + $0x68] sm:$0xff] %vm3306_vm14, %v3285_v13 }
 0x198   : > { %909 = vst.msk [vmem:[#allocation2 + $0x70] sm:$0xff] %vm894_vm7, %v875_v28 }
 0x199   : > { %v3335_v15 = vld [vmem:[#allocation2 + $0x60] sm:$0xff] }
 0x19a   : > { %4476 = vmatprep.mubr.msk.bf16.mxu1 %vm3375_vm0, %v3335_v15 }
 0x19b   : > { %v877_v60 = vpop.permute.xlu1 %876  ;;  %v1199_v16 = vpop.permute.xlu0 %1198 }
 0x19c   : > { %910 = vst.msk [vmem:[#allocation2 + $0x78] sm:$0xff] %vm894_vm7, %v877_v60 }
 0x19d   : > { %1233 = vst.msk [vmem:[#allocation2 + $0x70] sm:$0xff] %vm1218_vm8, %v1199_v16 }
 0x19e   : > { %v4454_v17 = vpop.f32.mrb[0].mxu0  ;;  %v3336_v18 = vld [vmem:[#allocation2 + $0x68] sm:$0xff] }
 0x19f   : > { %3591 = vst.msk [vmem:[%s5853_s8 + $0x10] sm:$0xff] %vm346_vm6, %v4454_v17  ;;  %v3462_v14 = vpop.f32.mrb[1].mxu0  ;;  %v1201_v19 = vpop.permute.xlu1 %1200  ;;  %4477 = vmatmul.mubr.msk.bf16.gmra.mrb[8].mxu1 %vm3375_vm0, %v3336_v18  ;;  %v3694_v24 = vmul.f32 %v4454_v17, %v4454_v17  ;;  %v3624_v31 = vsel %vm346_vm6, %v4454_v17, 0.0 }
 0x1a0   : > { %v1377_v20 = vpop.permute.xlu0 %1376  ;;  %3589 = vst.msk [vmem:[%s5853_s8] sm:$0xff] %vm346_vm6, %v3462_v14  ;;  %v3692_v21 = vmul.f32 %v3462_v14, %v3462_v14  ;;  %v4455_v22 = vpop.f32.mrb[2].mxu0  ;;  %v3621_v25 = vsel %vm346_vm6, %v3462_v14, 0.0 }
 0x1a1   : > { %1234 = vst.msk [vmem:[#allocation2 + $0x78] sm:$0xff] %vm1218_vm8, %v1201_v19  ;;  %v3465_v23 = vpop.f32.mrb[3].mxu0  ;;  %v3695_v33 = vmul.f32 %v4455_v22, %v4455_v22  ;;  %v3727_v0 = vsel %vm346_vm6, %v3694_v24, 0.0  ;;  %v3626_v36 = vsel %vm346_vm6, %v4455_v22, 0.0 }
 0x1a2   : > { %1411 = vst.msk [vmem:[#allocation2 + $0x70] sm:$0xff] %vm1396_vm9, %v1377_v20  ;;  %v3622_v26 = vsel %vm346_vm6, %v3465_v23, 0.0  ;;  %v3693_v27 = vmul.f32 %v3465_v23, %v3465_v23  ;;  %v3724_v32 = vsel %vm346_vm6, %v3692_v21, 0.0 }
 0x1a3   : > { %3592 = vst.msk [vmem:[%s5853_s8 + $0x18] sm:$0xff] %vm346_vm6, %v4455_v22  ;;  %3590 = vst.msk [vmem:[%s5853_s8 + $0x8] sm:$0xff] %vm346_vm6, %v3465_v23  ;;  %v1379_v29 = vpop.permute.xlu1 %1378  ;;  %v3623_v30 = vadd.f32 %v3622_v26, %v3621_v25  ;;  %v3729_v40 = vsel %vm346_vm6, %v3695_v33, 0.0 }
 0x1a4   : > { %1412 = vst.msk [vmem:[#allocation2 + $0x78] sm:$0xff] %vm1396_vm9, %v1379_v29  ;;  %v3725_v35 = vsel %vm346_vm6, %v3693_v27, 0.0 }
 0x1a5   : > { %v1922_v34 = vpop.permute.xlu0 %1921  ;;  %v3625_v53 = vadd.f32 %v3624_v31, %v3623_v30  ;;  %v3726_v41 = vadd.f32 %v3725_v35, %v3724_v32 }
 0x1a6   : > { %1956 = vst.msk [vmem:[#allocation2 + $0x70] sm:$0xff] %vm1941_vm10, %v1922_v34 }
 0x1a7   : > { %v3728_v37 = vadd.f32 %v3727_v0, %v3726_v41  ;;  %v3627_v38 = vadd.f32 %v3626_v36, %v3625_v53 }
 0x1a8   : > { %v1924_v39 = vpop.permute.xlu1 %1923 }
 0x1a9   : > { %1957 = vst.msk [vmem:[#allocation2 + $0x78] sm:$0xff] %vm1941_vm10, %v1924_v39  ;;  %v2243_v42 = vpop.permute.xlu0 %2242  ;;  %v3730_v43 = vadd.f32 %v3729_v40, %v3728_v37 }
 0x1aa   : > { %2277 = vst.msk [vmem:[#allocation2 + $0x70] sm:$0xff] %vm2262_vm11, %v2243_v42 }
 0x1ac   : > { %v2245_v44 = vpop.permute.xlu1 %2244 }
 0x1ad   : > { %2278 = vst.msk [vmem:[#allocation2 + $0x78] sm:$0xff] %vm2262_vm11, %v2245_v44  ;;  %v2421_v45 = vpop.permute.xlu0 %2420 }
 0x1ae   : > { %2455 = vst.msk [vmem:[#allocation2 + $0x70] sm:$0xff] %vm2440_vm12, %v2421_v45 }
 0x1b0   : > { %v2423_v46 = vpop.permute.xlu1 %2422 }
 0x1b1   : > { %2456 = vst.msk [vmem:[#allocation2 + $0x78] sm:$0xff] %vm2440_vm12, %v2423_v46  ;;  %v2966_v47 = vpop.permute.xlu0 %2965 }
 0x1b2   : > { %3000 = vst.msk [vmem:[#allocation2 + $0x70] sm:$0xff] %vm2985_vm13, %v2966_v47 }
 0x1b4   : > { %v2968_v48 = vpop.permute.xlu1 %2967 }
 0x1b5   : > { %3001 = vst.msk [vmem:[#allocation2 + $0x78] sm:$0xff] %vm2985_vm13, %v2968_v48  ;;  %v3287_v49 = vpop.permute.xlu0 %3286 }
 0x1b6   : > { %3321 = vst.msk [vmem:[#allocation2 + $0x70] sm:$0xff] %vm3306_vm14, %v3287_v49 }
 0x1b8   : > { %v3289_v50 = vpop.permute.xlu1 %3288 }
 0x1b9   : > { %3322 = vst.msk [vmem:[#allocation2 + $0x78] sm:$0xff] %vm3306_vm14, %v3289_v50 }
 0x1bd   : > { %v4458_v51 = vpop.f32.mrb[4].mxu0  ;;  %v3337_v54 = vld [vmem:[#allocation2 + $0x70] sm:$0xff] }
 0x1be   : > { %3595 = vst.msk [vmem:[%s5853_s8 + $0x30] sm:$0xff] %vm346_vm6, %v4458_v51  ;;  %v3478_v52 = vpop.f32.mrb[5].mxu0  ;;  %4480 = vmatprep.mubr.msk.bf16.mxu1 %vm3375_vm0, %v3337_v54  ;;  %v3698_v63 = vmul.f32 %v4458_v51, %v4458_v51  ;;  %v3632_v8 = vsel %vm346_vm6, %v4458_v51, 0.0 }
 0x1bf   : > { %3593 = vst.msk [vmem:[%s5853_s8 + $0x20] sm:$0xff] %vm346_vm6, %v3478_v52  ;;  %v3628_v55 = vsel %vm346_vm6, %v3478_v52, 0.0  ;;  %v3696_v57 = vmul.f32 %v3478_v52, %v3478_v52  ;;  %v4459_v58 = vpop.f32.mrb[6].mxu0 }
 0x1c0   : > { %v3629_v59 = vadd.f32 %v3628_v55, %v3627_v38  ;;  %3596 = vst.msk [vmem:[%s5853_s8 + $0x38] sm:$0xff] %vm346_vm6, %v4459_v58  ;;  %v3481_v61 = vpop.f32.mrb[7].mxu0  ;;  %v3338_v4 = vld [vmem:[#allocation2 + $0x78] sm:$0xff]  ;;  %v3699_v9 = vmul.f32 %v4459_v58, %v4459_v58  ;;  %v3735_v10 = vsel %vm346_vm6, %v3698_v63, 0.0  ;;  %v3634_v11 = vsel %vm346_vm6, %v4459_v58, 0.0 }
 0x1c1   : > { %v3731_v1 = vsel %vm346_vm6, %v3696_v57, 0.0  ;;  %3594 = vst.msk [vmem:[%s5853_s8 + $0x28] sm:$0xff] %vm346_vm6, %v3481_v61  ;;  %v3630_v2 = vsel %vm346_vm6, %v3481_v61, 0.0  ;;  %v3697_v3 = vmul.f32 %v3481_v61, %v3481_v61  ;;  %4481 = vmatmul.mubr.msk.bf16.gmra.mrb[12].mxu1 %vm3375_vm0, %v3338_v4 }
 0x1c2   : > { %v3732_v6 = vadd.f32 %v3731_v1, %v3730_v43  ;;  %v3631_v7 = vadd.f32 %v3630_v2, %v3629_v59  ;;  %v3737_v28 = vsel %vm346_vm6, %v3699_v9, 0.0 }
 0x1c3   : > { %v3733_v56 = vsel %vm346_vm6, %v3697_v3, 0.0 }
 0x1c4   : > { %v3633_v62 = vadd.f32 %v3632_v8, %v3631_v7  ;;  %v3734_v5 = vadd.f32 %v3733_v56, %v3732_v6 }
 0x1c6   : > { %v3736_v12 = vadd.f32 %v3735_v10, %v3734_v5  ;;  %v3635_v13 = vadd.f32 %v3634_v11, %v3633_v62 }
 0x1c8   : > { %v3738_v15 = vadd.f32 %v3737_v28, %v3736_v12 }
 0x1e1   : > { %v4462_v60 = vpop.f32.mrb[8].mxu0 }
 0x1e2   : > { %3599 = vst.msk [vmem:[%s5853_s8 + $0x50] sm:$0xff] %vm346_vm6, %v4462_v60  ;;  %v3494_v16 = vpop.f32.mrb[9].mxu0  ;;  %v3702_v21 = vmul.f32 %v4462_v60, %v4462_v60  ;;  %v3640_v27 = vsel %vm346_vm6, %v4462_v60, 0.0 }
 0x1e3   : > { %3597 = vst.msk [vmem:[%s5853_s8 + $0x40] sm:$0xff] %vm346_vm6, %v3494_v16  ;;  %v3636_v17 = vsel %vm346_vm6, %v3494_v16, 0.0  ;;  %v3700_v18 = vmul.f32 %v3494_v16, %v3494_v16  ;;  %v4463_v14 = vpop.f32.mrb[10].mxu0 }
 0x1e4   : > { %v3637_v19 = vadd.f32 %v3636_v17, %v3635_v13  ;;  %3600 = vst.msk [vmem:[%s5853_s8 + $0x58] sm:$0xff] %vm346_vm6, %v4463_v14  ;;  %v3497_v20 = vpop.f32.mrb[11].mxu0  ;;  %v3703_v29 = vmul.f32 %v4463_v14, %v4463_v14  ;;  %v3743_v33 = vsel %vm346_vm6, %v3702_v21, 0.0  ;;  %v3642_v35 = vsel %vm346_vm6, %v4463_v14, 0.0 }
 0x1e5   : > { %v3739_v22 = vsel %vm346_vm6, %v3700_v18, 0.0  ;;  %3598 = vst.msk [vmem:[%s5853_s8 + $0x48] sm:$0xff] %vm346_vm6, %v3497_v20  ;;  %v3638_v23 = vsel %vm346_vm6, %v3497_v20, 0.0  ;;  %v3701_v24 = vmul.f32 %v3497_v20, %v3497_v20 }
 0x1e6   : > { %v3740_v25 = vadd.f32 %v3739_v22, %v3738_v15  ;;  %v3639_v26 = vadd.f32 %v3638_v23, %v3637_v19  ;;  %v3745_v41 = vsel %vm346_vm6, %v3703_v29, 0.0 }
 0x1e7   : > { %v3741_v30 = vsel %vm346_vm6, %v3701_v24, 0.0 }
 0x1e8   : > { %v3641_v31 = vadd.f32 %v3640_v27, %v3639_v26  ;;  %v3742_v32 = vadd.f32 %v3741_v30, %v3740_v25 }
 0x1ea   : > { %v3744_v34 = vadd.f32 %v3743_v33, %v3742_v32  ;;  %v3643_v53 = vadd.f32 %v3642_v35, %v3641_v31 }
 0x1ec   : > { %v3746_v0 = vadd.f32 %v3745_v41, %v3744_v34 }
 0x205   : > { %v4466_v36 = vpop.f32.mrb[12].mxu0 }
 0x206   : > { %3603 = vst.msk [vmem:[%s5853_s8 + $0x70] sm:$0xff] %vm346_vm6, %v4466_v36  ;;  %v3510_v37 = vpop.f32.mrb[13].mxu0  ;;  %v3706_v44 = vmul.f32 %v4466_v36, %v4466_v36  ;;  %v3648_v50 = vsel %vm346_vm6, %v4466_v36, 0.0 }
 0x207   : > { %3601 = vst.msk [vmem:[%s5853_s8 + $0x60] sm:$0xff] %vm346_vm6, %v3510_v37  ;;  %v3644_v38 = vsel %vm346_vm6, %v3510_v37, 0.0  ;;  %v3704_v39 = vmul.f32 %v3510_v37, %v3510_v37  ;;  %v4467_v40 = vpop.f32.mrb[14].mxu0 }
 0x208   : > { %v3645_v42 = vadd.f32 %v3644_v38, %v3643_v53  ;;  %3604 = vst.msk [vmem:[%s5853_s8 + $0x78] sm:$0xff] %vm346_vm6, %v4467_v40  ;;  %v3513_v43 = vpop.f32.mrb[15].mxu0  ;;  %v3707_v51 = vmul.f32 %v4467_v40, %v4467_v40  ;;  %v3751_v57 = vsel %vm346_vm6, %v3706_v44, 0.0  ;;  %v3650_v58 = vsel %vm346_vm6, %v4467_v40, 0.0 }
 0x209   : > { %v3747_v45 = vsel %vm346_vm6, %v3704_v39, 0.0  ;;  %3602 = vst.msk [vmem:[%s5853_s8 + $0x68] sm:$0xff] %vm346_vm6, %v3513_v43  ;;  %v3646_v46 = vsel %vm346_vm6, %v3513_v43, 0.0  ;;  %v3705_v47 = vmul.f32 %v3513_v43, %v3513_v43 }
 0x20a   : > { %v3748_v48 = vadd.f32 %v3747_v45, %v3746_v0  ;;  %v3647_v49 = vadd.f32 %v3646_v46, %v3645_v42  ;;  %v3753_v63 = vsel %vm346_vm6, %v3707_v51, 0.0 }
 0x20b   : > { %v3749_v52 = vsel %vm346_vm6, %v3705_v47, 0.0 }
 0x20c   : > { %v3649_v54 = vadd.f32 %v3648_v50, %v3647_v49  ;;  %v3750_v55 = vadd.f32 %v3749_v52, %v3748_v48 }
 0x20e   : > { %v3752_v59 = vadd.f32 %v3751_v57, %v3750_v55  ;;  %v3651_v61 = vadd.f32 %v3650_v58, %v3649_v54 }
 0x210   : > { %v3754_v1 = vadd.f32 %v3753_v63, %v3752_v59 }
 0x22a   : > { %v4470_v2 = vpop.f32.mrb[0].mxu1 }
 0x22b   : > { %3607 = vst.msk [vmem:[%s5853_s8 + $0x90] sm:$0xff] %vm346_vm6, %v4470_v2  ;;  %v3526_v3 = vpop.f32.mrb[1].mxu1  ;;  %v3710_v56 = vmul.f32 %v4470_v2, %v4470_v2  ;;  %v3656_v13 = vsel %vm346_vm6, %v4470_v2, 0.0 }
 0x22c   : > { %3605 = vst.msk [vmem:[%s5853_s8 + $0x80] sm:$0xff] %vm346_vm6, %v3526_v3  ;;  %v3652_v4 = vsel %vm346_vm6, %v3526_v3, 0.0  ;;  %v3708_v6 = vmul.f32 %v3526_v3, %v3526_v3  ;;  %v4471_v7 = vpop.f32.mrb[2].mxu1 }
 0x22d   : > { %v3653_v8 = vadd.f32 %v3652_v4, %v3651_v61  ;;  %3608 = vst.msk [vmem:[%s5853_s8 + $0x98] sm:$0xff] %vm346_vm6, %v4471_v7  ;;  %v3529_v9 = vpop.f32.mrb[3].mxu1  ;;  %v3711_v28 = vmul.f32 %v4471_v7, %v4471_v7  ;;  %v3759_v17 = vsel %vm346_vm6, %v3710_v56, 0.0  ;;  %v3658_v18 = vsel %vm346_vm6, %v4471_v7, 0.0 }
 0x22e   : > { %v3755_v62 = vsel %vm346_vm6, %v3708_v6, 0.0  ;;  %3606 = vst.msk [vmem:[%s5853_s8 + $0x88] sm:$0xff] %vm346_vm6, %v3529_v9  ;;  %v3654_v5 = vsel %vm346_vm6, %v3529_v9, 0.0  ;;  %v3709_v10 = vmul.f32 %v3529_v9, %v3529_v9 }
 0x22f   : > { %v3756_v11 = vadd.f32 %v3755_v62, %v3754_v1  ;;  %v3655_v12 = vadd.f32 %v3654_v5, %v3653_v8  ;;  %v3761_v20 = vsel %vm346_vm6, %v3711_v28, 0.0 }
 0x230   : > { %v3757_v15 = vsel %vm346_vm6, %v3709_v10, 0.0 }
 0x231   : > { %v3657_v60 = vadd.f32 %v3656_v13, %v3655_v12  ;;  %v3758_v16 = vadd.f32 %v3757_v15, %v3756_v11 }
 0x233   : > { %v3760_v14 = vadd.f32 %v3759_v17, %v3758_v16  ;;  %v3659_v19 = vadd.f32 %v3658_v18, %v3657_v60 }
 0x235   : > { %v3762_v21 = vadd.f32 %v3761_v20, %v3760_v14 }
 0x24e   : > { %v4474_v22 = vpop.f32.mrb[4].mxu1 }
 0x24f   : > { %3611 = vst.msk [vmem:[%s5853_s8 + $0xb0] sm:$0xff] %vm346_vm6, %v4474_v22  ;;  %v3542_v23 = vpop.f32.mrb[5].mxu1  ;;  %v3714_v30 = vmul.f32 %v4474_v22, %v4474_v22  ;;  %v3664_v53 = vsel %vm346_vm6, %v4474_v22, 0.0 }
 0x250   : > { %3609 = vst.msk [vmem:[%s5853_s8 + $0xa0] sm:$0xff] %vm346_vm6, %v3542_v23  ;;  %v3660_v24 = vsel %vm346_vm6, %v3542_v23, 0.0  ;;  %v3712_v25 = vmul.f32 %v3542_v23, %v3542_v23  ;;  %v4475_v26 = vpop.f32.mrb[6].mxu1 }
 0x251   : > { %v3661_v27 = vadd.f32 %v3660_v24, %v3659_v19  ;;  %3612 = vst.msk [vmem:[%s5853_s8 + $0xb8] sm:$0xff] %vm346_vm6, %v4475_v26  ;;  %v3545_v29 = vpop.f32.mrb[7].mxu1  ;;  %v3715_v41 = vmul.f32 %v4475_v26, %v4475_v26  ;;  %v3767_v38 = vsel %vm346_vm6, %v3714_v30, 0.0  ;;  %v3666_v39 = vsel %vm346_vm6, %v4475_v26, 0.0 }
 0x252   : > { %v3763_v31 = vsel %vm346_vm6, %v3712_v25, 0.0  ;;  %3610 = vst.msk [vmem:[%s5853_s8 + $0xa8] sm:$0xff] %vm346_vm6, %v3545_v29  ;;  %v3662_v32 = vsel %vm346_vm6, %v3545_v29, 0.0  ;;  %v3713_v33 = vmul.f32 %v3545_v29, %v3545_v29 }
 0x253   : > { %v3764_v35 = vadd.f32 %v3763_v31, %v3762_v21  ;;  %v3663_v34 = vadd.f32 %v3662_v32, %v3661_v27  ;;  %v3769_v43 = vsel %vm346_vm6, %v3715_v41, 0.0 }
 0x254   : > { %v3765_v0 = vsel %vm346_vm6, %v3713_v33, 0.0 }
 0x255   : > { %v3665_v36 = vadd.f32 %v3664_v53, %v3663_v34  ;;  %v3766_v37 = vadd.f32 %v3765_v0, %v3764_v35 }
 0x257   : > { %v3768_v40 = vadd.f32 %v3767_v38, %v3766_v37  ;;  %v3667_v42 = vadd.f32 %v3666_v39, %v3665_v36 }
 0x259   : > { %v3770_v44 = vadd.f32 %v3769_v43, %v3768_v40 }
 0x272   : > { %v4478_v45 = vpop.f32.mrb[8].mxu1 }
 0x273   : > { %3615 = vst.msk [vmem:[%s5853_s8 + $0xd0] sm:$0xff] %vm346_vm6, %v4478_v45  ;;  %v3558_v46 = vpop.f32.mrb[9].mxu1  ;;  %v3718_v52 = vmul.f32 %v4478_v45, %v4478_v45  ;;  %v3672_v61 = vsel %vm346_vm6, %v4478_v45, 0.0 }
 0x274   : > { %3613 = vst.msk [vmem:[%s5853_s8 + $0xc0] sm:$0xff] %vm346_vm6, %v3558_v46  ;;  %v3668_v47 = vsel %vm346_vm6, %v3558_v46, 0.0  ;;  %v3716_v48 = vmul.f32 %v3558_v46, %v3558_v46  ;;  %v4479_v49 = vpop.f32.mrb[10].mxu1 }
 0x275   : > { %v3669_v50 = vadd.f32 %v3668_v47, %v3667_v42  ;;  %3616 = vst.msk [vmem:[%s5853_s8 + $0xd8] sm:$0xff] %vm346_vm6, %v4479_v49  ;;  %v3561_v51 = vpop.f32.mrb[11].mxu1  ;;  %v3719_v63 = vmul.f32 %v4479_v49, %v4479_v49  ;;  %v3775_v4 = vsel %vm346_vm6, %v3718_v52, 0.0  ;;  %v3674_v6 = vsel %vm346_vm6, %v4479_v49, 0.0 }
 0x276   : > { %v3771_v54 = vsel %vm346_vm6, %v3716_v48, 0.0  ;;  %3614 = vst.msk [vmem:[%s5853_s8 + $0xc8] sm:$0xff] %vm346_vm6, %v3561_v51  ;;  %v3670_v55 = vsel %vm346_vm6, %v3561_v51, 0.0  ;;  %v3717_v57 = vmul.f32 %v3561_v51, %v3561_v51 }
 0x277   : > { %v3772_v58 = vadd.f32 %v3771_v54, %v3770_v44  ;;  %v3671_v59 = vadd.f32 %v3670_v55, %v3669_v50  ;;  %v3777_v9 = vsel %vm346_vm6, %v3719_v63, 0.0 }
 0x278   : > { %v3773_v1 = vsel %vm346_vm6, %v3717_v57, 0.0 }
 0x279   : > { %v3673_v2 = vadd.f32 %v3672_v61, %v3671_v59  ;;  %v3774_v3 = vadd.f32 %v3773_v1, %v3772_v58 }
 0x27b   : > { %v3776_v7 = vadd.f32 %v3775_v4, %v3774_v3  ;;  %v3675_v8 = vadd.f32 %v3674_v6, %v3673_v2 }
 0x27d   : > { %v3778_v56 = vadd.f32 %v3777_v9, %v3776_v7 }
 0x294   : > { %v4482_v62 = vpop.f32.mrb[12].mxu1 }
 0x295   : > { %3619 = vst.msk [vmem:[%s5853_s8 + $0xf0] sm:$0xff] %vm346_vm6, %v4482_v62  ;;  %v3574_v5 = vpop.f32.mrb[13].mxu1  ;;  %v3722_v15 = vmul.f32 %v4482_v62, %v4482_v62  ;;  %v3680_v19 = vsel %vm346_vm6, %v4482_v62, 0.0 }
 0x296   : > { %3617 = vst.msk [vmem:[%s5853_s8 + $0xe0] sm:$0xff] %vm346_vm6, %v3574_v5  ;;  %v3676_v10 = vsel %vm346_vm6, %v3574_v5, 0.0  ;;  %v3720_v11 = vmul.f32 %v3574_v5, %v3574_v5  ;;  %v4483_v12 = vpop.f32.mrb[14].mxu1 }
 0x297   : > { %v3677_v13 = vadd.f32 %v3676_v10, %v3675_v8  ;;  %3620 = vst.msk [vmem:[%s5853_s8 + $0xf8] sm:$0xff] %vm346_vm6, %v4483_v12  ;;  %v3577_v28 = vpop.f32.mrb[15].mxu1  ;;  %v3723_v20 = vmul.f32 %v4483_v12, %v4483_v12  ;;  %v3783_v24 = vsel %vm346_vm6, %v3722_v15, 0.0  ;;  %v3682_v25 = vsel %vm346_vm6, %v4483_v12, 0.0 }
 0x298   : > { %v3779_v60 = vsel %vm346_vm6, %v3720_v11, 0.0  ;;  %3618 = vst.msk [vmem:[%s5853_s8 + $0xe8] sm:$0xff] %vm346_vm6, %v3577_v28  ;;  %v3678_v16 = vsel %vm346_vm6, %v3577_v28, 0.0  ;;  %v3721_v17 = vmul.f32 %v3577_v28, %v3577_v28 }
 0x299   : > { %v3780_v18 = vadd.f32 %v3779_v60, %v3778_v56  ;;  %v3679_v14 = vadd.f32 %v3678_v16, %v3677_v13  ;;  %v3785_v29 = vsel %vm346_vm6, %v3723_v20, 0.0 }
 0x29a   : > { %v3781_v21 = vsel %vm346_vm6, %v3721_v17, 0.0 }
 0x29b   : > { %v3681_v22 = vadd.f32 %v3680_v19, %v3679_v14  ;;  %v3782_v23 = vadd.f32 %v3781_v21, %v3780_v18 }
 0x29d   : > { %v3683_v26 = vadd.f32 %v3682_v25, %v3681_v22  ;;  %v3784_v27 = vadd.f32 %v3783_v24, %v3782_v23 }
 0x29f   : > { %v3684_v30 = vrot.slane %v3683_v26, 4  ;;  %v3786_v31 = vadd.f32 %v3785_v29, %v3784_v27 }
 0x2a1   : > { %v3685_v32 = vadd.f32 %v3684_v30, %v3683_v26  ;;  %v3787_v33 = vrot.slane %v3786_v31, 4 }
 0x2a3   : > { %v3686_v35 = vrot.slane %v3685_v32, 2  ;;  %v3788_v34 = vadd.f32 %v3787_v33, %v3786_v31 }
 0x2a5   : > { %v3687_v53 = vadd.f32 %v3686_v35, %v3685_v32  ;;  %v3789_v41 = vrot.slane %v3788_v34, 2 }
 0x2a7   : > { %v3688_v0 = vrot.slane %v3687_v53, 1  ;;  %v3790_v36 = vadd.f32 %v3789_v41, %v3788_v34 }
 0x2a9   : > { %v3689_v37 = vadd.f32 %v3688_v0, %v3687_v53  ;;  %v3791_v38 = vrot.slane %v3790_v36, 1 }
 0x2ab   : > { %3691 = vst.msk [vmem:[%s200_s10] sm:$0x1] %vm3690_vm1, %v3689_v37  ;;  %v3792_v39 = vadd.f32 %v3791_v38, %v3790_v36 }
 0x2ac   : > { %4615 = shalt.err (!%p4612_p3)
}
 0x2ad   : > { %s4616_s8 = scalar_lea.hbm %s6012_s29, 16  ;;  %s4620_s23 = scalar_lea.hbm %s6091_s3, 32 }
 0x2ae   : > { %p4617_p4 = scmp.ne.s32.totalorder %s6012_s29, %s4616_s8  ;;  %p4621_p9 = scmp.lt.u32.totalorder %s6012_s29, %s6091_s3 }
 0x2af   : > { %p4622_p10 = scmp.lt.u32.totalorder %s4620_s23, %s4616_s8  ;;  %p4624_p12 = scmp.lt.u32.totalorder %s4616_s8, %s6012_s29 }
 0x2b0   : > { %p4618_p7 = pnand %p4617_p4, %p4771_p5 }
 0x2b1   : > { %p4623_p11 = por %p4622_p10, %p4621_p9 }
 0x2b2   : > { %p4619_p8 = pneg %p4618_p7 }
 0x2b3   : > { %p4625_p13 = por %p4624_p12, %p4623_p11 }
 0x2b5   : > { %p4626_p0 = pnand %p4625_p13, %p4619_p8 }
 0x2b7   : > { %4629 = shalt.err (!%p4626_p0)
}
 0x2b8   : > { %4497 = dma.vmem_to_hbm [thread:$0]  (%p4771_p5), %s6014_s11, 16, %s6012_s29, %s3800_s14   ;;  %3793 = vst.msk [vmem:[%s206_s12] sm:$0x1] %vm3690_vm1, %v3792_v39 }
 0x2b9   : > { %s3804_s30 = scalar_lea.sflag [#allocation6], %s6002_s27  ;;  %s4630_s22 = scalar_lea.vmem %s6022_s20, 16 }
 0x2ba   : > { %p4631_p1 = scmp.ne.s32.totalorder %s6022_s20, %s4630_s22  ;;  %s4707_s5 = smov [#allocation5]  }
 0x2bb   : > { %s4634_s6 = sshll.u32 %s4707_s5, 4  ;;  %s4635_s6 = int_to_ptr.vmem [resolvable:$false] %s4634_s6 }
 0x2bc   : > { %p4632_p2 = pnand %p4631_p1, %p4771_p5  ;;  %s4636_s7 = scalar_lea.vmem %s4635_s6, 32 }
 0x2bd   : > { %p4637_p4 = scmp.lt.s32.totalorder %s6022_s20, %s4635_s6  ;;  %p4638_p7 = scmp.lt.s32.totalorder %s4636_s7, %s4630_s22 }
 0x2be   : > { %p4633_p3 = pneg %p4632_p2 }
 0x2bf   : > { %p4639_p8 = por %p4638_p7, %p4637_p4 }
 0x2c1   : > { %p4640_p9 = pnand %p4639_p8, %p4633_p3 }
 0x2c3   : > { %4643 = shalt.err (!%p4640_p9)
}
 0x2c4   : > { %s4644_s27 = scalar_lea.hbm %s6020_s13, 16  ;;  %s4648_s29 = scalar_lea.hbm %s6092_s4, 32 }
 0x2c5   : > { %p4645_p10 = scmp.ne.s32.totalorder %s6020_s13, %s4644_s27  ;;  %p4649_p13 = scmp.lt.u32.totalorder %s6020_s13, %s6092_s4 }
 0x2c6   : > { %p4650_p0 = scmp.lt.u32.totalorder %s4648_s29, %s4644_s27  ;;  %p4652_p2 = scmp.lt.u32.totalorder %s4644_s27, %s6020_s13 }
 0x2c7   : > { %p4646_p11 = pnand %p4645_p10, %p4771_p5 }
 0x2c8   : > { %p4651_p1 = por %p4650_p0, %p4649_p13 }
 0x2c9   : > { %p4647_p12 = pneg %p4646_p11 }
 0x2ca   : > { %p4653_p3 = por %p4652_p2, %p4651_p1 }
 0x2cc   : > { %p4654_p4 = pnand %p4653_p3, %p4647_p12 }
 0x2ce   : > { %4657 = shalt.err (!%p4654_p4)
}
 0x2cf   : > { %4498 = dma.vmem_to_hbm [thread:$0]  (%p4771_p5), %s6022_s20, 16, %s6020_s13, %s3804_s30  }
 0x2d0 PF: > { %p4508_p7 = scmp.ge.s32.totalorder %s4696_s18, 2  ;;  %s3852_s9 = sand.u32 1, %s4684_s15  }
 0x2d1   : > { %s3853_s10 = scalar_lea.sflag [#allocation4], %s3852_s9 }
 0x2d2   : > { %p4502_p8 = pnand %p4508_p7, %p4775_p6 }
 0x2d4   : > { %4675 = dma.done.wait (!%p4502_p8), %s3853_s10, 16  }
 0x2d5   : > { %4677 = vsyncadd (!%p4502_p8), %s3853_s10, 4294967280  ;;  %s3861_s23 = scalar_lea.sflag [#allocation6], %s3852_s9 }
 0x2d6   : > { %4679 = dma.done.wait (!%p4502_p8), %s3861_s23, 16  }
 0x2d7   : > { %4681 = vsyncadd (!%p4502_p8), %s3861_s23, 4294967280  ;;  %p18_p5 = scmp.ge.s32.totalorder %s4758_s21, 4   ;;  %s6099_s15 = smov %s4688_s16 }
 0x2d8   : > { %s6100_s16 = smov %s4692_s17  ;;  %s6101_s17 = smov %s4769_s24 }
 0x2d9   : > { %s6102_s18 = smov %s4758_s21  ;;  %20 = sbr.rel (!%p18_p5) target bundleno = 5 (0x5), region = 94 }
 0x2e0   :  { %3865 = vsyncpa [#allocation4], 1 }
 0x2e1   :  { %3867 = vsyncpa [#allocation4 + $0x1], 1 }
 0x2e2   :  { %3868 = vsyncpa [#allocation6], 1 }
 0x2e3   :  { %3870 = vsyncpa [#allocation6 + $0x1], 1 }

</bundles_post_ra>
